<compile_context>
chip_gen: v6e
topology: v6e:2x2x1
jax: 0.10.0
libtpu: 0.0.40
codegen_flags: <defaults>
</compile_context>

<pallas_src>
import math
from functools import partial

import jax
import jax.numpy as jnp
from jax.experimental import pallas as pl
from jax.experimental.pallas import tpu as pltpu

N_ITEMS = 256    # item-vocabulary size (input/output dim)
HIDDEN = 128     # encoder output / decoder hidden size
SAMPLE = 64      # latent sample_size
FREE_BITS_ALPHA = 2.0
LOG_2PI = math.log(2.0 * math.pi)


def _softplus(x):
    # matches torch.nn.Softplus (beta=1, threshold=20)
    return jnp.where(x > 20.0, x, jnp.log1p(jnp.exp(jnp.minimum(x, 20.0))))


def multvae_kernel(src_ref, tgt_ref, eps_ref,
                   w_enc_ref, b_enc_ref,
                   w_musig_ref, b_musig_ref,
                   w_dec1_ref, b_dec1_ref,
                   w_dec2_ref, b_dec2_ref,
                   logits_ref, probs_ref, recon_ref, kl_ref):
    src = src_ref[...]
    tgt = tgt_ref[...]

    # F.normalize(source, dim=-1): x / max(||x||_2, 1e-12)  (rsqrt -> EUP)
    sumsq = jnp.sum(src * src, axis=-1, keepdims=True)
    xn = src * jax.lax.rsqrt(jnp.maximum(sumsq, 1e-24))
    # input dropout: identity in eval mode

    # --- encoder: Linear + tanh (bf16 MXU, f32 accumulate) -------------------
    h = jnp.tanh(jnp.dot(xn.astype(jnp.bfloat16), w_enc_ref[...],
                         preferred_element_type=jnp.float32) + b_enc_ref[...])

    # --- reparametrize: fused mu|sigma matmul (N = 2*SAMPLE = 128) -----------
    musig = (jnp.dot(h.astype(jnp.bfloat16), w_musig_ref[...],
                     preferred_element_type=jnp.float32) + b_musig_ref[...])
    mu = musig[:, :SAMPLE]
    sig_pre = musig[:, SAMPLE:]
    sigma = jnp.clip(_softplus(sig_pre), 1e-4, 5.0)   # Softplus -> Hardtanh(1e-4, 5.0)
    z = mu + eps_ref[...] * sigma                     # eval: eps == 0 -> z = mu

    # --- decoder: Linear + tanh, Linear --------------------------------------
    h2 = jnp.tanh(jnp.dot(z.astype(jnp.bfloat16), w_dec1_ref[...],
                          preferred_element_type=jnp.float32) + b_dec1_ref[...])
    logits = (jnp.dot(h2.astype(jnp.bfloat16), w_dec2_ref[...],
                      preferred_element_type=jnp.float32) + b_dec2_ref[...])
    logits_ref[...] = logits

    # --- softmax / log_softmax over items -------------------------------------
    m = jnp.max(logits, axis=-1, keepdims=True)
    ex = jnp.exp(logits - m)
    denom = jnp.sum(ex, axis=-1, keepdims=True)
    probs_ref[...] = ex * pl.reciprocal(denom, approx=True)
    log_probs = (logits - m) - jnp.log(denom)

    # MultinomialLoss (size_average=False): per-example vector (TB, 1)
    recon = -jnp.sum(log_probs * tgt, axis=-1, keepdims=True)

    # posterior log prob under N(mu, sigma); prior log prob under N(0, 1)
    diff = z - mu
    post = -0.5 * jnp.sum(diff * diff / (sigma * sigma)
                          + 2.0 * jnp.log(sigma) + LOG_2PI,
                          axis=-1, keepdims=True)
    prior = -0.5 * jnp.sum(z * z + LOG_2PI, axis=-1, keepdims=True)

    kl = jnp.maximum(post - prior, FREE_BITS_ALPHA)   # free-bits clamp(min=alpha)

    recon_ref[...] = recon
    kl_ref[...] = kl


@partial(jax.jit, static_argnames=("tile_b",))
def multvae_forward(source, target, eps, params, kl_weight, *, tile_b=128):
    (w_enc, b_enc, w_musig, b_musig, w_dec1, b_dec1, w_dec2, b_dec2) = params
    B = source.shape[0]

    if B <= tile_b:
        tb = B                       # single tile covers the batch
    else:
        assert B % tile_b == 0 and tile_b % 8 == 0, "batch must tile evenly (tile % 8 == 0)"
        tb = tile_b
    num_tiles = B // tb

    # batch-tiled arrays
    def batch_spec(feat):
        return pl.BlockSpec((tb, feat), lambda i: (i, 0))

    # weights / biases: constant index map -> VMEM-resident, DMA'd once
    def resident_spec(shape):
        return pl.BlockSpec(shape, lambda i: (0, 0))

    in_arrays = (source, target, eps,
                 w_enc, b_enc, w_musig, b_musig, w_dec1, b_dec1, w_dec2, b_dec2)
    in_specs = [
        batch_spec(N_ITEMS),          # source
        batch_spec(N_ITEMS),          # target
        batch_spec(SAMPLE),           # eps
        resident_spec(w_enc.shape), resident_spec(b_enc.shape),
        resident_spec(w_musig.shape), resident_spec(b_musig.shape),
        resident_spec(w_dec1.shape), resident_spec(b_dec1.shape),
        resident_spec(w_dec2.shape), resident_spec(b_dec2.shape),
    ]

    out_shapes = (
        jax.ShapeDtypeStruct((B, N_ITEMS), jnp.float32),   # logits
        jax.ShapeDtypeStruct((B, N_ITEMS), jnp.float32),   # probs
        jax.ShapeDtypeStruct((B, 1), jnp.float32),         # per-example recon
        jax.ShapeDtypeStruct((B, 1), jnp.float32),         # per-example kl
    )
    out_specs = (
        batch_spec(N_ITEMS),
        batch_spec(N_ITEMS),
        batch_spec(1),
        batch_spec(1),
    )

    # advisory cost estimate for XLA scheduling around the custom call
    weight_elems = N_ITEMS * HIDDEN + HIDDEN * (2 * SAMPLE) + SAMPLE * HIDDEN + HIDDEN * N_ITEMS
    flops = 2 * B * weight_elems
    bytes_accessed = (B * (2 * N_ITEMS * 4 + SAMPLE * 4)        # source, target, eps
                      + weight_elems * 2                        # bf16 weights
                      + (HIDDEN + 2 * SAMPLE + HIDDEN + N_ITEMS) * 4   # biases
                      + B * (2 * N_ITEMS * 4 + 2 * 4))          # logits, probs, recon, kl
    cost = pl.CostEstimate(flops=flops, transcendentals=B * 600,
                           bytes_accessed=bytes_accessed)

    fn = pl.pallas_call(
        multvae_kernel,
        out_shape=out_shapes,
        grid=(num_tiles,),
        in_specs=in_specs,
        out_specs=out_specs,
        compiler_params=pltpu.CompilerParams(
            dimension_semantics=("parallel",)),
        cost_estimate=cost,
    )
    logits, probs, recon, kl = fn(*in_arrays)

    recon_mean = jnp.mean(recon)
    kl_mean = jnp.mean(kl)
    # mean(recon + w*kl) == mean(recon) + w*mean(kl); kl_weight is a runtime scalar.
    loss = recon_mean + kl_weight * kl_mean
    return logits, probs, loss, recon_mean, kl_mean


def init_params(key):
    """Deterministic PyTorch-Linear-style init: U(-1/sqrt(fan_in), 1/sqrt(fan_in)).

    Weights are stored pre-transposed (in, out) and cast to bf16 for the MXU;
    biases stay f32.  mu_net / sigma_net weights are fused along the output dim.
    """
    def linear(k, fan_in, fan_out):
        kw, kb = jax.random.split(k)
        bound = 1.0 / math.sqrt(fan_in)
        w = jax.random.uniform(kw, (fan_in, fan_out), jnp.float32, -bound, bound)
        b = jax.random.uniform(kb, (1, fan_out), jnp.float32, -bound, bound)
        return w, b

    k_enc, k_mu, k_sig, k_dec1, k_dec2 = jax.random.split(key, 5)
    w_enc, b_enc = linear(k_enc, N_ITEMS, HIDDEN)       # encoder
    w_mu, b_mu = linear(k_mu, HIDDEN, SAMPLE)           # mu_net
    w_sig, b_sig = linear(k_sig, HIDDEN, SAMPLE)        # sigma_net (Linear part)
    w_dec1, b_dec1 = linear(k_dec1, SAMPLE, HIDDEN)     # decoder layer 1
    w_dec2, b_dec2 = linear(k_dec2, HIDDEN, N_ITEMS)    # decoder layer 2

    w_musig = jnp.concatenate([w_mu, w_sig], axis=1)    # (HIDDEN, 2*SAMPLE)
    b_musig = jnp.concatenate([b_mu, b_sig], axis=1)    # (1, 2*SAMPLE)

    to_bf16 = lambda w: w.astype(jnp.bfloat16)
    return (to_bf16(w_enc), b_enc,
            to_bf16(w_musig), b_musig,
            to_bf16(w_dec1), b_dec1,
            to_bf16(w_dec2), b_dec2)


if __name__ == "__main__":
    B = 256          # two 128-row batch tiles
    TILE_B = 128

    key = jax.random.PRNGKey(0)
    k_params, k_src, k_tgt = jax.random.split(key, 3)

    params = init_params(k_params)

    # binary implicit-feedback matrices, like VAECollateBatch produces (ne(0).float())
    source = (jax.random.uniform(k_src, (B, N_ITEMS)) < 0.1).astype(jnp.float32)
    target = (jax.random.uniform(k_tgt, (B, N_ITEMS)) < 0.1).astype(jnp.float32)
    eps = jnp.zeros((B, SAMPLE), jnp.float32)           # eval mode: z = mu
    kl_weight = jnp.float32(0.0)                        # KLScheduler weight before any step()

    logits, probs, loss, recon, kl = jax.block_until_ready(
        multvae_forward(source, target, eps, params, kl_weight, tile_b=TILE_B))

    assert logits.shape == (B, N_ITEMS) and probs.shape == (B, N_ITEMS)
    assert loss.shape == () and recon.shape == () and kl.shape == ()
    assert bool(jnp.isfinite(logits).all()) and bool(jnp.isfinite(probs).all())
    assert bool(jnp.isfinite(loss)) and bool(jnp.isfinite(recon)) and bool(jnp.isfinite(kl))

    print("KERNEL_OK")
</pallas_src>

<mosaic_0001>
module attributes {stable_mosaic.version = 11 : i64} {
  func.func @multvae_kernel(%arg0: i32, %arg1: memref<128x256xf32, #tpu.memory_space<vmem>>, %arg2: memref<128x256xf32, #tpu.memory_space<vmem>>, %arg3: memref<128x64xf32, #tpu.memory_space<vmem>>, %arg4: memref<256x128xbf16, #tpu.memory_space<vmem>>, %arg5: memref<1x128xf32, #tpu.memory_space<vmem>>, %arg6: memref<128x128xbf16, #tpu.memory_space<vmem>>, %arg7: memref<1x128xf32, #tpu.memory_space<vmem>>, %arg8: memref<64x128xbf16, #tpu.memory_space<vmem>>, %arg9: memref<1x128xf32, #tpu.memory_space<vmem>>, %arg10: memref<128x256xbf16, #tpu.memory_space<vmem>>, %arg11: memref<1x256xf32, #tpu.memory_space<vmem>>, %arg12: memref<128x256xf32, #tpu.memory_space<vmem>>, %arg13: memref<128x256xf32, #tpu.memory_space<vmem>>, %arg14: memref<128x1xf32, #tpu.memory_space<vmem>>, %arg15: memref<128x1xf32, #tpu.memory_space<vmem>>) attributes {dimension_semantics = [#tpu.dimension_semantics<parallel>], iteration_bounds = array<i64: 2>, scalar_prefetch = 0 : i64, scratch_operands = 0 : i64, tpu.core_type = #tpu.core_type<tc>, window_params = [{transform_indices = @transform_0, window_bounds = array<i64: 128, 256>}, {transform_indices = @transform_1, window_bounds = array<i64: 128, 256>}, {transform_indices = @transform_2, window_bounds = array<i64: 128, 64>}, {pipeline_mode = #tpu.pipeline_mode<synchronous>, transform_indices = @transform_3, window_bounds = array<i64: 256, 128>}, {pipeline_mode = #tpu.pipeline_mode<synchronous>, transform_indices = @transform_4, window_bounds = array<i64: 1, 128>}, {pipeline_mode = #tpu.pipeline_mode<synchronous>, transform_indices = @transform_5, window_bounds = array<i64: 128, 128>}, {pipeline_mode = #tpu.pipeline_mode<synchronous>, transform_indices = @transform_6, window_bounds = array<i64: 1, 128>}, {pipeline_mode = #tpu.pipeline_mode<synchronous>, transform_indices = @transform_7, window_bounds = array<i64: 64, 128>}, {pipeline_mode = #tpu.pipeline_mode<synchronous>, transform_indices = @transform_8, window_bounds = array<i64: 1, 128>}, {pipeline_mode = #tpu.pipeline_mode<synchronous>, transform_indices = @transform_9, window_bounds = array<i64: 128, 256>}, {pipeline_mode = #tpu.pipeline_mode<synchronous>, transform_indices = @transform_10, window_bounds = array<i64: 1, 256>}, {transform_indices = @transform_11, window_bounds = array<i64: 128, 256>}, {transform_indices = @transform_12, window_bounds = array<i64: 128, 256>}, {transform_indices = @transform_13, window_bounds = array<i64: 128, 1>}, {transform_indices = @transform_14, window_bounds = array<i64: 128, 1>}]} {
    %c0 = arith.constant 0 : index
    %c0_0 = arith.constant 0 : index
    %0 = vector.load %arg1[%c0, %c0_0] : memref<128x256xf32, #tpu.memory_space<vmem>>, vector<128x256xf32>
    %c0_1 = arith.constant 0 : index
    %c0_2 = arith.constant 0 : index
    %1 = vector.load %arg2[%c0_1, %c0_2] : memref<128x256xf32, #tpu.memory_space<vmem>>, vector<128x256xf32>
    %2 = arith.mulf %0, %0 : vector<128x256xf32>
    %cst = arith.constant dense<0.000000e+00> : vector<128xf32>
    %3 = vector.multi_reduction <add>, %2, %cst [1] : vector<128x256xf32> to vector<128xf32>
    %4 = vector.shape_cast %3 : vector<128xf32> to vector<128x1xf32>
    %cst_3 = arith.constant 1.000000e-24 : f32
    %5 = vector.broadcast %cst_3 : f32 to vector<128x1xf32>
    %6 = arith.maximumf %4, %5 : vector<128x1xf32>
    %7 = math.rsqrt %6 : vector<128x1xf32>
    %8 = vector.broadcast %7 : vector<128x1xf32> to vector<128x256xf32>
    %9 = arith.mulf %0, %8 : vector<128x256xf32>
    %10 = arith.truncf %9 : vector<128x256xf32> to vector<128x256xbf16>
    %c0_4 = arith.constant 0 : index
    %c0_5 = arith.constant 0 : index
    %11 = vector.load %arg4[%c0_4, %c0_5] : memref<256x128xbf16, #tpu.memory_space<vmem>>, vector<256x128xbf16>
    %cst_6 = arith.constant dense<0.000000e+00> : vector<128x128xf32>
    %12 = tpu.matmul %10, %11, %cst_6 {dimension_numbers = #tpu.dot_dimension_numbers<[1], [0], [0], [1], [0, 0, 1, 1], [], []>} : vector<128x256xbf16>, vector<256x128xbf16>, vector<128x128xf32> -> vector<128x128xf32>
    %c0_7 = arith.constant 0 : index
    %c0_8 = arith.constant 0 : index
    %13 = vector.load %arg5[%c0_7, %c0_8] : memref<1x128xf32, #tpu.memory_space<vmem>>, vector<1x128xf32>
    %14 = vector.broadcast %13 : vector<1x128xf32> to vector<128x128xf32>
    %15 = arith.addf %12, %14 : vector<128x128xf32>
    %16 = math.tanh %15 : vector<128x128xf32>
    %17 = arith.truncf %16 : vector<128x128xf32> to vector<128x128xbf16>
    %c0_9 = arith.constant 0 : index
    %c0_10 = arith.constant 0 : index
    %18 = vector.load %arg6[%c0_9, %c0_10] : memref<128x128xbf16, #tpu.memory_space<vmem>>, vector<128x128xbf16>
    %cst_11 = arith.constant dense<0.000000e+00> : vector<128x128xf32>
    %19 = tpu.matmul %17, %18, %cst_11 {dimension_numbers = #tpu.dot_dimension_numbers<[1], [0], [0], [1], [0, 0, 1, 1], [], []>} : vector<128x128xbf16>, vector<128x128xbf16>, vector<128x128xf32> -> vector<128x128xf32>
    %c0_12 = arith.constant 0 : index
    %c0_13 = arith.constant 0 : index
    %20 = vector.load %arg7[%c0_12, %c0_13] : memref<1x128xf32, #tpu.memory_space<vmem>>, vector<1x128xf32>
    %21 = vector.broadcast %20 : vector<1x128xf32> to vector<128x128xf32>
    %22 = arith.addf %19, %21 : vector<128x128xf32>
    %23 = vector.extract_strided_slice %22 {offsets = [0, 0], sizes = [128, 64], strides = [1, 1]} : vector<128x128xf32> to vector<128x64xf32>
    %24 = vector.extract_strided_slice %22 {offsets = [0, 64], sizes = [128, 64], strides = [1, 1]} : vector<128x128xf32> to vector<128x64xf32>
    %cst_14 = arith.constant 2.000000e+01 : f32
    %25 = vector.broadcast %cst_14 : f32 to vector<128x64xf32>
    %26 = arith.cmpf ogt, %24, %25 : vector<128x64xf32>
    %cst_15 = arith.constant 2.000000e+01 : f32
    %27 = vector.broadcast %cst_15 : f32 to vector<128x64xf32>
    %28 = arith.minimumf %24, %27 : vector<128x64xf32>
    %29 = math.exp %28 : vector<128x64xf32>
    %30 = math.log1p %29 : vector<128x64xf32>
    %31 = arith.select %26, %24, %30 : vector<128x64xi1>, vector<128x64xf32>
    %cst_16 = arith.constant 9.99999974E-5 : f32
    %cst_17 = arith.constant 5.000000e+00 : f32
    %32 = vector.broadcast %cst_16 : f32 to vector<128x64xf32>
    %33 = arith.maximumf %32, %31 : vector<128x64xf32>
    %34 = vector.broadcast %cst_17 : f32 to vector<128x64xf32>
    %35 = arith.minimumf %34, %33 : vector<128x64xf32>
    %c0_18 = arith.constant 0 : index
    %c0_19 = arith.constant 0 : index
    %36 = vector.load %arg3[%c0_18, %c0_19] : memref<128x64xf32, #tpu.memory_space<vmem>>, vector<128x64xf32>
    %37 = arith.mulf %36, %35 : vector<128x64xf32>
    %38 = arith.addf %23, %37 : vector<128x64xf32>
    %39 = arith.truncf %38 : vector<128x64xf32> to vector<128x64xbf16>
    %c0_20 = arith.constant 0 : index
    %c0_21 = arith.constant 0 : index
    %40 = vector.load %arg8[%c0_20, %c0_21] : memref<64x128xbf16, #tpu.memory_space<vmem>>, vector<64x128xbf16>
    %cst_22 = arith.constant dense<0.000000e+00> : vector<128x128xf32>
    %41 = tpu.matmul %39, %40, %cst_22 {dimension_numbers = #tpu.dot_dimension_numbers<[1], [0], [0], [1], [0, 0, 1, 1], [], []>} : vector<128x64xbf16>, vector<64x128xbf16>, vector<128x128xf32> -> vector<128x128xf32>
    %c0_23 = arith.constant 0 : index
    %c0_24 = arith.constant 0 : index
    %42 = vector.load %arg9[%c0_23, %c0_24] : memref<1x128xf32, #tpu.memory_space<vmem>>, vector<1x128xf32>
    %43 = vector.broadcast %42 : vector<1x128xf32> to vector<128x128xf32>
    %44 = arith.addf %41, %43 : vector<128x128xf32>
    %45 = math.tanh %44 : vector<128x128xf32>
    %46 = arith.truncf %45 : vector<128x128xf32> to vector<128x128xbf16>
    %c0_25 = arith.constant 0 : index
    %c0_26 = arith.constant 0 : index
    %47 = vector.load %arg10[%c0_25, %c0_26] : memref<128x256xbf16, #tpu.memory_space<vmem>>, vector<128x256xbf16>
    %cst_27 = arith.constant dense<0.000000e+00> : vector<128x256xf32>
    %48 = tpu.matmul %46, %47, %cst_27 {dimension_numbers = #tpu.dot_dimension_numbers<[1], [0], [0], [1], [0, 0, 1, 1], [], []>} : vector<128x128xbf16>, vector<128x256xbf16>, vector<128x256xf32> -> vector<128x256xf32>
    %c0_28 = arith.constant 0 : index
    %c0_29 = arith.constant 0 : index
    %49 = vector.load %arg11[%c0_28, %c0_29] : memref<1x256xf32, #tpu.memory_space<vmem>>, vector<1x256xf32>
    %50 = vector.broadcast %49 : vector<1x256xf32> to vector<128x256xf32>
    %51 = arith.addf %48, %50 : vector<128x256xf32>
    %c0_30 = arith.constant 0 : index
    %c0_31 = arith.constant 0 : index
    %52 = vector.load %arg12[%c0_30, %c0_31] : memref<128x256xf32, #tpu.memory_space<vmem>>, vector<128x256xf32>
    tpu.vector_store %arg12[%c0_30, %c0_31], %51 {strides = array<i32>} : memref<128x256xf32, #tpu.memory_space<vmem>>, vector<128x256xf32>,
    %cst_32 = arith.constant dense<0xFF800000> : vector<128xf32>
    %53 = vector.multi_reduction <maximumf>, %51, %cst_32 [1] : vector<128x256xf32> to vector<128xf32>
    %54 = vector.shape_cast %53 : vector<128xf32> to vector<128x1xf32>
    %55 = vector.broadcast %54 : vector<128x1xf32> to vector<128x256xf32>
    %56 = arith.subf %51, %55 : vector<128x256xf32>
    %57 = math.exp %56 : vector<128x256xf32>
    %cst_33 = arith.constant dense<0.000000e+00> : vector<128xf32>
    %58 = vector.multi_reduction <add>, %57, %cst_33 [1] : vector<128x256xf32> to vector<128xf32>
    %59 = vector.shape_cast %58 : vector<128xf32> to vector<128x1xf32>
    %60 = tpu.reciprocal %59 {approx = true} : vector<128x1xf32> -> vector<128x1xf32>
    %61 = vector.broadcast %60 : vector<128x1xf32> to vector<128x256xf32>
    %62 = arith.mulf %57, %61 : vector<128x256xf32>
    %c0_34 = arith.constant 0 : index
    %c0_35 = arith.constant 0 : index
    %63 = vector.load %arg13[%c0_34, %c0_35] : memref<128x256xf32, #tpu.memory_space<vmem>>, vector<128x256xf32>
    tpu.vector_store %arg13[%c0_34, %c0_35], %62 {strides = array<i32>} : memref<128x256xf32, #tpu.memory_space<vmem>>, vector<128x256xf32>,
    %64 = vector.broadcast %54 : vector<128x1xf32> to vector<128x256xf32>
    %65 = arith.subf %51, %64 : vector<128x256xf32>
    %66 = math.log %59 : vector<128x1xf32>
    %67 = vector.broadcast %66 : vector<128x1xf32> to vector<128x256xf32>
    %68 = arith.subf %65, %67 : vector<128x256xf32>
    %69 = arith.mulf %68, %1 : vector<128x256xf32>
    %cst_36 = arith.constant dense<0.000000e+00> : vector<128xf32>
    %70 = vector.multi_reduction <add>, %69, %cst_36 [1] : vector<128x256xf32> to vector<128xf32>
    %71 = vector.shape_cast %70 : vector<128xf32> to vector<128x1xf32>
    %cst_37 = arith.constant 0.000000e+00 : f32
    %72 = vector.broadcast %cst_37 : f32 to vector<128x1xf32>
    %73 = arith.subf %72, %71 : vector<128x1xf32>
    %74 = arith.subf %38, %23 : vector<128x64xf32>
    %75 = arith.mulf %74, %74 : vector<128x64xf32>
    %76 = arith.mulf %35, %35 : vector<128x64xf32>
    %77 = arith.divf %75, %76 : vector<128x64xf32>
    %78 = math.log %35 : vector<128x64xf32>
    %cst_38 = arith.constant 2.000000e+00 : f32
    %79 = vector.broadcast %cst_38 : f32 to vector<128x64xf32>
    %80 = arith.mulf %79, %78 : vector<128x64xf32>
    %81 = arith.addf %77, %80 : vector<128x64xf32>
    %cst_39 = arith.constant 1.83787704 : f32
    %82 = vector.broadcast %cst_39 : f32 to vector<128x64xf32>
    %83 = arith.addf %81, %82 : vector<128x64xf32>
    %cst_40 = arith.constant dense<0.000000e+00> : vector<128xf32>
    %84 = vector.multi_reduction <add>, %83, %cst_40 [1] : vector<128x64xf32> to vector<128xf32>
    %85 = vector.shape_cast %84 : vector<128xf32> to vector<128x1xf32>
    %cst_41 = arith.constant -5.000000e-01 : f32
    %86 = vector.broadcast %cst_41 : f32 to vector<128x1xf32>
    %87 = arith.mulf %86, %85 : vector<128x1xf32>
    %88 = arith.mulf %38, %38 : vector<128x64xf32>
    %cst_42 = arith.constant 1.83787704 : f32
    %89 = vector.broadcast %cst_42 : f32 to vector<128x64xf32>
    %90 = arith.addf %88, %89 : vector<128x64xf32>
    %cst_43 = arith.constant dense<0.000000e+00> : vector<128xf32>
    %91 = vector.multi_reduction <add>, %90, %cst_43 [1] : vector<128x64xf32> to vector<128xf32>
    %92 = vector.shape_cast %91 : vector<128xf32> to vector<128x1xf32>
    %cst_44 = arith.constant -5.000000e-01 : f32
    %93 = vector.broadcast %cst_44 : f32 to vector<128x1xf32>
    %94 = arith.mulf %93, %92 : vector<128x1xf32>
    %95 = arith.subf %87, %94 : vector<128x1xf32>
    %cst_45 = arith.constant 2.000000e+00 : f32
    %96 = vector.broadcast %cst_45 : f32 to vector<128x1xf32>
    %97 = arith.maximumf %95, %96 : vector<128x1xf32>
    %c0_46 = arith.constant 0 : index
    %c0_47 = arith.constant 0 : index
    %98 = vector.load %arg14[%c0_46, %c0_47] : memref<128x1xf32, #tpu.memory_space<vmem>>, vector<128x1xf32>
    tpu.vector_store %arg14[%c0_46, %c0_47], %73 {strides = array<i32>} : memref<128x1xf32, #tpu.memory_space<vmem>>, vector<128x1xf32>,
    %c0_48 = arith.constant 0 : index
    %c0_49 = arith.constant 0 : index
    %99 = vector.load %arg15[%c0_48, %c0_49] : memref<128x1xf32, #tpu.memory_space<vmem>>, vector<128x1xf32>
    tpu.vector_store %arg15[%c0_48, %c0_49], %97 {strides = array<i32>} : memref<128x1xf32, #tpu.memory_space<vmem>>, vector<128x1xf32>,
    return
  }
  func.func @transform_0(%arg0: i32) -> (i32, i32) {
    %c0_i32 = arith.constant 0 : i32
    %c0_i32_0 = arith.constant 0 : i32
    return %arg0, %c0_i32 : i32, i32
  }
  func.func @transform_1(%arg0: i32) -> (i32, i32) {
    %c0_i32 = arith.constant 0 : i32
    %c0_i32_0 = arith.constant 0 : i32
    return %arg0, %c0_i32 : i32, i32
  }
  func.func @transform_2(%arg0: i32) -> (i32, i32) {
    %c0_i32 = arith.constant 0 : i32
    %c0_i32_0 = arith.constant 0 : i32
    return %arg0, %c0_i32 : i32, i32
  }
  func.func @transform_3(%arg0: i32) -> (i32, i32) {
    %c0_i32 = arith.constant 0 : i32
    %c0_i32_0 = arith.constant 0 : i32
    %c0_i32_1 = arith.constant 0 : i32
    return %c0_i32, %c0_i32_0 : i32, i32
  }
  func.func @transform_4(%arg0: i32) -> (i32, i32) {
    %c0_i32 = arith.constant 0 : i32
    %c0_i32_0 = arith.constant 0 : i32
    %c0_i32_1 = arith.constant 0 : i32
    return %c0_i32, %c0_i32_0 : i32, i32
  }
  func.func @transform_5(%arg0: i32) -> (i32, i32) {
    %c0_i32 = arith.constant 0 : i32
    %c0_i32_0 = arith.constant 0 : i32
    %c0_i32_1 = arith.constant 0 : i32
    return %c0_i32, %c0_i32_0 : i32, i32
  }
  func.func @transform_6(%arg0: i32) -> (i32, i32) {
    %c0_i32 = arith.constant 0 : i32
    %c0_i32_0 = arith.constant 0 : i32
    %c0_i32_1 = arith.constant 0 : i32
    return %c0_i32, %c0_i32_0 : i32, i32
  }
  func.func @transform_7(%arg0: i32) -> (i32, i32) {
    %c0_i32 = arith.constant 0 : i32
    %c0_i32_0 = arith.constant 0 : i32
    %c0_i32_1 = arith.constant 0 : i32
    return %c0_i32, %c0_i32_0 : i32, i32
  }
  func.func @transform_8(%arg0: i32) -> (i32, i32) {
    %c0_i32 = arith.constant 0 : i32
    %c0_i32_0 = arith.constant 0 : i32
    %c0_i32_1 = arith.constant 0 : i32
    return %c0_i32, %c0_i32_0 : i32, i32
  }
  func.func @transform_9(%arg0: i32) -> (i32, i32) {
    %c0_i32 = arith.constant 0 : i32
    %c0_i32_0 = arith.constant 0 : i32
    %c0_i32_1 = arith.constant 0 : i32
    return %c0_i32, %c0_i32_0 : i32, i32
  }
  func.func @transform_10(%arg0: i32) -> (i32, i32) {
    %c0_i32 = arith.constant 0 : i32
    %c0_i32_0 = arith.constant 0 : i32
    %c0_i32_1 = arith.constant 0 : i32
    return %c0_i32, %c0_i32_0 : i32, i32
  }
  func.func @transform_11(%arg0: i32) -> (i32, i32) {
    %c0_i32 = arith.constant 0 : i32
    %c0_i32_0 = arith.constant 0 : i32
    return %arg0, %c0_i32 : i32, i32
  }
  func.func @transform_12(%arg0: i32) -> (i32, i32) {
    %c0_i32 = arith.constant 0 : i32
    %c0_i32_0 = arith.constant 0 : i32
    return %arg0, %c0_i32 : i32, i32
  }
  func.func @transform_13(%arg0: i32) -> (i32, i32) {
    %c0_i32 = arith.constant 0 : i32
    %c0_i32_0 = arith.constant 0 : i32
    return %arg0, %c0_i32 : i32, i32
  }
  func.func @transform_14(%arg0: i32) -> (i32, i32) {
    %c0_i32 = arith.constant 0 : i32
    %c0_i32_0 = arith.constant 0 : i32
    return %arg0, %c0_i32 : i32, i32
  }
}

</mosaic_0001>

<bundles_post_ra>
// kernel: multvae_forward.1
= control target key start
LH: loop header
LB: loop body
LE: loop exit
PB: predicated region body
PF: predicated region fallthrough
CT: control target
= control target key end

     0   :  { %s6202_s0 = inlined_call_operand.hbm [shape: f32[256,256], index: 0, kind: input, shape index: {}]   ;;  %s6203_s1 = inlined_call_operand.hbm [shape: f32[256,256], index: 1, kind: input, shape index: {}]   ;;  %s6204_s2 = inlined_call_operand.vmem [shape: f32[256,64], index: 2, kind: input, shape index: {}]   ;;  %s6205_s3 = inlined_call_operand.vmem [shape: bf16[256,128], index: 3, kind: input, shape index: {}]   ;;  %s6206_s4 = inlined_call_operand.vmem [shape: f32[1,128], index: 4, kind: input, shape index: {}]   ;;  %s6207_s5 = inlined_call_operand.vmem [shape: bf16[128,128], index: 5, kind: input, shape index: {}]   ;;  %s6208_s6 = inlined_call_operand.vmem [shape: f32[1,128], index: 6, kind: input, shape index: {}]   ;;  %s6209_s7 = inlined_call_operand.vmem [shape: bf16[64,128], index: 7, kind: input, shape index: {}]   ;;  %s6210_s8 = inlined_call_operand.vmem [shape: f32[1,128], index: 8, kind: input, shape index: {}]   ;;  %s6211_s9 = inlined_call_operand.vmem [shape: bf16[128,256], index: 9, kind: input, shape index: {}]   ;;  %s6212_s10 = inlined_call_operand.vmem [shape: f32[1,256], index: 10, kind: input, shape index: {}]   ;;  %s6213_s11 = inlined_call_operand.hbm [shape: f32[256,256], index: 11, kind: output, shape index: {0}]   ;;  %s6214_s12 = inlined_call_operand.hbm [shape: f32[256,256], index: 12, kind: output, shape index: {1}]   ;;  %s6215_s13 = inlined_call_operand.vmem [shape: f32[256,1], index: 13, kind: output, shape index: {2}]   ;;  %s6216_s14 = inlined_call_operand.vmem [shape: f32[256,1], index: 14, kind: output, shape index: {3}]  }
   0x1   :  { %6288 = sst [smem:[#allocation78_spill]] %s6202_s0 }
   0x2   :  { %6289 = sst [smem:[#allocation79_spill]] %s6213_s11 }
   0x3   :  { %6290 = sst [smem:[#allocation80_spill]] %s6214_s12 }
   0x4   :  { %6291 = sst [smem:[#allocation81_spill]] %s6215_s13 }
   0x5   :  { %20 = vsyncpa [#allocation3], 0 }
   0x6   :  { %22 = vsyncpa [#allocation3 + $0x1], 0 }
   0x7   :  { %23 = vsyncpa [#allocation6], 0 }
   0x8   :  { %25 = vsyncpa [#allocation6 + $0x1], 0 }
   0x9   :  { %26 = vsyncpa [#allocation4], 0 }
   0xa   :  { %28 = vsyncpa [#allocation4 + $0x1], 0 }
   0xb   :  { %29 = vsyncpa [#allocation9], 0 }
   0xc   :  { %31 = vsyncpa [#allocation9 + $0x1], 0  ;;  %s4210_s29 = smov 0   ;;  %s4212_s30 = smov 0  }
   0xd   :  { %s4214_s15 = smov 0   ;;  %s4216_s16 = smov 0  }
   0xe LB: > { %6292 = sst [smem:[#allocation14_spill]] %s4111_s29  ;;  %s4231_s17 = sadd.s32 4294967295, %s4123_s16   ;;  %s4123_s16 = sphi %s4216_s16, %s6457_s16   ;;  %s4119_s15 = sphi %s4214_s15, %s6459_s15   ;;  %s4115_s30 = sphi %s4212_s30, %s6461_s30   ;;  %s4111_s29 = sphi %s4210_s29, %s6460_s29  }
   0xf   : > { %6293 = sst [smem:[#allocation15_spill]] %s4119_s15  ;;  %s3244_s18 = sadd.s32 4294967294, %s4123_s16  }
  0x10   : > { %s4235_s19 = sadd.s32 1, %s4123_s16   ;;  %s44_s20 = sadd.s32 1, %s4119_s15 }
  0x11   : > { %6294 = sst [smem:[#allocation16_spill]] %s4235_s19  ;;  %s41_s21 = ssub.s32 %s4123_s16, %s4235_s19 }
  0x12   : > { %p51_p0 = scmp.ne.s32.totalorder %s4119_s15, %s4115_s30  ;;  %p42_p1 = scmp.eq.s32.totalorder %s41_s21, 0 }
  0x13   : > { %p52_p2 = scmp.eq.s32.totalorder %s4123_s16, 0  ;;  %p57_p3 = scmp.ne.s32.totalorder %s4115_s30, %s4111_s29 }
  0x14   : > { %p58_p4 = scmp.eq.s32.totalorder %s4231_s17, 0  ;;  %p301_p7 = scmp.eq.s32.totalorder %s4231_s17, 1 }
  0x15   : > { %s4247_s22 = scalar_select %p42_p1, %s4119_s15, %s44_s20  }
  0x16   : > { %p4249_p5 = por %p52_p2, %p51_p0  ;;  %p4253_p6 = por %p58_p4, %p57_p3 }
  0x17   : > { %6295 = sst [smem:[#allocation17_spill]] %s4247_s22  ;;  %p307_p8 = scmp.eq.s32.totalorder %s3244_s18, 1 }
  0x18   : > { %s6297_s24 = scalar_select %p4253_p6, 1, 0 }
  0x19   : > { %p3525_p10 = scmp.lt.s32.totalorder %s4123_s16, 2  ;;  %p4260_p11 = por %p301_p7, %p51_p0 }
  0x1a   : > { %p4264_p12 = por %p307_p8, %p57_p3  ;;  %s4269_s27 = sand.u32 1, %s4119_s15  }
  0x1b   : > { %s6298_s25 = scalar_select %p4260_p11, 1, 0 }
  0x1c   : > { %s6299_s26 = scalar_select %p4264_p12, 1, 0 }
  0x1d   : > { %s6223_s28 = sshll.u32 %s4123_s16, 12  ;;  %s6222_s20 = sshll.u32 %s4269_s27, 8 }
  0x1e   : > { %6300 = sst [smem:[#allocation18_spill]] %s6299_s26  ;;  %s433_s19 = scalar_lea.vmem [#allocation2], %s6222_s20 }
  0x1f   : > { %s6301_s0 = sld [smem:[#allocation78_spill]]  ;;  %s441_s29 = sshll.u32 %s433_s19, 4  ;;  %s4288_s29 = int_to_ptr.vmem [resolvable:$true] %s441_s29 }
  0x20   : > { %p4284_p13 = pnand %p3525_p10, %p4249_p5 }
  0x22   : > { %p3971_p1 = pneg %p4284_p13 }
  0x25   : > { %s4278_s22 = scalar_lea.hbm %s6301_s0, %s6223_s28  ;;  %s3974_s23 = scalar_lea.hbm %s6301_s0, 8192 }
  0x26   : > { %s3969_s13 = scalar_lea.hbm %s4278_s22, 4096  ;;  %p3975_p4 = scmp.lt.s32.totalorder %s4278_s22, %s6301_s0 }
  0x27   : > { %p3970_p0 = scmp.ne.s32.totalorder %s4278_s22, %s3969_s13  ;;  %p3976_p5 = scmp.lt.s32.totalorder %s3974_s23, %s3969_s13 }
  0x29   : > { %p3972_p2 = pnand %p3971_p1, %p3970_p0  ;;  %p3977_p7 = por %p3976_p5, %p3975_p4 }
  0x2b   : > { %p3973_p3 = pneg %p3972_p2 }
  0x2d   : > { %p3978_p8 = pnand %p3977_p7, %p3973_p3 }
  0x2f   : > { %3981 = shalt.err (!%p3978_p8)
}
  0x30   : > { %s3982_s28 = scalar_lea.vmem %s4288_s29, 4096  ;;  %s4125_s21 = smov [#allocation2]  }
  0x31   : > { %p3983_p10 = scmp.ne.s32.totalorder %s4288_s29, %s3982_s28  ;;  %s3987_s19 = sshll.u32 %s4125_s21, 4  ;;  %s3988_s19 = int_to_ptr.vmem [resolvable:$false] %s3987_s19 }
  0x32   : > { %s3989_s26 = scalar_lea.vmem %s3988_s19, 8192  ;;  %p3990_p9 = scmp.lt.s32.totalorder %s4288_s29, %s3988_s19 }
  0x33   : > { %p3985_p0 = pnand %p3983_p10, %p3971_p1  ;;  %p3991_p12 = scmp.lt.s32.totalorder %s3989_s26, %s3982_s28 }
  0x35   : > { %p3986_p2 = pneg %p3985_p0  ;;  %p3992_p11 = por %p3991_p12, %p3990_p9 }
  0x37   : > { %p3993_p4 = pnand %p3992_p11, %p3986_p2 }
  0x39   : > { %3996 = shalt.err (!%p3993_p4)
}
  0x3a   : > { %s6227_s13 = smov 256   ;;  %s4127_s20 = smov 16  }
  0x3b   : > { %s6303_s26 = scalar_lea.sflag [#allocation3], %s4269_s27  ;;  %p3255_p9 = scmp.ge.s32.totalorder %s4123_s16, 1 }
  0x3c   : > { %3514 = dma.hbm_to_vmem [thread:$0]  (!%p4284_p13), %s4278_s22, 4096, %s4288_s29, %s6303_s26, %s6227_s13, %s6227_s13, %s4127_s20  }
  0x3d   : > { %p480_p11 = scmp.lt.s32.totalorder %s4123_s16, 3  ;;  %s6305_s23 = sshll.u32 %s4123_s16, 12 }
  0x3e   : > { %s4331_s19 = scalar_lea.hbm %s6203_s1, %s6305_s23  ;;  %s6306_s0 = sshll.u32 %s4269_s27, 8 }
  0x3f   : > { %p4322_p12 = pnand %p3255_p9, %p480_p11  ;;  %s455_s12 = scalar_lea.vmem [#allocation5], %s6306_s0 }
  0x40   : > { %s463_s11 = sshll.u32 %s455_s12, 4  ;;  %s452_s29 = scalar_lea.sflag [#allocation6], %s4269_s27  ;;  %s4335_s11 = int_to_ptr.vmem [resolvable:$true] %s463_s11 }
  0x41   : > { %s3997_s22 = scalar_lea.hbm %s4331_s19, 4096  ;;  %s4002_s23 = scalar_lea.hbm %s6203_s1, 8192 }
  0x42   : > { %p3998_p3 = scmp.ne.s32.totalorder %s4331_s19, %s3997_s22  ;;  %p4003_p8 = scmp.lt.s32.totalorder %s4331_s19, %s6203_s1 }
  0x43   : > { %p4004_p10 = scmp.lt.s32.totalorder %s4002_s23, %s3997_s22 }
  0x44   : > { %p4000_p5 = pnand %p3998_p3, %p3971_p1 }
  0x45   : > { %p4005_p0 = por %p4004_p10, %p4003_p8 }
  0x46   : > { %p4001_p7 = pneg %p4000_p5 }
  0x48   : > { %p4006_p2 = pnand %p4005_p0, %p4001_p7 }
  0x4a   : > { %4009 = shalt.err (!%p4006_p2)
}
  0x4b   : > { %s4010_s0 = scalar_lea.vmem %s4335_s11, 4096  ;;  %s4128_s12 = smov [#allocation5]  }
  0x4c   : > { %p4011_p4 = scmp.ne.s32.totalorder %s4335_s11, %s4010_s0  ;;  %s4015_s27 = sshll.u32 %s4128_s12, 4  ;;  %s4016_s27 = int_to_ptr.vmem [resolvable:$false] %s4015_s27 }
  0x4d   : > { %s4017_s13 = scalar_lea.vmem %s4016_s27, 8192  ;;  %p4018_p3 = scmp.lt.s32.totalorder %s4335_s11, %s4016_s27 }
  0x4e   : > { %p4013_p9 = pnand %p4011_p4, %p3971_p1  ;;  %p4019_p5 = scmp.lt.s32.totalorder %s4017_s13, %s4010_s0 }
  0x50   : > { %p4014_p11 = pneg %p4013_p9  ;;  %p4020_p6 = por %p4019_p5, %p4018_p3 }
  0x52   : > { %p4021_p8 = pnand %p4020_p6, %p4014_p11 }
  0x54   : > { %4024 = shalt.err (!%p4021_p8)
}
  0x55   : > { %s6307_s22 = smov 256   ;;  %484 = sbr.rel (%p4322_p12) target bundleno = 1801 (0x709), region = 64 }
  0x56   : > { %3517 = dma.hbm_to_vmem [thread:$0]  (!%p4284_p13), %s4331_s19, 4096, %s4335_s11, %s452_s29, %s6307_s22, %s6307_s22, %s4127_s20  }
  0x5a   : > { %s4366_s26 = sand.u32 1, %s4115_s30   ;;  %p6308_p6 = scmp.ne.s32.totalorder %s6297_s24, 0 }
  0x5b   : > { %s4369_s23 = sshll.u32 %s4366_s26, 8  ;;  %s487_s18 = scalar_lea.sflag [#allocation3], %s4366_s26 }
  0x5c   : > { %s4373_s15 = scalar_lea.vmem [#allocation2], %s4369_s23 }
  0x5d   : > { %4094 = dma.done.wait (%p6308_p6), %s487_s18, 4096  }
  0x5e   : > { %4096 = vsyncadd (%p6308_p6), %s487_s18, 4294963200  ;;  %s496_s11 = scalar_lea.sflag [#allocation6], %s4366_s26  ;;  %s4381_s20 = scalar_lea.vmem [#allocation5], %s4369_s23 }
  0x5f   : > { %4098 = dma.done.wait (%p6308_p6), %s496_s11, 4096  }
  0x60   : > { %4100 = vsyncadd (%p6308_p6), %s496_s11, 4294963200  ;;  %v4388_v0 = vld [vmem:[%s4373_s15] sm:$0xff]  ;;  %v4391_v1 = vld [vmem:[%s4373_s15 + $0x8] sm:$0xff]  ;;  %s4129_s13 = smov 64   ;;  %s3260_s0 = sshll.u32 %s4231_s17, 4 }
  0x61   : > { %v4394_v2 = vld [vmem:[%s4373_s15 + $0x20] sm:$0xff]  ;;  %v656_v3 = vmul.f32 %v4388_v0, %v4388_v0  ;;  %v657_v4 = vmul.f32 %v4391_v1, %v4391_v1  ;;  %v4401_v5 = vld [vmem:[%s4373_s15 + $0x28] sm:$0xff]  ;;  %v4406_v7 = vld [vmem:[%s4373_s15 + $0x10] sm:$0xff]  ;;  %p572_p13 = scmp.lt.s32.totalorder %s3260_s0, 31  ;;  %s5322_s21 = scalar_lea.vmem [#allocation7], %s4369_s23 }
  0x62   : > { %v660_v6 = vmul.f32 %v4394_v2, %v4394_v2  ;;  %v4409_v8 = vld [vmem:[%s4373_s15 + $0x18] sm:$0xff]  ;;  %v661_v9 = vmul.f32 %v4401_v5, %v4401_v5  ;;  %v658_v10 = vmul.f32 %v4406_v7, %v4406_v7  ;;  %v4418_v12 = vld [vmem:[%s4373_s15 + $0x30] sm:$0xff]  ;;  %v4434_v19 = vld [vmem:[%s4373_s15 + $0x40] sm:$0xff]  ;;  %s6286_s12 = sshll.u32 %s4231_s17, 12  ;;  %s6446_s18 = sld [smem:[#allocation79_spill]] }
  0x63   : > { %v659_v11 = vmul.f32 %v4409_v8, %v4409_v8  ;;  %v4421_v13 = vld [vmem:[%s4373_s15 + $0x38] sm:$0xff]  ;;  %v4424_v14 = vld [vmem:[%s4373_s15 + $0x50] sm:$0xff]  ;;  %v688_v15 = vadd.f32 %v657_v4, %v656_v3  ;;  %v662_v16 = vmul.f32 %v4418_v12, %v4418_v12  ;;  %v4437_v20 = vld [vmem:[%s4373_s15 + $0x48] sm:$0xff]  ;;  %v664_v23 = vmul.f32 %v4434_v19, %v4434_v19  ;;  %s6463_s0 = smov (!%p572_p13, %s3260_s0), 31  ;;  %s3029_s24 = sshll.u32 %s5322_s21, 4  ;;  %s6037_s24 = int_to_ptr.vmem [resolvable:$true] %s3029_s24 }
  0x64   : > { %v663_v17 = vmul.f32 %v4421_v13, %v4421_v13  ;;  %v4431_v18 = vld [vmem:[%s4373_s15 + $0x58] sm:$0xff]  ;;  %v694_v21 = vadd.f32 %v661_v9, %v660_v6  ;;  %v665_v24 = vmul.f32 %v4437_v20, %v4437_v20  ;;  %v666_v26 = vmul.f32 %v4424_v14, %v4424_v14  ;;  %v4448_v28 = vld [vmem:[%s4373_s15 + $0x60] sm:$0xff]  ;;  %v4451_v29 = vld [vmem:[%s4373_s15 + $0x68] sm:$0xff]  ;;  %s4025_s19 = scalar_lea.vmem %s6037_s24, 4096  ;;  %p6447_p12 = scmp.ne.s32.totalorder %s6298_s25, 0 }
  0x65   : > { %689 = vadd.xlane.f32.xlu0 %v688_v15  ;;  %v691_v22 = vadd.f32 %v659_v11, %v658_v10  ;;  %v667_v27 = vmul.f32 %v4431_v18, %v4431_v18  ;;  %v4454_v30 = vld [vmem:[%s4373_s15 + $0x70] sm:$0xff]  ;;  %v4457_v31 = vld [vmem:[%s4373_s15 + $0x78] sm:$0xff]  ;;  %v668_v33 = vmul.f32 %v4448_v28, %v4448_v28  ;;  %v669_v34 = vmul.f32 %v4451_v29, %v4451_v29  ;;  %v4474_v40 = vld [vmem:[%s4373_s15 + $0x80] sm:$0xff]  ;;  %p4026_p1 = scmp.ne.s32.totalorder %s6037_s24, %s4025_s19  ;;  %s4131_s29 = smov [#allocation7]  }
  0x66   : > { %695 = vadd.xlane.f32.xlu1 %v694_v21  ;;  %v697_v25 = vadd.f32 %v663_v17, %v662_v16  ;;  %v700_v32 = vadd.f32 %v665_v24, %v664_v23  ;;  %v4464_v35 = vld [vmem:[%s4373_s15 + $0x90] sm:$0xff]  ;;  %v4467_v36 = vld [vmem:[%s4373_s15 + $0x98] sm:$0xff]  ;;  %v670_v38 = vmul.f32 %v4454_v30, %v4454_v30  ;;  %v671_v39 = vmul.f32 %v4457_v31, %v4457_v31  ;;  %v4477_v41 = vld [vmem:[%s4373_s15 + $0x88] sm:$0xff] }
  0x67   : > { %v703_v37 = vadd.f32 %v667_v27, %v666_v26  ;;  %v3565_v42 = vld [vmem:[%s6205_s3 + $0x78] sm:$0xff]   ;;  %v4483_v43 = vld [vmem:[%s4373_s15 + $0xa0] sm:$0xff]  ;;  %v4486_v44 = vld [vmem:[%s4373_s15 + $0xa8] sm:$0xff]  ;;  %v706_v46 = vadd.f32 %v669_v34, %v668_v33  ;;  %v672_v47 = vmul.f32 %v4474_v40, %v4474_v40  ;;  %v673_v48 = vmul.f32 %v4477_v41, %v4477_v41  ;;  %p4027_p7 = pnand %p4026_p1, %p6447_p12 }
  0x68   : > { %v3566_v45 = vld [vmem:[%s6205_s3 + $0x38] sm:$0xff]   ;;  %v4496_v49 = vld [vmem:[%s4373_s15 + $0xb0] sm:$0xff]  ;;  %3339 = vmatprep.subr.bf16.mxu0 %v3565_v42  ;;  %v709_v52 = vadd.f32 %v671_v39, %v670_v38  ;;  %v674_v53 = vmul.f32 %v4464_v35, %v4464_v35  ;;  %v675_v54 = vmul.f32 %v4467_v36, %v4467_v36  ;;  %v3569_v56 = vld [vmem:[%s6205_s3 + $0x68] sm:$0xff]   ;;  %3487 = vmatprep.subr.bf16.mxu1 %v3565_v42  ;;  %s6034_s11 = scalar_lea.hbm %s6446_s18, %s6286_s12 }
  0x69   : > { %692 = vadd.xlane.f32.xlu0 %v691_v22  ;;  %v4499_v50 = vld [vmem:[%s4373_s15 + $0xb8] sm:$0xff]  ;;  %v3567_v51 = vld [vmem:[%s6205_s3 + $0x70] sm:$0xff]   ;;  %3340 = vmatpush3.bf16.msra.mxu0 %v3566_v45  ;;  %v4515_v57 = vld [vmem:[%s4373_s15 + $0xc0] sm:$0xff]  ;;  %v712_v59 = vadd.f32 %v673_v48, %v672_v47  ;;  %v676_v60 = vmul.f32 %v4483_v43, %v4483_v43  ;;  %v677_v61 = vmul.f32 %v4486_v44, %v4486_v44  ;;  %p4028_p10 = pneg %p4027_p7 }
  0x6a   : > { %698 = vadd.xlane.f32.xlu1 %v697_v25  ;;  %v3568_v55 = vld [vmem:[%s6205_s3 + $0x30] sm:$0xff]   ;;  %3341 = vmatprep.subr.bf16.mxu0 %v3567_v51  ;;  %v4518_v58 = vld [vmem:[%s4373_s15 + $0xc8] sm:$0xff]  ;;  %v4528_v63 = vld [vmem:[%s4373_s15 + $0xd8] sm:$0xff]  ;;  %v715_v3 = vadd.f32 %v675_v54, %v674_v53  ;;  %v678_v4 = vmul.f32 %v4496_v49, %v4496_v49  ;;  %v679_v6 = vmul.f32 %v4499_v50, %v4499_v50 }
  0x6b   : > { %3495 = vmatpush3.bf16.msra.mxu1 %v3566_v45  ;;  %v4525_v62 = vld [vmem:[%s4373_s15 + $0xd0] sm:$0xff]  ;;  %v3570_v9 = vld [vmem:[%s6205_s3 + $0x28] sm:$0xff]   ;;  %v3571_v10 = vld [vmem:[%s6205_s3 + $0x60] sm:$0xff]   ;;  %v718_v16 = vadd.f32 %v677_v61, %v676_v60  ;;  %v680_v17 = vmul.f32 %v4515_v57, %v4515_v57  ;;  %v681_v21 = vmul.f32 %v4518_v58, %v4518_v58  ;;  %v683_v26 = vmul.f32 %v4528_v63, %v4528_v63 }
  0x6c   : > { %3488 = vmatprep.subr.bf16.mxu1 %v3567_v51  ;;  %v4541_v11 = vld [vmem:[%s4373_s15 + $0xe0] sm:$0xff]  ;;  %v4544_v15 = vld [vmem:[%s4373_s15 + $0xe8] sm:$0xff]  ;;  %v4551_v22 = vld [vmem:[%s4373_s15 + $0xf0] sm:$0xff]  ;;  %v721_v24 = vadd.f32 %v679_v6, %v678_v4  ;;  %v682_v25 = vmul.f32 %v4525_v62, %v4525_v62 }
  0x6d   : > { %701 = vadd.xlane.f32.xlu0 %v700_v32  ;;  %3342 = vmatpush3.bf16.msra.mxu0 %v3568_v55  ;;  %v4554_v23 = vld [vmem:[%s4373_s15 + $0xf8] sm:$0xff]  ;;  %v3572_v27 = vld [vmem:[%s6205_s3 + $0x20] sm:$0xff]   ;;  %v724_v33 = vadd.f32 %v681_v21, %v680_v17  ;;  %v684_v34 = vmul.f32 %v4541_v11, %v4541_v11  ;;  %v686_v39 = vmul.f32 %v4551_v22, %v4551_v22  ;;  %v3576_v51 = vld [vmem:[%s6205_s3 + $0x10] sm:$0xff]   ;;  %s5098_s15 = sshll.u32 %s6463_s0, 3 }
  0x6e   : > { %704 = vadd.xlane.f32.xlu1 %v703_v37  ;;  %3343 = vmatprep.subr.bf16.mxu0 %v3569_v56  ;;  %v3573_v32 = vld [vmem:[%s6205_s3 + $0x58] sm:$0xff]   ;;  %v685_v37 = vmul.f32 %v4544_v15, %v4544_v15  ;;  %v727_v38 = vadd.f32 %v683_v26, %v682_v25  ;;  %v687_v42 = vmul.f32 %v4554_v23, %v4554_v23  ;;  %v3578_v53 = vld [vmem:[%s6205_s3 + $0x8] sm:$0xff]   ;;  %v3579_v54 = vld [vmem:[%s6205_s3 + $0x40] sm:$0xff]   ;;  %s5104_s22 = scalar_lea.vmem %s6204_s2, %s5098_s15  ;;  %s6020_s0 = scalar_lea.vmem %s6216_s14, %s5098_s15 }
  0x6f   : > { %3496 = vmatpush3.bf16.msra.mxu1 %v3568_v55  ;;  %v3574_v45 = vld [vmem:[%s6205_s3 + $0x18] sm:$0xff]   ;;  %v3580_v55 = vld [vmem:[%s6205_s3] sm:$0xff]  }
  0x70   : > { %3489 = vmatprep.subr.bf16.mxu1 %v3569_v56  ;;  %v730_v47 = vadd.f32 %v685_v37, %v684_v34  ;;  %v733_v48 = vadd.f32 %v687_v42, %v686_v39 }
  0x71   : > { %707 = vadd.xlane.f32.xlu0 %v706_v46  ;;  %3344 = vmatpush3.bf16.msra.mxu0 %v3570_v9  ;;  %v3575_v46 = vld [vmem:[%s6205_s3 + $0x50] sm:$0xff]  }
  0x72   : > { %710 = vadd.xlane.f32.xlu1 %v709_v52  ;;  %3345 = vmatprep.subr.bf16.mxu0 %v3571_v10  ;;  %v3577_v52 = vld [vmem:[%s6205_s3 + $0x48] sm:$0xff]  }
  0x73   : > { %3497 = vmatpush3.bf16.msra.mxu1 %v3570_v9 }
  0x74   : > { %3490 = vmatprep.subr.bf16.mxu1 %v3571_v10 }
  0x75   : > { %713 = vadd.xlane.f32.xlu0 %v712_v59  ;;  %3346 = vmatpush3.bf16.msra.mxu0 %v3572_v27 }
  0x76   : > { %716 = vadd.xlane.f32.xlu1 %v715_v3  ;;  %3347 = vmatprep.subr.bf16.mxu0 %v3573_v32 }
  0x77   : > { %3498 = vmatpush3.bf16.msra.mxu1 %v3572_v27 }
  0x78   : > { %3491 = vmatprep.subr.bf16.mxu1 %v3573_v32 }
  0x79   : > { %719 = vadd.xlane.f32.xlu0 %v718_v16  ;;  %3348 = vmatpush3.bf16.msra.mxu0 %v3574_v45 }
  0x7a   : > { %722 = vadd.xlane.f32.xlu1 %v721_v24  ;;  %3349 = vmatprep.subr.bf16.mxu0 %v3575_v46 }
  0x7b   : > { %3499 = vmatpush3.bf16.msra.mxu1 %v3574_v45 }
  0x7c   : > { %3492 = vmatprep.subr.bf16.mxu1 %v3575_v46 }
  0x7d   : > { %725 = vadd.xlane.f32.xlu0 %v724_v33  ;;  %3350 = vmatpush3.bf16.msra.mxu0 %v3576_v51 }
  0x7e   : > { %728 = vadd.xlane.f32.xlu1 %v727_v38  ;;  %3351 = vmatprep.subr.bf16.mxu0 %v3577_v52 }
  0x7f   : > { %3500 = vmatpush3.bf16.msra.mxu1 %v3576_v51 }
  0x80   : > { %3493 = vmatprep.subr.bf16.mxu1 %v3577_v52 }
  0x81   : > { %731 = vadd.xlane.f32.xlu0 %v730_v47  ;;  %3352 = vmatpush3.bf16.msra.mxu0 %v3578_v53 }
  0x82   : > { %734 = vadd.xlane.f32.xlu1 %v733_v48  ;;  %3353 = vmatprep.subr.bf16.mxu0 %v3579_v54 }
  0x83   : > { %3501 = vmatpush3.bf16.msra.mxu1 %v3578_v53 }
  0x84   : > { %3494 = vmatprep.subr.bf16.mxu1 %v3579_v54 }
  0x85   : > { %3354 = vmatpush3.bf16.msra.mxu0 %v3580_v55 }
  0x87   : > { %3502 = vmatpush3.bf16.msra.mxu1 %v3580_v55 }
  0xee   : > { %v690_v56 = vpop.xlane.xlu0 %689 }
  0xef   : > { %v736_v59 = vmax.f32 %v690_v56, 1e-24  ;;  %v696_v60 = vpop.xlane.xlu1 %695 }
  0xf0   : > { %v738_v61 = vmax.f32 %v696_v60, 1e-24 }
  0xf1   : > { %3617 = vrsqrt.f32 %v736_v59 }
  0xf2   : > { %3619 = vrsqrt.f32 %v738_v61  ;;  %v693_v3 = vpop.xlane.xlu0 %692 }
  0xf3   : > { %v737_v4 = vmax.f32 %v693_v3, 1e-24  ;;  %v699_v6 = vpop.xlane.xlu1 %698 }
  0xf4   : > { %v739_v9 = vmax.f32 %v699_v6, 1e-24 }
  0xf5   : > { %3621 = vrsqrt.f32 %v737_v4 }
  0xf6   : > { %3623 = vrsqrt.f32 %v739_v9  ;;  %v702_v10 = vpop.xlane.xlu0 %701 }
  0xf7   : > { %v705_v16 = vpop.xlane.xlu1 %704  ;;  %v740_v17 = vmax.f32 %v702_v10, 1e-24 }
  0xf8   : > { %v741_v21 = vmax.f32 %v705_v16, 1e-24 }
  0xf9   : > { %3625 = vrsqrt.f32 %v740_v17 }
  0xfa   : > { %3627 = vrsqrt.f32 %v741_v21  ;;  %v708_v24 = vpop.xlane.xlu0 %707 }
  0xfb   : > { %v711_v25 = vpop.xlane.xlu1 %710  ;;  %v742_v26 = vmax.f32 %v708_v24, 1e-24 }
  0xfc   : > { %v743_v27 = vmax.f32 %v711_v25, 1e-24 }
  0xfd   : > { %3629 = vrsqrt.f32 %v742_v26 }
  0xfe   : > { %v3618_v32 = vpop.eup %3617  ;;  %v714_v33 = vpop.xlane.xlu0 %713  ;;  %3631 = vrsqrt.f32 %v743_v27 }
  0xff   : > { %v3620_v34 = vpop.eup %3619  ;;  %v717_v37 = vpop.xlane.xlu1 %716  ;;  %v744_v38 = vmax.f32 %v714_v33, 1e-24  ;;  %v769_v45 = vmul.f32 %v3618_v32, %v4391_v1  ;;  %v768_v52 = vmul.f32 %v3618_v32, %v4388_v0 }
 0x100   : > { %v745_v39 = vmax.f32 %v717_v37, 1e-24  ;;  %v773_v47 = vmul.f32 %v3620_v34, %v4401_v5 }
 0x101   : > { %3633 = vrsqrt.f32 %v744_v38 }
 0x102   : > { %v3622_v42 = vpop.eup %3621  ;;  %3635 = vrsqrt.f32 %v745_v39  ;;  %v720_v46 = vpop.xlane.xlu0 %719 }
 0x103   : > { %v3624_v48 = vpop.eup %3623  ;;  %v771_v51 = vmul.f32 %v3622_v42, %v4409_v8  ;;  %v770_v53 = vmul.f32 %v3622_v42, %v4406_v7  ;;  %v723_v54 = vpop.xlane.xlu1 %722  ;;  %v746_v55 = vmax.f32 %v720_v46, 1e-24 }
 0x104   : > { %v747_v56 = vmax.f32 %v723_v54, 1e-24  ;;  %v775_v59 = vmul.f32 %v3624_v48, %v4421_v13  ;;  %v772_v13 = vmul.f32 %v3620_v34, %v4394_v2  ;;  %v774_v10 = vmul.f32 %v3624_v48, %v4418_v12 }
 0x105   : > { %v801_v60 = vpack.c.bf16 %v771_v51, %v769_v45  ;;  %v800_v61 = vpack.c.bf16 %v770_v53, %v768_v52  ;;  %3637 = vrsqrt.f32 %v746_v55 }
 0x106   : > { %v3626_v3 = vpop.eup %3625  ;;  %3639 = vrsqrt.f32 %v747_v56  ;;  %v803_v1 = vpack.c.bf16 %v775_v59, %v773_v47  ;;  %v726_v4 = vpop.xlane.xlu0 %725  ;;  %v802_v33 = vpack.c.bf16 %v774_v10, %v772_v13 }
 0x107   : > { %v3628_v5 = vpop.eup %3627  ;;  %983 = vmatprep.mubr.bf16.mxu0 %v801_v60  ;;  %v729_v6 = vpop.xlane.xlu1 %728  ;;  %v748_v8 = vmax.f32 %v726_v4, 1e-24  ;;  %v777_v7 = vmul.f32 %v3626_v3, %v4437_v20  ;;  %v776_v12 = vmul.f32 %v3626_v3, %v4434_v19  ;;  %v3587_v4 = vld [vmem:[%s6207_s5 + $0x8] sm:$0xff]  }
 0x108   : > { %984 = vmatmul.mubr.bf16.vlgmr.msra.gmra.mxu0 %v800_v61  ;;  %v749_v0 = vmax.f32 %v729_v6, 1e-24  ;;  %v779_v9 = vmul.f32 %v3628_v5, %v4431_v18  ;;  %v778_v34 = vmul.f32 %v3628_v5, %v4424_v14  ;;  %v3588_v5 = vld [vmem:[%s6207_s5] sm:$0xff]  }
 0x109   : > { %991 = vmatprep.mubr.bf16.mxu0 %v803_v1  ;;  %3641 = vrsqrt.f32 %v748_v8 }
 0x10a   : > { %3643 = vrsqrt.f32 %v749_v0  ;;  %v732_v16 = vpop.xlane.xlu0 %731  ;;  %v3630_v24 = vpop.eup %3629  ;;  %v805_v27 = vpack.c.bf16 %v779_v9, %v777_v7  ;;  %v804_v48 = vpack.c.bf16 %v778_v34, %v776_v12  ;;  %v4654_v0 = vld [vmem:[%s6206_s4] ss:$0 sm:$0xff] }
 0x10b   : > { %v735_v17 = vpop.xlane.xlu1 %734  ;;  %v750_v21 = vmax.f32 %v732_v16, 1e-24  ;;  %v3632_v26 = vpop.eup %3631  ;;  %v781_v39 = vmul.f32 %v3630_v24, %v4451_v29  ;;  %v780_v53 = vmul.f32 %v3630_v24, %v4448_v28 }
 0x10c   : > { %v751_v25 = vmax.f32 %v735_v17, 1e-24  ;;  %v783_v42 = vmul.f32 %v3632_v26, %v4457_v31 }
 0x10d   : > { %3645 = vrsqrt.f32 %v750_v21 }
 0x10e   : > { %v3634_v32 = vpop.eup %3633  ;;  %3647 = vrsqrt.f32 %v751_v25  ;;  %v807_v19 = vpack.c.bf16 %v783_v42, %v781_v39 }
 0x10f   : > { %v3636_v37 = vpop.eup %3635  ;;  %v785_v20 = vmul.f32 %v3634_v32, %v4477_v41  ;;  %v784_v18 = vmul.f32 %v3634_v32, %v4474_v40 }
 0x110   : > { %992 = vmatmul.mubr.bf16.gmra.mxu0 %v802_v33  ;;  %v787_v2 = vmul.f32 %v3636_v37, %v4467_v36  ;;  %v786_v38 = vmul.f32 %v3636_v37, %v4464_v35 }
 0x111   : > { %999 = vmatprep.mubr.bf16.mxu0 %v805_v27 }
 0x112   : > { %v3638_v45 = vpop.eup %3637  ;;  %v809_v46 = vpack.c.bf16 %v787_v2, %v785_v20  ;;  %v808_v47 = vpack.c.bf16 %v786_v38, %v784_v18 }
 0x113   : > { %v3640_v41 = vpop.eup %3639  ;;  %v789_v40 = vmul.f32 %v3638_v45, %v4486_v44  ;;  %v788_v14 = vmul.f32 %v3638_v45, %v4483_v43  ;;  %v782_v44 = vmul.f32 %v3632_v26, %v4454_v30 }
 0x114   : > { %1015 = vmatprep.mubr.bf16.mxu1 %v809_v46  ;;  %v791_v36 = vmul.f32 %v3640_v41, %v4499_v50  ;;  %v790_v35 = vmul.f32 %v3640_v41, %v4496_v49 }
 0x115   : > { %1016 = vmatmul.mubr.bf16.vlgmr.msra.gmra.mxu1 %v808_v47  ;;  %v806_v59 = vpack.c.bf16 %v782_v44, %v780_v53 }
 0x116   : > { %v3642_v51 = vpop.eup %3641  ;;  %v811_v29 = vpack.c.bf16 %v791_v36, %v789_v40  ;;  %v810_v50 = vpack.c.bf16 %v790_v35, %v788_v14 }
 0x117   : > { %v3644_v52 = vpop.eup %3643  ;;  %v793_v31 = vmul.f32 %v3642_v51, %v4518_v58  ;;  %v792_v49 = vmul.f32 %v3642_v51, %v4515_v57  ;;  %v3581_v57 = vld [vmem:[%s6207_s5 + $0x38] sm:$0xff]  }
 0x118   : > { %1000 = vmatmul.mubr.bf16.gmra.mxu0 %v804_v48  ;;  %1023 = vmatprep.mubr.bf16.mxu1 %v811_v29  ;;  %v795_v54 = vmul.f32 %v3644_v52, %v4528_v63  ;;  %v794_v60 = vmul.f32 %v3644_v52, %v4525_v62  ;;  %v3582_v62 = vld [vmem:[%s6207_s5 + $0x30] sm:$0xff]  }
 0x119   : > { %1007 = vmatprep.mubr.bf16.mxu0 %v807_v19  ;;  %3431 = vmatprep.subr.bf16.mxu1 %v3581_v57 }
 0x11a   : > { %v3646_v55 = vpop.eup %3645  ;;  %v813_v56 = vpack.c.bf16 %v795_v54, %v793_v31  ;;  %v812_v30 = vpack.c.bf16 %v794_v60, %v792_v49  ;;  %3432 = vmatpush3.bf16.msra.mxu1 %v3581_v57 }
 0x11b   : > { %v3648_v43 = vpop.eup %3647  ;;  %v797_v58 = vmul.f32 %v3646_v55, %v4544_v15  ;;  %v796_v63 = vmul.f32 %v3646_v55, %v4541_v11  ;;  %3433 = vmatprep.subr.bf16.mxu1 %v3582_v62  ;;  %v3583_v11 = vld [vmem:[%s6207_s5 + $0x28] sm:$0xff]   ;;  %v3584_v15 = vld [vmem:[%s6207_s5 + $0x20] sm:$0xff]  }
 0x11c   : > { %v799_v28 = vmul.f32 %v3648_v43, %v4554_v23  ;;  %v798_v3 = vmul.f32 %v3648_v43, %v4551_v22  ;;  %v3585_v22 = vld [vmem:[%s6207_s5 + $0x18] sm:$0xff]   ;;  %v3586_v23 = vld [vmem:[%s6207_s5 + $0x10] sm:$0xff]  }
 0x11d   : > { %1024 = vmatmul.mubr.bf16.gmra.mxu1 %v810_v50 }
 0x11e   : > { %1031 = vmatprep.mubr.bf16.mxu1 %v813_v56  ;;  %v815_v61 = vpack.c.bf16 %v799_v28, %v797_v58  ;;  %v814_v1 = vpack.c.bf16 %v798_v3, %v796_v63  ;;  %3434 = vmatpush3.bf16.msra.mxu1 %v3582_v62 }
 0x11f   : > { %3435 = vmatprep.subr.bf16.mxu1 %v3583_v11 }
 0x120   : > { %1008 = vmatmul.mubr.bf16.gmra.mxu0 %v806_v59 }
 0x122   : > { %3436 = vmatpush3.bf16.msra.mxu1 %v3583_v11 }
 0x123   : > { %3437 = vmatprep.subr.bf16.mxu1 %v3584_v15 }
 0x125   : > { %1032 = vmatmul.mubr.bf16.gmra.mxu1 %v812_v30 }
 0x126   : > { %1039 = vmatprep.mubr.bf16.mxu1 %v815_v61  ;;  %3438 = vmatpush3.bf16.msra.mxu1 %v3584_v15 }
 0x127   : > { %3439 = vmatprep.subr.bf16.mxu1 %v3585_v22 }
 0x12a   : > { %3440 = vmatpush3.bf16.msra.mxu1 %v3585_v22 }
 0x12b   : > { %3441 = vmatprep.subr.bf16.mxu1 %v3586_v23 }
 0x12d   : > { %1040 = vmatmul.mubr.bf16.gmra.mxu1 %v814_v1 }
 0x12e   : > { %3442 = vmatpush3.bf16.msra.mxu1 %v3586_v23 }
 0x12f   : > { %3443 = vmatprep.subr.bf16.mxu1 %v3587_v4 }
 0x132   : > { %3444 = vmatpush3.bf16.msra.mxu1 %v3587_v4 }
 0x133   : > { %3445 = vmatprep.subr.bf16.mxu1 %v3588_v5 }
 0x136   : > { %3446 = vmatpush3.bf16.msra.mxu1 %v3588_v5 }
 0x1c8   : > { %v3355_v6 = vpop.f32.mrf.mxu0 }
 0x1ca   : > { %v3356_v8 = vpop.f32.mrf.mxu0 }
 0x1cb   : > { %v3357_v7 = vadd.f32 %v3356_v8, %v3355_v6 }
 0x1cc   : > { %v3358_v9 = vpop.f32.mrf.mxu0 }
 0x1cd   : > { %v986_v13 = vadd.f32 %v3357_v7, %v4654_v0 }
 0x1ce   : > { %v3359_v10 = vpop.f32.mrf.mxu0 }
 0x1cf   : > { %v3360_v16 = vadd.f32 %v3359_v10, %v3358_v9  ;;  %3649 = vtanh.f32 %v986_v13 }
 0x1d0   : > { %v3361_v17 = vpop.f32.mrf.mxu0 }
 0x1d1   : > { %v989_v21 = vadd.f32 %v3360_v16, %v4654_v0 }
 0x1d2   : > { %v3362_v24 = vpop.f32.mrf.mxu0 }
 0x1d3   : > { %3651 = vtanh.f32 %v989_v21  ;;  %v3363_v25 = vadd.f32 %v3362_v24, %v3361_v17 }
 0x1d4   : > { %v3364_v26 = vpop.f32.mrf.mxu0 }
 0x1d5   : > { %v3379_v27 = vpop.f32.mrf.mxu1  ;;  %v994_v32 = vadd.f32 %v3363_v25, %v4654_v0 }
 0x1d6   : > { %v3365_v33 = vpop.f32.mrf.mxu0 }
 0x1d7   : > { %v3366_v37 = vadd.f32 %v3365_v33, %v3364_v26  ;;  %v3380_v20 = vpop.f32.mrf.mxu1  ;;  %3653 = vtanh.f32 %v994_v32 }
 0x1d8   : > { %v3367_v18 = vpop.f32.mrf.mxu0  ;;  %v3381_v40 = vadd.f32 %v3380_v20, %v3379_v27 }
 0x1d9   : > { %v997_v2 = vadd.f32 %v3366_v37, %v4654_v0  ;;  %v3382_v12 = vpop.f32.mrf.mxu1 }
 0x1da   : > { %v3368_v34 = vpop.f32.mrf.mxu0  ;;  %v1018_v53 = vadd.f32 %v3381_v40, %v4654_v0 }
 0x1db   : > { %3655 = vtanh.f32 %v997_v2  ;;  %v3369_v38 = vadd.f32 %v3368_v34, %v3367_v18  ;;  %v3383_v39 = vpop.f32.mrf.mxu1 }
 0x1dc   : > { %v3370_v42 = vpop.f32.mrf.mxu0  ;;  %v3650_v41 = vpop.eup %3649  ;;  %v3384_v14 = vadd.f32 %v3383_v39, %v3382_v12 }
 0x1dd   : > { %v3385_v45 = vpop.f32.mrf.mxu1  ;;  %v1002_v46 = vadd.f32 %v3369_v38, %v4654_v0 }
 0x1de   : > { %v3371_v47 = vpop.f32.mrf.mxu0  ;;  %v1021_v50 = vadd.f32 %v3384_v14, %v4654_v0 }
 0x1df   : > { %v3372_v48 = vadd.f32 %v3371_v47, %v3370_v42  ;;  %v3386_v36 = vpop.f32.mrf.mxu1  ;;  %3657 = vtanh.f32 %v1002_v46 }
 0x1e0   : > { %v3652_v19 = vpop.eup %3651  ;;  %v3373_v35 = vpop.f32.mrf.mxu0  ;;  %v3387_v56 = vadd.f32 %v3386_v36, %v3385_v45 }
 0x1e1   : > { %v1005_v51 = vadd.f32 %v3372_v48, %v4654_v0  ;;  %v1064_v29 = vpack.c.bf16 %v3652_v19, %v3650_v41  ;;  %v3388_v52 = vpop.f32.mrf.mxu1 }
 0x1e2   : > { %v3374_v31 = vpop.f32.mrf.mxu0  ;;  %v1026_v3 = vadd.f32 %v3387_v56, %v4654_v0 }
 0x1e3   : > { %3659 = vtanh.f32 %v1005_v51  ;;  %v3375_v44 = vadd.f32 %v3374_v31, %v3373_v35  ;;  %3447 = vmatprep.mubr.bf16.mxu1 %v1064_v29  ;;  %v3389_v54 = vpop.f32.mrf.mxu1 }
 0x1e4   : > { %v3376_v55 = vpop.f32.mrf.mxu0  ;;  %v3390_v60 = vadd.f32 %v3389_v54, %v3388_v52  ;;  %v3654_v58 = vpop.eup %3653  ;;  %3661 = vtanh.f32 %v1018_v53 }
 0x1e5   : > { %v3391_v43 = vpop.f32.mrf.mxu1  ;;  %v1010_v59 = vadd.f32 %v3375_v44, %v4654_v0  ;;  %3663 = vtanh.f32 %v1021_v50 }
 0x1e6   : > { %v3377_v49 = vpop.f32.mrf.mxu0  ;;  %v1029_v11 = vadd.f32 %v3390_v60, %v4654_v0 }
 0x1e7   : > { %v3378_v28 = vadd.f32 %v3377_v49, %v3376_v55  ;;  %v3392_v30 = vpop.f32.mrf.mxu1  ;;  %3665 = vtanh.f32 %v1010_v59 }
 0x1e8   : > { %v3656_v61 = vpop.eup %3655  ;;  %v3393_v63 = vadd.f32 %v3392_v30, %v3391_v43 }
 0x1e9   : > { %v1013_v1 = vadd.f32 %v3378_v28, %v4654_v0  ;;  %v1065_v57 = vpack.c.bf16 %v3656_v61, %v3654_v58  ;;  %v3394_v62 = vpop.f32.mrf.mxu1 }
 0x1ea   : > { %v1034_v15 = vadd.f32 %v3393_v63, %v4654_v0 }
 0x1eb   : > { %3667 = vtanh.f32 %v1013_v1  ;;  %3448 = vmatmul.mubr.bf16.vlgmr.msra.gmra.mxu1 %v1065_v57  ;;  %v3395_v22 = vpop.f32.mrf.mxu1  ;;  %v3589_v1 = vld [vmem:[%s6209_s7 + $0x18] sm:$0xff]   ;;  %v3590_v57 = vld [vmem:[%s6209_s7 + $0x10] sm:$0xff]  }
 0x1ec   : > { %v3396_v23 = vadd.f32 %v3395_v22, %v3394_v62  ;;  %3669 = vtanh.f32 %v1026_v3  ;;  %v3658_v6 = vpop.eup %3657  ;;  %3463 = vmatprep.subr.bf16.mxu1 %v3589_v1 }
 0x1ed   : > { %v3397_v4 = vpop.f32.mrf.mxu1  ;;  %3671 = vtanh.f32 %v1029_v11  ;;  %3464 = vmatpush3.bf16.msra.mxu1 %v3589_v1 }
 0x1ee   : > { %v1037_v5 = vadd.f32 %v3396_v23, %v4654_v0  ;;  %3673 = vtanh.f32 %v1034_v15  ;;  %3465 = vmatprep.subr.bf16.mxu1 %v3590_v57 }
 0x1ef   : > { %v3398_v8 = vpop.f32.mrf.mxu1 }
 0x1f0   : > { %v3660_v7 = vpop.eup %3659  ;;  %3675 = vtanh.f32 %v1037_v5  ;;  %v3399_v9 = vadd.f32 %v3398_v8, %v3397_v4  ;;  %v3591_v8 = vld [vmem:[%s6209_s7 + $0x8] sm:$0xff]  }
 0x1f1   : > { %v1066_v13 = vpack.c.bf16 %v3660_v7, %v3658_v6  ;;  %v3400_v10 = vpop.f32.mrf.mxu1  ;;  %v3662_v21 = vpop.eup %3661  ;;  %3466 = vmatpush3.bf16.msra.mxu1 %v3590_v57 }
 0x1f2   : > { %v1042_v16 = vadd.f32 %v3399_v9, %v4654_v0  ;;  %v3664_v25 = vpop.eup %3663  ;;  %3467 = vmatprep.subr.bf16.mxu1 %v3591_v8 }
 0x1f3   : > { %3451 = vmatprep.mubr.bf16.mxu1 %v1066_v13  ;;  %v3401_v17 = vpop.f32.mrf.mxu1  ;;  %v1068_v33 = vpack.c.bf16 %v3664_v25, %v3662_v21 }
 0x1f4   : > { %v3402_v24 = vadd.f32 %v3401_v17, %v3400_v10  ;;  %v3666_v27 = vpop.eup %3665  ;;  %3677 = vtanh.f32 %v1042_v16 }
 0x1f5   : > { %3468 = vmatpush3.bf16.msra.mxu1 %v3591_v8  ;;  %v3592_v8 = vld [vmem:[%s6209_s7] sm:$0xff]  }
 0x1f6   : > { %v1045_v26 = vadd.f32 %v3402_v24, %v4654_v0  ;;  %v4675_v0 = vld [vmem:[%s6208_s6] ss:$0 sm:$0xff]  ;;  %3469 = vmatprep.subr.bf16.mxu1 %v3592_v8 }
 0x1f8   : > { %v3668_v32 = vpop.eup %3667  ;;  %3679 = vtanh.f32 %v1045_v26 }
 0x1f9   : > { %v1067_v37 = vpack.c.bf16 %v3668_v32, %v3666_v27  ;;  %v3670_v20 = vpop.eup %3669  ;;  %3470 = vmatpush3.bf16.msra.mxu1 %v3592_v8 }
 0x1fa   : > { %v3672_v18 = vpop.eup %3671 }
 0x1fb   : > { %3452 = vmatmul.mubr.bf16.gmra.mxu1 %v1067_v37  ;;  %v3674_v2 = vpop.eup %3673  ;;  %v1069_v34 = vpack.c.bf16 %v3672_v18, %v3670_v20 }
 0x1fc   : > { %3455 = vmatprep.mubr.bf16.mxu1 %v1068_v33 }
 0x1fd   : > { %v3676_v12 = vpop.eup %3675 }
 0x1fe   : > { %v1070_v38 = vpack.c.bf16 %v3676_v12, %v3674_v2 }
 0x201   : > { %v3678_v39 = vpop.eup %3677 }
 0x203   : > { %3456 = vmatmul.mubr.bf16.gmra.mxu1 %v1069_v34 }
 0x204   : > { %3459 = vmatprep.mubr.bf16.mxu1 %v1070_v38 }
 0x205   : > { %v3680_v42 = vpop.eup %3679 }
 0x206   : > { %v1071_v45 = vpack.c.bf16 %v3680_v42, %v3678_v39 }
 0x20b   : > { %3460 = vmatmul.mubr.bf16.gmra.mxu1 %v1071_v45 }
 0x2ab   : > { %v3449_v46 = vpop.f32.mrf.mxu1 }
 0x2ac   : > { %v4678_v47 = vadd.f32 %v3449_v46, %v4675_v0 }
 0x2ad   : > { %v1177_v41 = vpop.f32.mrf.mxu1 }
 0x2ae   : > { %v1258_v40 = vmin.f32 %v4678_v47, 20.0  ;;  %v4682_v48 = vadd.f32 %v4675_v0, %v1177_v41  ;;  %vm1242_vm0 = vcmp.gt.f32.partialorder %v4678_v47, 20.0 }
 0x2af   : > { %v3450_v36 = vpop.f32.mrf.mxu1 }
 0x2b0   : > { %v1276_v19 = vmul.f32 1.442695, %v1258_v40  ;;  %v1256_v14 = vmin.f32 %v4682_v48, 20.0  ;;  %v4686_v35 = vadd.f32 %v3450_v36, %v4675_v0  ;;  %vm1240_vm2 = vcmp.gt.f32.partialorder %v4682_v48, 20.0 }
 0x2b1   : > { %v1180_v51 = vpop.f32.mrf.mxu1 }
 0x2b2   : > { %3681 = vpow2.f32 %v1276_v19  ;;  %v1272_v29 = vmul.f32 1.442695, %v1256_v14  ;;  %v4689_v52 = vadd.f32 %v4675_v0, %v1180_v51  ;;  %v1259_v31 = vmin.f32 %v4686_v35, 20.0 }
 0x2b3   : > { %vm1243_vm6 = vcmp.gt.f32.partialorder %v4686_v35, 20.0 }
 0x2b4   : > { %3683 = vpow2.f32 %v1272_v29  ;;  %v1257_v53 = vmin.f32 %v4689_v52, 20.0  ;;  %v1278_v54 = vmul.f32 1.442695, %v1259_v31  ;;  %vm1241_vm4 = vcmp.gt.f32.partialorder %v4689_v52, 20.0 }
 0x2b6   : > { %v1274_v44 = vmul.f32 1.442695, %v1257_v53 }
 0x2b8   : > { %3685 = vpow2.f32 %v1274_v44 }
 0x2b9   : > { %3687 = vpow2.f32 %v1278_v54 }
 0x2bb   : > { %v3453_v50 = vpop.f32.mrf.mxu1 }
 0x2bc   : > { %v4694_v55 = vadd.f32 %v3453_v50, %v4675_v0 }
 0x2bd   : > { %v1193_v56 = vpop.f32.mrf.mxu1 }
 0x2be   : > { %v1262_v43 = vmin.f32 %v4694_v55, 20.0  ;;  %v4698_v59 = vadd.f32 %v4675_v0, %v1193_v56  ;;  %vm1246_vm9 = vcmp.gt.f32.partialorder %v4694_v55, 20.0 }
 0x2bf   : > { %v4700_v49 = vpop.eup %3681  ;;  %v3454_v60 = vpop.f32.mrf.mxu1 }
 0x2c0   : > { %v1284_v58 = vmul.f32 1.442695, %v1262_v43  ;;  %v1260_v28 = vmin.f32 %v4698_v59, 20.0  ;;  %v4704_v30 = vadd.f32 %v3454_v60, %v4675_v0  ;;  %v1322_v61 = vadd.f32 1.0, %v4700_v49 }
 0x2c1   : > { %v4707_v63 = vpop.eup %3683  ;;  %v1196_v3 = vpop.f32.mrf.mxu1  ;;  %v1325_v16 = vmul.f32 -0.5, %v4700_v49  ;;  %v1328_v12 = vand.u32 2147483647, %v4700_v49  ;;  %vm1244_vm8 = vcmp.gt.f32.partialorder %v4698_v59, 20.0 }
 0x2c2   : > { %3689 = vpow2.f32 %v1284_v58  ;;  %v1280_v62 = vmul.f32 1.442695, %v1260_v28  ;;  %v4716_v11 = vadd.f32 %v4675_v0, %v1196_v3  ;;  %v1304_v22 = vadd.f32 1.0, %v4707_v63 }
 0x2c3   : > { %v3457_v15 = vpop.f32.mrf.mxu1  ;;  %3691 = vlog2.f32 %v1322_v61  ;;  %v1263_v23 = vmin.f32 %v4704_v30, 20.0  ;;  %v1307_v32 = vmul.f32 -0.5, %v4707_v63  ;;  %v1326_v39 = vadd.f32 1.0, %v1325_v16 }
 0x2c4   : > { %3693 = vpow2.f32 %v1280_v62  ;;  %v1261_v4 = vmin.f32 %v4716_v11, 20.0  ;;  %v4727_v9 = vadd.f32 %v3457_v15, %v4675_v0  ;;  %v1310_v42 = vand.u32 2147483647, %v4707_v63 }
 0x2c5   : > { %v4721_v5 = vpop.eup %3685  ;;  %v1209_v6 = vpop.f32.mrf.mxu1  ;;  %3695 = vlog2.f32 %v1304_v22  ;;  %v1286_v24 = vmul.f32 1.442695, %v1263_v23  ;;  %v1308_v46 = vadd.f32 1.0, %v1307_v32  ;;  %vm4757_vm1 = vcmp.lt.f32.partialorder %v1328_v12, 0.0004427343 }
 0x2c6   : > { %v1282_v7 = vmul.f32 1.442695, %v1261_v4  ;;  %6309 = vst [vmem:[#allocation19_spill] sm:$0xff] %v4727_v9  ;;  %v4730_v13 = vadd.f32 %v4675_v0, %v1209_v6  ;;  %v1313_v17 = vadd.f32 1.0, %v4721_v5  ;;  %v4734_v21 = vpop.eup %3687  ;;  %v1266_v33 = vmin.f32 %v4727_v9, 20.0 }
 0x2c7   : > { %v3458_v10 = vpop.f32.mrf.mxu1  ;;  %v1331_v34 = vadd.f32 1.0, %v4734_v21  ;;  %v1316_v41 = vmul.f32 -0.5, %v4721_v5  ;;  %v1327_v54 = vmul.f32 %v4700_v49, %v1326_v39  ;;  %vm4764_vm3 = vcmp.lt.f32.partialorder %v1310_v42, 0.0004427343 }
 0x2c8   : > { %3697 = vpow2.f32 %v1282_v7  ;;  %v1264_v25 = vmin.f32 %v4730_v13, 20.0  ;;  %v4738_v26 = vadd.f32 %v3458_v10, %v4675_v0  ;;  %v1292_v40 = vmul.f32 1.442695, %v1266_v33 }
 0x2c9   : > { %v1212_v27 = vpop.f32.mrf.mxu1  ;;  %3699 = vlog2.f32 %v1313_v17  ;;  %v1309_v58 = vmul.f32 %v4707_v63, %v1308_v46  ;;  %v1317_v28 = vadd.f32 1.0, %v1316_v41  ;;  %v1319_v61 = vand.u32 2147483647, %v4721_v5 }
 0x2ca   : > { %v1288_v37 = vmul.f32 1.442695, %v1264_v25  ;;  %v4743_v20 = vadd.f32 %v4675_v0, %v1212_v27  ;;  %v1267_v18 = vmin.f32 %v4738_v26, 20.0  ;;  %3701 = vpow2.f32 %v1286_v24 }
 0x2cb   : > { %v3461_v2 = vpop.f32.mrf.mxu1  ;;  %3703 = vlog2.f32 %v1331_v34  ;;  %v1334_v57 = vmul.f32 -0.5, %v4734_v21  ;;  %v1318_v25 = vmul.f32 %v4721_v5, %v1317_v28  ;;  %vm4802_vm5 = vcmp.lt.f32.partialorder %v1319_v61, 0.0004427343 }
 0x2cc   : > { %6310 = vst [vmem:[#allocation20_spill] sm:$0xff] %v4743_v20  ;;  %v1265_v38 = vmin.f32 %v4743_v20, 20.0  ;;  %3705 = vpow2.f32 %v1288_v37  ;;  %v1294_v51 = vmul.f32 1.442695, %v1267_v18  ;;  %v4774_v1 = vadd.f32 %v3461_v2, %v4675_v0 }
 0x2cd   : > { %v1225_v45 = vpop.f32.mrf.mxu1  ;;  %v1335_v32 = vadd.f32 1.0, %v1334_v57  ;;  %v1337_v34 = vand.u32 2147483647, %v4734_v21  ;;  %vm1245_vm10 = vcmp.gt.f32.partialorder %v4716_v11, 20.0  ;;  %vm1247_vm14 = vcmp.gt.f32.partialorder %v4704_v30, 20.0 }
 0x2ce   : > { %v1290_v36 = vmul.f32 1.442695, %v1265_v38  ;;  %v4752_v19 = vadd.f32 %v4675_v0, %v1225_v45  ;;  %6316 = vst [vmem:[#allocation22_spill] sm:$0xff] %v4774_v1  ;;  %v1270_v33 = vmin.f32 %v4774_v1, 20.0 }
 0x2cf   : > { %v4754_v14 = vpop.eup %3689  ;;  %v3462_v29 = vpop.f32.mrf.mxu1  ;;  %vm1338_vm7 = vcmp.lt.f32.partialorder %v1337_v34, 0.0004427343 }
 0x2d0   : > { %6311 = vst [vmem:[#allocation21_spill] sm:$0xff] %v4752_v19  ;;  %v3692_v53 = vpop.eup %3691  ;;  %3707 = vpow2.f32 %v1290_v36  ;;  %v1268_v44 = vmin.f32 %v4752_v19, 20.0  ;;  %v4784_v23 = vadd.f32 %v3462_v29, %v4675_v0 }
 0x2d1   : > { %v4768_v56 = vpop.eup %3693  ;;  %v1228_v43 = vpop.f32.mrf.mxu1  ;;  %v1324_v60 = vmul.f32 0.6931472, %v3692_v53  ;;  %3709 = vpow2.f32 %v1292_v40  ;;  %v1336_v53 = vmul.f32 %v4734_v21, %v1335_v32 }
 0x2d2   : > { %v3696_v3 = vpop.eup %3695  ;;  %v4777_v49 = vadd.f32 %v4675_v0, %v1228_v43  ;;  %3711 = vpow2.f32 %v1294_v51  ;;  %v1340_v15 = vadd.f32 1.0, %v4768_v56  ;;  %v1296_v22 = vmul.f32 1.442695, %v1268_v44 }
 0x2d3   : > { %v1330_v62 = vsel %vm4757_vm1, %v1327_v54, %v1324_v60  ;;  %v1306_v63 = vmul.f32 0.6931472, %v3696_v3  ;;  %v1358_v0 = vadd.f32 1.0, %v4754_v14  ;;  %v1271_v39 = vmin.f32 %v4784_v23, 20.0 }
 0x2d4   : > { %v1269_v4 = vmin.f32 %v4777_v49, 20.0  ;;  %v1450_v6 = vsel %vm1242_vm0, %v4678_v47, %v1330_v62  ;;  %3713 = vlog2.f32 %v1340_v15  ;;  %v1343_v40 = vmul.f32 -0.5, %v4768_v56 }
 0x2d5   : > { %v4793_v7 = vpop.eup %3697  ;;  %v1466_v10 = vmax.f32 %v1450_v6, 0.0001  ;;  %v1312_v16 = vsel %vm4764_vm3, %v1309_v58, %v1306_v63  ;;  %3715 = vpow2.f32 %v1296_v22  ;;  %v1300_v51 = vmul.f32 1.442695, %v1270_v33 }
 0x2d6   : > { %v3700_v17 = vpop.eup %3699  ;;  %v1448_v24 = vsel %vm1240_vm2, %v4682_v48, %v1312_v16  ;;  %v1298_v12 = vmul.f32 1.442695, %v1269_v4  ;;  %v1349_v38 = vadd.f32 1.0, %v4793_v7  ;;  %3717 = vlog2.f32 %v1358_v0 }
 0x2d7   : > { %v4807_v37 = vmin.f32 %v1466_v10, 5.0  ;;  %v1464_v18 = vmax.f32 %v1448_v24, 0.0001  ;;  %v1315_v2 = vmul.f32 0.6931472, %v3700_v17  ;;  %v4811_v5 = vpop.eup %3701  ;;  %v1352_v58 = vmul.f32 -0.5, %v4793_v7 }
 0x2d8   : > { %v3704_v46 = vpop.eup %3703  ;;  %3719 = vlog2.f32 %v1349_v38  ;;  %v1367_v44 = vadd.f32 1.0, %v4811_v5  ;;  %v1302_v50 = vmul.f32 1.442695, %v1271_v39  ;;  %v1344_v61 = vadd.f32 1.0, %v1343_v40 }
 0x2d9   : > { %1532 = vrot.lane.b32.xlu1 %v4807_v37, %s4129_s13  ;;  %v4816_v42 = vmin.f32 %v1464_v18, 5.0  ;;  %v1321_v45 = vsel %vm4802_vm5, %v1318_v25, %v1315_v2  ;;  %v4824_v36 = vpop.eup %3705  ;;  %v1333_v31 = vmul.f32 0.6931472, %v3704_v46  ;;  %3721 = vpow2.f32 %v1298_v12 }
 0x2da   : > { %v1449_v41 = vsel %vm1241_vm4, %v4689_v52, %v1321_v45  ;;  %3723 = vlog2.f32 %v1367_v44  ;;  %v1376_v21 = vadd.f32 1.0, %v4824_v36  ;;  %v1346_v62 = vand.u32 2147483647, %v4768_v56 }
 0x2db   : > { %1528 = vrot.lane.b32.xlu0 %v4816_v42, %s4129_s13  ;;  %v1465_v29 = vmax.f32 %v1449_v41, 0.0001  ;;  %v1339_v60 = vsel %vm1338_vm7, %v1336_v53, %v1333_v31  ;;  %3725 = vpow2.f32 %v1300_v51  ;;  %v1361_v63 = vmul.f32 -0.5, %v4754_v14 }
 0x2dc   : > { %v1451_v28 = vsel %vm1243_vm6, %v4686_v35, %v1339_v60  ;;  %v1355_v22 = vand.u32 2147483647, %v4793_v7  ;;  %v1370_v4 = vmul.f32 -0.5, %v4811_v5  ;;  %3727 = vlog2.f32 %v1376_v21 }
 0x2dd   : > { %v4831_v54 = vpop.eup %3707  ;;  %v4833_v43 = vmin.f32 %v1465_v29, 5.0  ;;  %v1467_v57 = vmax.f32 %v1451_v28, 0.0001  ;;  %3729 = vpow2.f32 %v1302_v50  ;;  %v1353_v10 = vadd.f32 1.0, %v1352_v58 }
 0x2de   : > { %v4839_v3 = vpop.eup %3709  ;;  %v1385_v6 = vadd.f32 1.0, %v4831_v54  ;;  %v1364_v16 = vand.u32 2147483647, %v4754_v14  ;;  %v1345_v17 = vmul.f32 %v4768_v56, %v1344_v61  ;;  %v1373_v24 = vand.u32 2147483647, %v4811_v5 }
 0x2df   : > { %1530 = vrot.lane.b32.xlu1 %v4833_v43, %s4129_s13  ;;  %v4845_v15 = vpop.eup %3711  ;;  %v4850_v8 = vmin.f32 %v1467_v57, 5.0  ;;  %vm1347_vm11 = vcmp.lt.f32.partialorder %v1346_v62, 0.0004427343  ;;  %v1362_v27 = vadd.f32 1.0, %v1361_v63  ;;  %v1394_v32 = vadd.f32 1.0, %v4839_v3 }
 0x2e0   : > { %3731 = vlog2.f32 %v1385_v6  ;;  %vm4860_vm12 = vcmp.lt.f32.partialorder %v1355_v22, 0.0004427343  ;;  %v1371_v18 = vadd.f32 1.0, %v1370_v4  ;;  %v1379_v56 = vmul.f32 -0.5, %v4824_v36 }
 0x2e1   : > { %v3714_v0 = vpop.eup %3713  ;;  %v1403_v2 = vadd.f32 1.0, %v4845_v15  ;;  %v1354_v38 = vmul.f32 %v4793_v7, %v1353_v10  ;;  %vm4869_vm13 = vcmp.lt.f32.partialorder %v1364_v16, 0.0004427343  ;;  %3733 = vlog2.f32 %v1394_v32 }
 0x2e2   : > { %v1342_v25 = vmul.f32 0.6931472, %v3714_v0  ;;  %v4866_v12 = vpop.eup %3715  ;;  %vm4877_vm15 = vcmp.lt.f32.partialorder %v1373_v24, 0.0004427343  ;;  %v1382_v40 = vand.u32 2147483647, %v4824_v36  ;;  %v1363_v31 = vmul.f32 %v4754_v14, %v1362_v27 }
 0x2e3   : > { %1534 = vrot.lane.b32.xlu1 %v4850_v8, %s4129_s13  ;;  %v3718_v45 = vpop.eup %3717  ;;  %3735 = vlog2.f32 %v1403_v2  ;;  %v1388_v53 = vmul.f32 -0.5, %v4831_v54  ;;  %v1372_v50 = vmul.f32 %v4811_v5, %v1371_v18  ;;  %vm1248_vm0 = vcmp.gt.f32.partialorder %v4730_v13, 20.0 }
 0x2e4   : > { %v1348_v34 = vsel %vm1347_vm11, %v1345_v17, %v1342_v25  ;;  %v1360_v29 = vmul.f32 0.6931472, %v3718_v45  ;;  %v1380_v60 = vadd.f32 1.0, %v1379_v56  ;;  %v1412_v58 = vadd.f32 1.0, %v4866_v12 }
 0x2e5   : > { %v1452_v46 = vsel %vm1244_vm8, %v4698_v59, %v1348_v34  ;;  %v3720_v7 = vpop.eup %3719  ;;  %v1391_v57 = vand.u32 2147483647, %v4831_v54  ;;  %v1397_v14 = vmul.f32 -0.5, %v4839_v3  ;;  %vm4900_vm1 = vcmp.lt.f32.partialorder %v1382_v40, 0.0004427343 }
 0x2e6   : > { %v1468_v51 = vmax.f32 %v1452_v46, 0.0001  ;;  %v1351_v44 = vmul.f32 0.6931472, %v3720_v7  ;;  %v4887_v28 = vpop.eup %3721  ;;  %v1366_v21 = vsel %vm4869_vm13, %v1363_v31, %v1360_v29  ;;  %vm1249_vm2 = vcmp.gt.f32.partialorder %v4743_v20, 20.0 }
 0x2e7   : > { %v1454_v5 = vsel %vm1246_vm9, %v4694_v55, %v1366_v21  ;;  %3737 = vlog2.f32 %v1412_v58  ;;  %v3724_v22 = vpop.eup %3723  ;;  %v1389_v10 = vadd.f32 1.0, %v1388_v53  ;;  %v1406_v16 = vmul.f32 -0.5, %v4845_v15 }
 0x2e8   : > { %v4889_v61 = vmin.f32 %v1468_v51, 5.0  ;;  %v1357_v62 = vsel %vm4860_vm12, %v1354_v38, %v1351_v44  ;;  %v1470_v6 = vmax.f32 %v1454_v5, 0.0001  ;;  %v4911_v0 = vpop.eup %3725  ;;  %v1369_v24 = vmul.f32 0.6931472, %v3724_v22 }
 0x2e9   : > { %v1453_v4 = vsel %vm1245_vm10, %v4716_v11, %v1357_v62  ;;  %v1381_v25 = vmul.f32 %v4824_v36, %v1380_v60  ;;  %v1421_v27 = vadd.f32 1.0, %v4887_v28  ;;  %v3728_v32 = vpop.eup %3727  ;;  %vm4917_vm3 = vcmp.lt.f32.partialorder %v1391_v57, 0.0004427343 }
 0x2ea   : > { %1536 = vrot.lane.b32.xlu0 %v4889_v61, %s4129_s13  ;;  %v1469_v17 = vmax.f32 %v1453_v4, 0.0001  ;;  %v4915_v33 = vmin.f32 %v1470_v6, 5.0  ;;  %vm1250_vm4 = vcmp.gt.f32.partialorder %v4727_v9, 20.0  ;;  %v1398_v56 = vadd.f32 1.0, %v1397_v14  ;;  %v4923_v34 = vpop.eup %3729 }
 0x2eb   : > { %v1400_v2 = vand.u32 2147483647, %v4839_v3  ;;  %v1375_v36 = vsel %vm4877_vm15, %v1372_v50, %v1369_v24  ;;  %v1378_v39 = vmul.f32 0.6931472, %v3728_v32  ;;  %3739 = vlog2.f32 %v1421_v27 }
 0x2ec   : > { %v4925_v38 = vmin.f32 %v1469_v17, 5.0  ;;  %v1455_v46 = vsel %vm1247_vm14, %v4704_v30, %v1375_v36  ;;  %v1390_v40 = vmul.f32 %v4831_v54, %v1389_v10  ;;  %v1407_v7 = vadd.f32 1.0, %v1406_v16 }
 0x2ed   : > { %v3732_v45 = vpop.eup %3731  ;;  %v1415_v51 = vmul.f32 -0.5, %v4866_v12  ;;  %v1471_v41 = vmax.f32 %v1455_v46, 0.0001  ;;  %v1384_v29 = vsel %vm4900_vm1, %v1381_v25, %v1378_v39  ;;  %v1430_v53 = vadd.f32 1.0, %v4911_v0 }
 0x2ee   : > { %1540 = vrot.lane.b32.xlu0 %v4915_v33, %s4129_s13  ;;  %1538 = vrot.lane.b32.xlu1 %v4925_v38, %s4129_s13  ;;  %v1387_v31 = vmul.f32 0.6931472, %v3732_v45  ;;  %v1456_v44 = vsel %vm1248_vm0, %v4730_v13, %v1384_v29  ;;  %v1399_v50 = vmul.f32 %v4839_v3, %v1398_v56  ;;  %vm4945_vm5 = vcmp.lt.f32.partialorder %v1400_v2, 0.0004427343  ;;  %v3734_v58 = vpop.eup %3733 }
 0x2ef   : > { %v1409_v60 = vand.u32 2147483647, %v4845_v15  ;;  %v4950_v21 = vmin.f32 %v1471_v41, 5.0  ;;  %v1472_v57 = vmax.f32 %v1456_v44, 0.0001  ;;  %3741 = vlog2.f32 %v1430_v53 }
 0x2f0   : > { %v1393_v14 = vsel %vm4917_vm3, %v1390_v40, %v1387_v31  ;;  %v3736_v62 = vpop.eup %3735  ;;  %v1396_v3 = vmul.f32 0.6931472, %v3734_v58  ;;  %v1408_v63 = vmul.f32 %v4845_v15, %v1407_v7  ;;  %v1416_v22 = vadd.f32 1.0, %v1415_v51 }
 0x2f1   : > { %v1457_v5 = vsel %vm1249_vm2, %v4743_v20, %v1393_v14  ;;  %v4960_v4 = vmin.f32 %v1472_v57, 5.0  ;;  %v1405_v10 = vmul.f32 0.6931472, %v3736_v62  ;;  %v1424_v16 = vmul.f32 -0.5, %v4887_v28 }
 0x2f2   : > { %1542 = vrot.lane.b32.xlu1 %v4950_v21, %s4129_s13  ;;  %v1473_v6 = vmax.f32 %v1457_v5, 0.0001  ;;  %v1402_v17 = vsel %vm4945_vm5, %v1399_v50, %v1396_v3  ;;  %vm1410_vm6 = vcmp.lt.f32.partialorder %v1409_v60, 0.0004427343  ;;  %v1418_v24 = vand.u32 2147483647, %v4866_v12 }
 0x2f3   : > { %v1439_v25 = vadd.f32 1.0, %v4923_v34  ;;  %1544 = vrot.lane.b32.xlu0 %v4960_v4, %s4129_s13  ;;  %v1458_v27 = vsel %vm1250_vm4, %v4727_v9, %v1402_v17  ;;  %vm1251_vm7 = vcmp.gt.f32.partialorder %v4738_v26, 20.0  ;;  %v1411_v32 = vsel %vm1410_vm6, %v1408_v63, %v1405_v10 }
 0x2f4   : > { %v4969_v15 = vmin.f32 %v1473_v6, 5.0  ;;  %v3738_v18 = vpop.eup %3737  ;;  %v1474_v56 = vmax.f32 %v1458_v27, 0.0001  ;;  %v1459_v2 = vsel %vm1251_vm7, %v4738_v26, %v1411_v32  ;;  %v1417_v36 = vmul.f32 %v4866_v12, %v1416_v22 }
 0x2f5   : > { %3743 = vlog2.f32 %v1439_v25  ;;  %v1475_v39 = vmax.f32 %v1459_v2, 0.0001  ;;  %v1414_v45 = vmul.f32 0.6931472, %v3738_v18  ;;  %v1425_v46 = vadd.f32 1.0, %v1424_v16 }
 0x2f6   : > { %1546 = vrot.lane.b32.xlu1 %v4969_v15, %s4129_s13  ;;  %v1433_v40 = vmul.f32 -0.5, %v4911_v0  ;;  %v4980_v7 = vmin.f32 %v1474_v56, 5.0  ;;  %vm1419_vm8 = vcmp.lt.f32.partialorder %v1418_v24, 0.0004427343  ;;  %v1427_v51 = vand.u32 2147483647, %v4887_v28 }
 0x2f7   : > { %v4983_v41 = vmin.f32 %v1475_v39, 5.0  ;;  %vm1252_vm9 = vcmp.gt.f32.partialorder %v4752_v19, 20.0  ;;  %v1420_v29 = vsel %vm1419_vm8, %v1417_v36, %v1414_v45  ;;  %v1426_v50 = vmul.f32 %v4887_v28, %v1425_v46 }
 0x2f8   : > { %v3740_v12 = vpop.eup %3739  ;;  %1548 = vrot.lane.b32.xlu0 %v4980_v7, %s4129_s13  ;;  %v1460_v31 = vsel %vm1252_vm9, %v4752_v19, %v1420_v29  ;;  %v1434_v54 = vadd.f32 1.0, %v1433_v40  ;;  %vm1428_vm10 = vcmp.lt.f32.partialorder %v1427_v51, 0.0004427343  ;;  %v1436_v60 = vand.u32 2147483647, %v4911_v0 }
 0x2f9   : > { %v1476_v53 = vmax.f32 %v1460_v31, 0.0001  ;;  %v1423_v44 = vmul.f32 0.6931472, %v3740_v12  ;;  %v1442_v58 = vmul.f32 -0.5, %v4923_v34  ;;  %vm1253_vm11 = vcmp.gt.f32.partialorder %v4777_v49, 20.0 }
 0x2fa   : > { %1550 = vrot.lane.b32.xlu1 %v4983_v41, %s4129_s13  ;;  %v1435_v28 = vmul.f32 %v4911_v0, %v1434_v54  ;;  %vm1437_vm12 = vcmp.lt.f32.partialorder %v1436_v60, 0.0004427343  ;;  %vm1254_vm13 = vcmp.gt.f32.partialorder %v4774_v1, 20.0  ;;  %v1445_v16 = vand.u32 2147483647, %v4923_v34 }
 0x2fb   : > { %v4994_v57 = vmin.f32 %v1476_v53, 5.0  ;;  %v1429_v14 = vsel %vm1428_vm10, %v1426_v50, %v1423_v44  ;;  %v1443_v22 = vadd.f32 1.0, %v1442_v58  ;;  %vm1255_vm15 = vcmp.gt.f32.partialorder %v4784_v23, 20.0 }
 0x2fc   : > { %v3742_v62 = vpop.eup %3741  ;;  %v1461_v5 = vsel %vm1253_vm11, %v4777_v49, %v1429_v14  ;;  %vm1446_vm14 = vcmp.lt.f32.partialorder %v1445_v16, 0.0004427343  ;;  %v2518_v36 = vmul.f32 %v4816_v42, %v4816_v42  ;;  %v2519_v45 = vmul.f32 %v4833_v43, %v4833_v43 }
 0x2fd   : > { %1552 = vrot.lane.b32.xlu0 %v4994_v57, %s4129_s13  ;;  %v1477_v3 = vmax.f32 %v1461_v5, 0.0001  ;;  %v1432_v63 = vmul.f32 0.6931472, %v3742_v62  ;;  %v1444_v32 = vmul.f32 %v4923_v34, %v1443_v22  ;;  %v2522_v34 = vmul.f32 %v4889_v61, %v4889_v61 }
 0x2fe   : > { %v2524_v46 = vmul.f32 %v4915_v33, %v4915_v33  ;;  %3745 = vlog2.f32 %v4816_v42  ;;  %v2520_v40 = vmul.f32 %v4807_v37, %v4807_v37  ;;  %v2526_v51 = vmul.f32 %v4960_v4, %v4960_v4 }
 0x2ff   : > { %v5001_v6 = vmin.f32 %v1477_v3, 5.0  ;;  %v1438_v10 = vsel %vm1437_vm12, %v1435_v28, %v1432_v63  ;;  %3747 = vlog2.f32 %v4807_v37  ;;  %v2521_v29 = vmul.f32 %v4850_v8, %v4850_v8 }
 0x300   : > { %v1462_v17 = vsel %vm1254_vm13, %v4774_v1, %v1438_v10  ;;  %3749 = vlog2.f32 %v4833_v43  ;;  %v2528_v42 = vmul.f32 %v4980_v7, %v4980_v7  ;;  %v2523_v12 = vmul.f32 %v4925_v38, %v4925_v38 }
 0x301   : > { %1554 = vrot.lane.b32.xlu1 %v5001_v6, %s4129_s13  ;;  %v1478_v25 = vmax.f32 %v1462_v17, 0.0001  ;;  %3751 = vlog2.f32 %v4889_v61  ;;  %v2530_v37 = vmul.f32 %v4994_v57, %v4994_v57  ;;  %v2525_v31 = vmul.f32 %v4950_v21, %v4950_v21 }
 0x302   : > { %v3744_v24 = vpop.eup %3743  ;;  %3753 = vlog2.f32 %v4850_v8  ;;  %v2527_v44 = vmul.f32 %v4969_v15, %v4969_v15  ;;  %v2529_v58 = vmul.f32 %v4983_v41, %v4983_v41  ;;  %vm1655_vm0 = vcmask 523264  }
 0x303   : > { %v1441_v27 = vmul.f32 0.6931472, %v3744_v24  ;;  %v5009_v0 = vmin.f32 %v1478_v25, 5.0  ;;  %3755 = vlog2.f32 %v4915_v33  ;;  %vm2966_vm1 = vcmask 7168  }
 0x304   : > { %3757 = vlog2.f32 %v4960_v4 }
 0x305   : > { %v1447_v18 = vsel %vm1446_vm14, %v1444_v32, %v1441_v27  ;;  %1556 = vrot.lane.b32.xlu0 %v5009_v0, %s4129_s13  ;;  %v2532_v8 = vmul.f32 %v5009_v0, %v5009_v0  ;;  %3759 = vlog2.f32 %v4950_v21 }
 0x306   : > { %v1463_v56 = vsel %vm1255_vm15, %v4784_v23, %v1447_v18  ;;  %3761 = vlog2.f32 %v4925_v38  ;;  %v3593_v18 = vld [vmem:[%s6211_s9 + $0x70] ss:$8 sps:$4 sm:$0xff]  }
 0x307   : > { %v1479_v2 = vmax.f32 %v1463_v56, 0.0001  ;;  %v3595_v56 = vld [vmem:[%s6211_s9 + $0x74] ss:$8 sps:$4 sm:$0xff]  }
 0x308   : > { %1909 = vmatprep.subr.bf16.mxu0 %v3595_v56 }
 0x309   : > { %v5017_v39 = vmin.f32 %v1479_v2, 5.0  ;;  %2550 = vrot.lane.b32.xlu0 %v2518_v36, %s4129_s13  ;;  %v3598_v36 = vld [vmem:[%s6211_s9 + $0x64] ss:$8 sps:$4 sm:$0xff]   ;;  %1910 = vmatpush1.bf16.msra.mxu0 %v3593_v18 }
 0x30a   : > { %1911 = vmatprep.subr.bf16.mxu0 %v3598_v36  ;;  %v1505_v36 = vld [vmem:[%s5104_s22 + $0x48] sm:$0xff] }
 0x30b   : > { %1558 = vrot.lane.b32.xlu1 %v5017_v39, %s4129_s13  ;;  %v3746_v43 = vpop.eup %3745  ;;  %v2533_v27 = vmul.f32 %v5017_v39, %v5017_v39 }
 0x30c   : > { %v2631_v61 = vmul.f32 0.6931472, %v3746_v43  ;;  %v3748_v53 = vpop.eup %3747 }
 0x30d   : > { %2558 = vrot.lane.b32.xlu0 %v2522_v34, %s4129_s13  ;;  %v3750_v33 = vpop.eup %3749  ;;  %v2635_v54 = vmul.f32 0.6931472, %v3748_v53  ;;  %v1499_v53 = vld [vmem:[%s5104_s22 + $0x18] sm:$0xff] }
 0x30e   : > { %v2662_v50 = vmul.f32 2.0, %v2631_v61  ;;  %v3752_v60 = vpop.eup %3751  ;;  %v2633_v14 = vmul.f32 0.6931472, %v3750_v33 }
 0x30f   : > { %2552 = vrot.lane.b32.xlu1 %v2519_v45, %s4129_s13  ;;  %v3754_v62 = vpop.eup %3753  ;;  %v2664_v4 = vmul.f32 2.0, %v2635_v54  ;;  %v2639_v5 = vmul.f32 0.6931472, %v3752_v60  ;;  %v3596_v45 = vld [vmem:[%s6211_s9 + $0x60] ss:$8 sps:$4 sm:$0xff]  }
 0x310   : > { %v3756_v21 = vpop.eup %3755  ;;  %v2663_v3 = vmul.f32 2.0, %v2633_v14  ;;  %v2637_v63 = vmul.f32 0.6931472, %v3754_v62  ;;  %1912 = vmatpush1.bf16.msra.mxu0 %v3596_v45 }
 0x311   : > { %2562 = vrot.lane.b32.xlu0 %v2524_v46, %s4129_s13  ;;  %v2666_v28 = vmul.f32 2.0, %v2639_v5  ;;  %v2643_v22 = vmul.f32 0.6931472, %v3756_v21  ;;  %v3758_v10 = vpop.eup %3757  ;;  %v2531_v46 = vmul.f32 %v5001_v6, %v5001_v6  ;;  %v1500_v21 = vld [vmem:[%s5104_s22 + $0x20] sm:$0xff] }
 0x312   : > { %v2665_v16 = vmul.f32 2.0, %v2637_v63  ;;  %v3760_v17 = vpop.eup %3759  ;;  %v2647_v25 = vmul.f32 0.6931472, %v3758_v10 }
 0x313   : > { %2554 = vrot.lane.b32.xlu1 %v2520_v40, %s4129_s13  ;;  %v2668_v24 = vmul.f32 2.0, %v2643_v22  ;;  %v2645_v32 = vmul.f32 0.6931472, %v3760_v17  ;;  %v3762_v34 = vpop.eup %3761  ;;  %v1502_v22 = vld [vmem:[%s5104_s22 + $0x30] sm:$0xff]  ;;  %v1503_v17 = vld [vmem:[%s5104_s22 + $0x38] sm:$0xff] }
 0x314   : > { %v2670_v38 = vmul.f32 2.0, %v2647_v25  ;;  %v2641_v40 = vmul.f32 0.6931472, %v3762_v34 }
 0x315   : > { %2566 = vrot.lane.b32.xlu0 %v2526_v51, %s4129_s13  ;;  %v2669_v2 = vmul.f32 2.0, %v2645_v32 }
 0x316   : > { %v2667_v51 = vmul.f32 2.0, %v2641_v40 }
 0x317   : > { %2556 = vrot.lane.b32.xlu1 %v2521_v29, %s4129_s13 }
 0x319   : > { %2570 = vrot.lane.b32.xlu0 %v2528_v42, %s4129_s13  ;;  %v1496_v42 = vld [vmem:[%s5104_s22] sm:$0xff] }
 0x31b   : > { %2560 = vrot.lane.b32.xlu1 %v2523_v12, %s4129_s13 }
 0x31d   : > { %2574 = vrot.lane.b32.xlu0 %v2530_v37, %s4129_s13  ;;  %v1497_v37 = vld [vmem:[%s5104_s22 + $0x8] sm:$0xff] }
 0x31f   : > { %2564 = vrot.lane.b32.xlu1 %v2525_v31, %s4129_s13  ;;  %v1498_v31 = vld [vmem:[%s5104_s22 + $0x10] sm:$0xff] }
 0x321   : > { %2578 = vrot.lane.b32.xlu0 %v2532_v8, %s4129_s13 }
 0x323   : > { %2568 = vrot.lane.b32.xlu1 %v2527_v44, %s4129_s13 }
 0x325   : > { %2694 = vrot.lane.b32.xlu0 %v2662_v50, %s4129_s13 }
 0x327   : > { %2572 = vrot.lane.b32.xlu1 %v2529_v58, %s4129_s13 }
 0x329   : > { %2698 = vrot.lane.b32.xlu0 %v2664_v4, %s4129_s13 }
 0x32b   : > { %2696 = vrot.lane.b32.xlu1 %v2663_v3, %s4129_s13  ;;  %v1501_v3 = vld [vmem:[%s5104_s22 + $0x28] sm:$0xff] }
 0x32d   : > { %2702 = vrot.lane.b32.xlu0 %v2666_v28, %s4129_s13 }
 0x32f   : > { %2700 = vrot.lane.b32.xlu1 %v2665_v16, %s4129_s13 }
 0x331   : > { %2706 = vrot.lane.b32.xlu0 %v2668_v24, %s4129_s13 }
 0x333   : > { %2580 = vrot.lane.b32.xlu1 %v2533_v27, %s4129_s13 }
 0x335   : > { %2710 = vrot.lane.b32.xlu0 %v2670_v38, %s4129_s13  ;;  %v1504_v38 = vld [vmem:[%s5104_s22 + $0x40] sm:$0xff] }
 0x337   : > { %2708 = vrot.lane.b32.xlu1 %v2669_v2, %s4129_s13 }
 0x33b   : > { %2576 = vrot.lane.b32.xlu1 %v2531_v46, %s4129_s13 }
 0x33f   : > { %2704 = vrot.lane.b32.xlu1 %v2667_v51, %s4129_s13 }
 0x34b   : > { %v1533_v29 = vpop.permute.xlu1 %1532 }
 0x34c   : > { %v1578_v44 = vmul.f32 %v1533_v29, %v1498_v31  ;;  %v1506_v29 = vld [vmem:[%s5104_s22 + $0x50] sm:$0xff] }
 0x34d   : > { %v1529_v12 = vpop.permute.xlu0 %1528 }
 0x34e   : > { %v1576_v43 = vmul.f32 %v1529_v12, %v1496_v42  ;;  %v5119_v14 = vadd.f32 %v1578_v44, %v4678_v47  ;;  %v1507_v12 = vld [vmem:[%s5104_s22 + $0x58] sm:$0xff] }
 0x350   : > { %v5111_v33 = vadd.f32 %v1576_v43, %v4682_v48  ;;  %6332 = vst [vmem:[#allocation24_spill] sm:$0xff] %v5119_v14 }
 0x351   : > { %v1531_v8 = vpop.permute.xlu1 %1530 }
 0x352   : > { %v1577_v61 = vmul.f32 %v1531_v8, %v1497_v37 }
 0x354   : > { %v5114_v50 = vadd.f32 %v1577_v61, %v4689_v52 }
 0x355   : > { %v1535_v54 = vpop.permute.xlu1 %1534 }
 0x356   : > { %6331 = vst [vmem:[#allocation23_spill] sm:$0xff] %v5114_v50  ;;  %v1579_v60 = vmul.f32 %v1535_v54, %v1499_v53  ;;  %v1608_v58 = vpack.c.bf16 %v5114_v50, %v5111_v33 }
 0x358   : > { %v5122_v62 = vadd.f32 %v1579_v60, %v4686_v35  ;;  %3471 = vmatprep.mubr.msk.bf16.mxu1 %vm1655_vm0, %v1608_v58  ;;  %v1508_v58 = vld [vmem:[%s5104_s22 + $0x60] sm:$0xff] }
 0x35a   : > { %6333 = vst [vmem:[#allocation25_spill] sm:$0xff] %v5122_v62  ;;  %v1609_v4 = vpack.c.bf16 %v5122_v62, %v5119_v14 }
 0x35c   : > { %3472 = vmatmul.mubr.msk.bf16.vlgmr.msra.gmra.mxu1 %vm1655_vm0, %v1609_v4  ;;  %v1537_v5 = vpop.permute.xlu0 %1536 }
 0x35d   : > { %v1580_v63 = vmul.f32 %v1537_v5, %v1500_v21  ;;  %v1509_v21 = vld [vmem:[%s5104_s22 + $0x68] sm:$0xff] }
 0x35f   : > { %v5133_v24 = vadd.f32 %v1580_v63, %v4698_v59 }
 0x360   : > { %v1539_v28 = vpop.permute.xlu1 %1538  ;;  %v1541_v10 = vpop.permute.xlu0 %1540 }
 0x361   : > { %v1581_v16 = vmul.f32 %v1539_v28, %v1501_v3  ;;  %6334 = vst [vmem:[#allocation26_spill] sm:$0xff] %v5133_v24  ;;  %v1582_v27 = vmul.f32 %v1541_v10, %v1502_v22 }
 0x363   : > { %v5136_v25 = vadd.f32 %v1581_v16, %v4716_v11  ;;  %v5143_v34 = vadd.f32 %v1582_v27, %v4694_v55 }
 0x364   : > { %v1543_v32 = vpop.permute.xlu1 %1542 }
 0x365   : > { %v1583_v18 = vmul.f32 %v1543_v32, %v1503_v17  ;;  %v1610_v56 = vpack.c.bf16 %v5136_v25, %v5133_v24  ;;  %v1545_v2 = vpop.permute.xlu0 %1544  ;;  %6335 = vst [vmem:[#allocation27_spill] sm:$0xff] %v5143_v34  ;;  %v1510_v17 = vld [vmem:[%s5104_s22 + $0x70] sm:$0xff]  ;;  %v1511_v32 = vld [vmem:[%s5104_s22 + $0x78] sm:$0xff] }
 0x366   : > { %v1584_v46 = vmul.f32 %v1545_v2, %v1504_v38 }
 0x367   : > { %v5146_v45 = vadd.f32 %v1583_v18, %v4704_v30  ;;  %3475 = vmatprep.mubr.msk.bf16.mxu1 %vm1655_vm0, %v1610_v56 }
 0x368   : > { %v1547_v40 = vpop.permute.xlu1 %1546  ;;  %v5154_v37 = vadd.f32 %v1584_v46, %v4730_v13 }
 0x369   : > { %6336 = vst [vmem:[#allocation28_spill] sm:$0xff] %v5146_v45  ;;  %v1585_v51 = vmul.f32 %v1547_v40, %v1505_v36  ;;  %v1611_v42 = vpack.c.bf16 %v5146_v45, %v5143_v34 }
 0x36a   : > { %v1549_v31 = vpop.permute.xlu0 %1548 }
 0x36b   : > { %v5157_v43 = vadd.f32 %v1585_v51, %v4743_v20  ;;  %3476 = vmatmul.mubr.msk.bf16.gmra.mxu1 %vm1655_vm0, %v1611_v42  ;;  %v1586_v8 = vmul.f32 %v1549_v31, %v1506_v29 }
 0x36c   : > { %v1551_v61 = vpop.permute.xlu1 %1550 }
 0x36d   : > { %6337 = vst [vmem:[#allocation29_spill] sm:$0xff] %v5157_v43  ;;  %v1587_v53 = vmul.f32 %v1551_v61, %v1507_v12  ;;  %v1612_v44 = vpack.c.bf16 %v5157_v43, %v5154_v37  ;;  %v5163_v54 = vadd.f32 %v1586_v8, %v4727_v9 }
 0x36f   : > { %6338 = vst [vmem:[#allocation30_spill] sm:$0xff] %v5163_v54  ;;  %v5166_v60 = vadd.f32 %v1587_v53, %v4738_v26  ;;  %3479 = vmatprep.mubr.msk.bf16.mxu1 %vm1655_vm0, %v1612_v44  ;;  %v1553_v4 = vpop.permute.xlu0 %1552 }
 0x370   : > { %v1588_v3 = vmul.f32 %v1553_v4, %v1508_v58 }
 0x371   : > { %6339 = vst [vmem:[#allocation31_spill] sm:$0xff] %v5166_v60  ;;  %v1613_v5 = vpack.c.bf16 %v5166_v60, %v5163_v54 }
 0x372   : > { %v5175_v22 = vadd.f32 %v1588_v3, %v4752_v19  ;;  %v2487_v3 = vsub.f32 %v5114_v50, %v4689_v52 }
 0x373   : > { %3480 = vmatmul.mubr.msk.bf16.gmra.mxu1 %vm1655_vm0, %v1613_v5  ;;  %v1555_v63 = vpop.permute.xlu1 %1554 }
 0x374   : > { %v1589_v28 = vmul.f32 %v1555_v63, %v1509_v21  ;;  %6340 = vst [vmem:[#allocation32_spill] sm:$0xff] %v5175_v22  ;;  %v2488_v21 = vsub.f32 %v5119_v14, %v4678_v47 }
 0x376   : > { %v5178_v10 = vadd.f32 %v1589_v28, %v4777_v49 }
 0x377   : > { %v1557_v16 = vpop.permute.xlu0 %1556 }
 0x378   : > { %6341 = vst [vmem:[#allocation33_spill] sm:$0xff] %v5178_v10  ;;  %v1614_v27 = vpack.c.bf16 %v5178_v10, %v5175_v22  ;;  %v1590_v38 = vmul.f32 %v1557_v16, %v1510_v17 }
 0x37a   : > { %3483 = vmatprep.mubr.msk.bf16.mxu1 %vm1655_vm0, %v1614_v27  ;;  %v5188_v36 = vadd.f32 %v1590_v38, %v4774_v1  ;;  %v2504_v27 = vmul.f32 %v2488_v21, %v2488_v21  ;;  %v2503_v38 = vmul.f32 %v2487_v3, %v2487_v3 }
 0x37b   : > { %v5185_v18 = vpop.permute.xlu0 %2550 }
 0x37c   : > { %6342 = vst [vmem:[#allocation34_spill] sm:$0xff] %v5188_v36 }
 0x37d   : > { %v1559_v56 = vpop.permute.xlu1 %1558 }
 0x37e   : > { %v1591_v2 = vmul.f32 %v1559_v56, %v1511_v32  ;;  %v2490_v32 = vsub.f32 %v5133_v24, %v4698_v59  ;;  %v2489_v56 = vsub.f32 %v5122_v62, %v4686_v35  ;;  %v3599_v59 = vld [vmem:[%s6211_s9 + $0x50] ss:$8 sps:$4 sm:$0xff]   ;;  %v3601_v35 = vld [vmem:[%s6211_s9 + $0x54] ss:$8 sps:$4 sm:$0xff]  }
 0x37f   : > { %v2559_v40 = vpop.permute.xlu0 %2558  ;;  %1913 = vmatprep.subr.bf16.mxu0 %v3601_v35 }
 0x380   : > { %v5191_v46 = vadd.f32 %v1591_v2, %v4784_v23  ;;  %v2505_v21 = vmul.f32 %v2489_v56, %v2489_v56  ;;  %1914 = vmatpush1.bf16.msra.mxu0 %v3599_v59  ;;  %v2493_v56 = vsub.f32 %v5146_v45, %v4704_v30  ;;  %v3610_v30 = vld [vmem:[%s6211_s9 + $0x24] ss:$8 sps:$4 sm:$0xff]  }
 0x381   : > { %v2553_v51 = vpop.permute.xlu1 %2552 }
 0x382   : > { %6343 = vst [vmem:[#allocation35_spill] sm:$0xff] %v5191_v46  ;;  %v1615_v29 = vpack.c.bf16 %v5191_v46, %v5188_v36 }
 0x383   : > { %v2563_v42 = vpop.permute.xlu0 %2562 }
 0x384   : > { %3484 = vmatmul.mubr.msk.bf16.gmra.mxu1 %vm1655_vm0, %v1615_v29 }
 0x385   : > { %v2555_v12 = vpop.permute.xlu1 %2554 }
 0x386   : > { %3763 = vrcp.f32 %v2555_v12  ;;  %v2506_v12 = vmul.f32 %v2490_v32, %v2490_v32 }
 0x387   : > { %v5196_v31 = vpop.permute.xlu0 %2566  ;;  %3765 = vrcp.f32 %v2553_v51 }
 0x388   : > { %3767 = vrcp.f32 %v2559_v40 }
 0x389   : > { %v2557_v8 = vpop.permute.xlu1 %2556 }
 0x38a   : > { %3769 = vrcp.f32 %v2557_v8  ;;  %v2492_v8 = vsub.f32 %v5143_v34, %v4694_v55 }
 0x38b   : > { %v5198_v61 = vpop.permute.xlu0 %2570  ;;  %3771 = vrcp.f32 %v2563_v42 }
 0x38c   : > { %v2508_v55 = vmul.f32 %v2492_v8, %v2492_v8 }
 0x38d   : > { %v5200_v53 = vpop.permute.xlu1 %2560 }
 0x38f   : > { %v5202_v44 = vpop.permute.xlu0 %2574 }
 0x391   : > { %v2565_v58 = vpop.permute.xlu1 %2564 }
 0x392   : > { %3773 = vrcp.f32 %v2565_v58 }
 0x393   : > { %v5204_v4 = vpop.permute.xlu0 %2578  ;;  %v3764_v63 = vpop.eup %3763 }
 0x394   : > { %6344 = vst [vmem:[#allocation36_spill] sm:$0xff] %v5204_v4  ;;  %v3766_v16 = vpop.eup %3765  ;;  %v2603_v2 = vmul.f32 %v3764_v63, %v2504_v27 }
 0x395   : > { %v5206_v5 = vpop.permute.xlu1 %2568  ;;  %v3768_v47 = vpop.eup %3767  ;;  %v2601_v40 = vmul.f32 %v3766_v16, %v2503_v38  ;;  %v3602_v38 = vld [vmem:[%s6211_s9 + $0x40] ss:$8 sps:$4 sm:$0xff]  }
 0x396   : > { %v2607_v3 = vmul.f32 %v3768_v47, %v2506_v12  ;;  %v2497_v47 = vsub.f32 %v5166_v60, %v4738_v26  ;;  %v3605_v12 = vld [vmem:[%s6211_s9 + $0x30] ss:$8 sps:$4 sm:$0xff]   ;;  %v2509_v26 = vmul.f32 %v2493_v56, %v2493_v56  ;;  %v3613_v56 = vld [vmem:[%s6211_s9 + $0x14] ss:$8 sps:$4 sm:$0xff]  }
 0x397   : > { %v5212_v28 = vpop.permute.xlu0 %2694  ;;  %v3770_v52 = vpop.eup %3769 }
 0x398   : > { %v3772_v63 = vpop.eup %3771  ;;  %v2605_v16 = vmul.f32 %v3770_v52, %v2505_v21  ;;  %v3607_v52 = vld [vmem:[%s6211_s9 + $0x34] ss:$8 sps:$4 sm:$0xff]   ;;  %v2513_v21 = vmul.f32 %v2497_v47, %v2497_v47  ;;  %v2501_v47 = vsub.f32 %v5191_v46, %v4784_v23  ;;  %v6229_v23 = vmov 0  }
 0x399   : > { %v2573_v17 = vpop.permute.xlu1 %2572  ;;  %1941 = vmatprep.mubr.bf16.mxu0 %v6229_v23 }
 0x39a   : > { %3775 = vrcp.f32 %v2573_v17 }
 0x39b   : > { %v2699_v51 = vpop.permute.xlu0 %2698 }
 0x39c   : > { %v5218_v42 = vadd.f32 %v2699_v51, %v2603_v2  ;;  %v3604_v2 = vld [vmem:[%s6211_s9 + $0x44] ss:$8 sps:$4 sm:$0xff]   ;;  %v2611_v51 = vmul.f32 %v3772_v63, %v2508_v55 }
 0x39d   : > { %v2697_v29 = vpop.permute.xlu1 %2696  ;;  %1915 = vmatprep.subr.bf16.mxu0 %v3604_v2  ;;  %v3611_v2 = vld [vmem:[%s6211_s9 + $0x10] ss:$8 sps:$4 sm:$0xff]  }
 0x39e   : > { %v5228_v58 = vadd.f32 %v2697_v29, %v2601_v40  ;;  %1916 = vmatpush1.bf16.msra.mxu0 %v3602_v38 }
 0x39f   : > { %v2703_v17 = vpop.permute.xlu0 %2702  ;;  %v3774_v8 = vpop.eup %3773  ;;  %1917 = vmatprep.subr.bf16.mxu0 %v3607_v52  ;;  %v3616_v52 = vld [vmem:[%s6211_s9 + $0x4] ss:$8 sps:$4 sm:$0xff]  }
 0x3a0   : > { %v5230_v32 = vadd.f32 %v2703_v17, %v2607_v3  ;;  %v2613_v63 = vmul.f32 %v3774_v8, %v2509_v26 }
 0x3a1   : > { %v2701_v27 = vpop.permute.xlu1 %2700 }
 0x3a2   : > { %6345 = vst [vmem:[#allocation37_spill] sm:$0xff] %v5230_v32  ;;  %v5238_v40 = vadd.f32 %v2701_v27, %v2605_v16  ;;  %1918 = vmatpush1.bf16.msra.mxu0 %v3605_v12  ;;  %v3608_v16 = vld [vmem:[%s6211_s9 + $0x20] ss:$8 sps:$4 sm:$0xff]  }
 0x3a3   : > { %v2707_v29 = vpop.permute.xlu0 %2706  ;;  %1919 = vmatprep.subr.bf16.mxu0 %v3610_v30 }
 0x3a4   : > { %6346 = vst [vmem:[#allocation38_spill] sm:$0xff] %v5238_v40  ;;  %v5250_v35 = vadd.f32 %v2707_v29, %v2611_v51  ;;  %v3614_v51 = vld [vmem:[%s6211_s9] ss:$8 sps:$4 sm:$0xff]   ;;  %v2517_v29 = vmul.f32 %v2501_v47, %v2501_v47 }
 0x3a5   : > { %v2581_v59 = vpop.permute.xlu1 %2580 }
 0x3a6   : > { %6347 = vst [vmem:[#allocation39_spill] sm:$0xff] %v5250_v35  ;;  %3777 = vrcp.f32 %v2581_v59  ;;  %1920 = vmatpush1.bf16.msra.mxu0 %v3608_v16  ;;  %v2499_v59 = vsub.f32 %v5178_v10, %v4777_v49  ;;  %v5286_v16 = vld [vmem:[%s6210_s8] ss:$0 sm:$0xff] }
 0x3a7   : > { %v3776_v3 = vpop.eup %3775  ;;  %1921 = vmatprep.subr.bf16.mxu0 %v3613_v56 }
 0x3a8   : > { %v5258_v17 = vmul.f32 %v3776_v3, %v2513_v21  ;;  %v2515_v30 = vmul.f32 %v2499_v59, %v2499_v59 }
 0x3a9   : > { %v2709_v27 = vpop.permute.xlu1 %2708 }
 0x3aa   : > { %6348 = vst [vmem:[#allocation40_spill] sm:$0xff] %v5258_v17  ;;  %v5260_v55 = vadd.f32 %v2709_v27, %v2613_v63  ;;  %1922 = vmatpush1.bf16.msra.mxu0 %v3611_v2 }
 0x3ab   : > { %1923 = vmatprep.subr.bf16.mxu0 %v3616_v52 }
 0x3ac   : > { %6349 = vst [vmem:[#allocation41_spill] sm:$0xff] %v5260_v55 }
 0x3ad   : > { %v2577_v38 = vpop.permute.xlu1 %2576 }
 0x3ae   : > { %3779 = vrcp.f32 %v2577_v38  ;;  %1924 = vmatpush1.bf16.msra.mxu0 %v3614_v51 }
 0x3b3   : > { %v3778_v12 = vpop.eup %3777 }
 0x3b4   : > { %v5276_v8 = vmul.f32 %v3778_v12, %v2517_v29 }
 0x3b6   : > { %6350 = vst [vmem:[#allocation42_spill] sm:$0xff] %v5276_v8 }
 0x3bb   : > { %v3780_v26 = vpop.eup %3779 }
 0x3bc   : > { %v5281_v21 = vmul.f32 %v3780_v26, %v2515_v30 }
 0x3be   : > { %6351 = vst [vmem:[#allocation43_spill] sm:$0xff] %v5281_v21 }
 0x41c   : > { %v3473_v3 = vpop.f32.mrf.mxu1 }
 0x41d   : > { %v1723_v47 = vadd.f32 %v3473_v3, %v5286_v16 }
 0x41e   : > { %v1714_v63 = vpop.f32.mrf.mxu1 }
 0x41f   : > { %v1715_v27 = vadd.f32 %v5286_v16, %v1714_v63 }
 0x420   : > { %v3474_v38 = vpop.f32.mrf.mxu1 }
 0x421   : > { %3781 = vtanh.f32 %v1715_v27  ;;  %v1726_v56 = vadd.f32 %v3474_v38, %v5286_v16  ;;  %v6352_v38 = vmov 0  }
 0x422   : > { %v1717_v2 = vpop.f32.mrf.mxu1 }
 0x423   : > { %v1718_v49 = vadd.f32 %v5286_v16, %v1717_v2 }
 0x425   : > { %3783 = vtanh.f32 %v1718_v49 }
 0x426   : > { %3785 = vtanh.f32 %v1726_v56 }
 0x427   : > { %3787 = vtanh.f32 %v1723_v47 }
 0x42b   : > { %v3477_v51 = vpop.f32.mrf.mxu1 }
 0x42d   : > { %v1730_v52 = vpop.f32.mrf.mxu1 }
 0x42e   : > { %v3782_v29 = vpop.eup %3781  ;;  %v1731_v12 = vadd.f32 %v5286_v16, %v1730_v52  ;;  %v1739_v52 = vadd.f32 %v3477_v51, %v5286_v16 }
 0x42f   : > { %v3478_v59 = vpop.f32.mrf.mxu1 }
 0x430   : > { %3789 = vtanh.f32 %v1731_v12  ;;  %v1742_v49 = vadd.f32 %v3478_v59, %v5286_v16 }
 0x431   : > { %v1733_v26 = vpop.f32.mrf.mxu1 }
 0x432   : > { %v3784_v30 = vpop.eup %3783  ;;  %v1734_v23 = vadd.f32 %v5286_v16, %v1733_v26 }
 0x433   : > { %v1793_v63 = vpack.c.bf16 %v3784_v30, %v3782_v29  ;;  %v3481_v27 = vpop.f32.mrf.mxu1  ;;  %v3786_v2 = vpop.eup %3785 }
 0x434   : > { %3791 = vtanh.f32 %v1734_v23  ;;  %v3788_v47 = vpop.eup %3787 }
 0x435   : > { %1942 = vmatmul.mubr.bf16.vlgmr.msra.gmra.mxu0 %v1793_v63  ;;  %v1746_v3 = vpop.f32.mrf.mxu1  ;;  %v1794_v46 = vpack.c.bf16 %v3786_v2, %v3788_v47  ;;  %3793 = vtanh.f32 %v1742_v49  ;;  %v1755_v2 = vadd.f32 %v3481_v27, %v5286_v16 }
 0x436   : > { %1951 = vmatprep.mubr.bf16.mxu0 %v6352_v38  ;;  %3795 = vtanh.f32 %v1739_v52  ;;  %v1747_v12 = vadd.f32 %v5286_v16, %v1746_v3 }
 0x437   : > { %v3482_v56 = vpop.f32.mrf.mxu1 }
 0x438   : > { %v1758_v51 = vadd.f32 %v3482_v56, %v5286_v16 }
 0x439   : > { %v1749_v10 = vpop.f32.mrf.mxu1 }
 0x43a   : > { %v1750_v29 = vadd.f32 %v5286_v16, %v1749_v10 }
 0x43c   : > { %3797 = vtanh.f32 %v1750_v29 }
 0x43d   : > { %1952 = vmatmul.mubr.bf16.gmra.mxu0 %v1794_v46  ;;  %v3790_v23 = vpop.eup %3789  ;;  %3799 = vtanh.f32 %v1747_v12 }
 0x43e   : > { %1961 = vmatprep.mubr.bf16.mxu0 %v6352_v38  ;;  %3801 = vtanh.f32 %v1758_v51 }
 0x43f   : > { %3803 = vtanh.f32 %v1755_v2 }
 0x441   : > { %v3792_v30 = vpop.eup %3791 }
 0x442   : > { %v1795_v26 = vpack.c.bf16 %v3792_v30, %v3790_v23  ;;  %v3794_v46 = vpop.eup %3793 }
 0x443   : > { %v3796_v47 = vpop.eup %3795 }
 0x444   : > { %v3485_v59 = vpop.f32.mrf.mxu1  ;;  %v1796_v10 = vpack.c.bf16 %v3794_v46, %v3796_v47 }
 0x445   : > { %1962 = vmatmul.mubr.bf16.gmra.mxu0 %v1795_v26  ;;  %v1771_v26 = vadd.f32 %v3485_v59, %v5286_v16 }
 0x446   : > { %1971 = vmatprep.mubr.bf16.mxu0 %v6352_v38  ;;  %v1762_v63 = vpop.f32.mrf.mxu1 }
 0x447   : > { %v1763_v23 = vadd.f32 %v5286_v16, %v1762_v63 }
 0x448   : > { %v3486_v49 = vpop.f32.mrf.mxu1 }
 0x449   : > { %v3798_v29 = vpop.eup %3797  ;;  %v1774_v27 = vadd.f32 %v3486_v49, %v5286_v16 }
 0x44a   : > { %v1765_v52 = vpop.f32.mrf.mxu1  ;;  %v3800_v12 = vpop.eup %3799 }
 0x44b   : > { %v1766_v3 = vadd.f32 %v5286_v16, %v1765_v52  ;;  %v1797_v56 = vpack.c.bf16 %v3798_v29, %v3800_v12  ;;  %v3802_v30 = vpop.eup %3801  ;;  %v1817_v29 = vld [vmem:[%s6212_s10] sm:$0x3] }
 0x44c   : > { %v3804_v51 = vpop.eup %3803 }
 0x44d   : > { %1972 = vmatmul.mubr.bf16.gmra.mxu0 %v1796_v10  ;;  %3805 = vtanh.f32 %v1766_v3  ;;  %v1798_v46 = vpack.c.bf16 %v3802_v30, %v3804_v51  ;;  %v1819_v3 = vlaneseq }
 0x44e   : > { %1981 = vmatprep.mubr.bf16.mxu0 %v6352_v38  ;;  %3807 = vtanh.f32 %v1763_v23 }
 0x44f   : > { %3809 = vtanh.f32 %v1774_v27  ;;  %v1820_v16 = vshrl.u32 %v1819_v3, 7 }
 0x450   : > { %3811 = vtanh.f32 %v1771_v26 }
 0x451   : > { %v1821_v59 = vsub.s32 0, %v1820_v16  ;;  %v1825_v23 = vsub.s32 1, %v1820_v16  ;;  %3813 = vlog2.f32 %v4969_v15 }
 0x452   : > { %3815 = vlog2.f32 %v4980_v7 }
 0x453   : > { %v5314_v12 = vrot.slane %v1817_v29, %v1821_v59  ;;  %3817 = vlog2.f32 %v4983_v41 }
 0x454   : > { %3819 = vlog2.f32 %v4994_v57 }
 0x455   : > { %1982 = vmatmul.mubr.bf16.gmra.mxu0 %v1797_v56  ;;  %v5316_v56 = vrot.slane %v1817_v29, %v1825_v23  ;;  %3821 = vlog2.f32 %v5001_v6 }
 0x456   : > { %1991 = vmatprep.mubr.bf16.mxu0 %v6352_v38  ;;  %3823 = vlog2.f32 %v5009_v0 }
 0x457   : > { %3825 = vlog2.f32 %v5017_v39 }
 0x45a   : > { %v3806_v63 = vpop.eup %3805 }
 0x45b   : > { %v3808_v2 = vpop.eup %3807 }
 0x45c   : > { %v1799_v47 = vpack.c.bf16 %v3806_v63, %v3808_v2  ;;  %v3810_v10 = vpop.eup %3809 }
 0x45d   : > { %1992 = vmatmul.mubr.bf16.gmra.mxu0 %v1798_v46  ;;  %v3812_v52 = vpop.eup %3811 }
 0x45e   : > { %2001 = vmatprep.mubr.bf16.mxu0 %v6352_v38  ;;  %v1800_v49 = vpack.c.bf16 %v3810_v10, %v3812_v52  ;;  %v3814_v15 = vpop.eup %3813 }
 0x465   : > { %2002 = vmatmul.mubr.bf16.gmra.mxu0 %v1799_v47 }
 0x466   : > { %2011 = vmatprep.mubr.bf16.mxu0 %v6352_v38 }
 0x46d   : > { %2012 = vmatmul.mubr.bf16.gmra.mxu0 %v1800_v49 }
 0x4f5   : > { %v1943_v27 = vpop.f32.mrf.mxu0 }
 0x4f6   : > { %v5319_v30 = vadd.f32 %v1943_v27, %v5314_v12 }
 0x4f7   : > { %v1945_v38 = vpop.f32.mrf.mxu0 }
 0x4f8   : > { %2022 = vst [vmem:[%s5322_s21] sm:$0xff] %v5319_v30  ;;  %v5327_v26 = vadd.f32 %v1945_v38, %v5316_v56 }
 0x4f9   : > { %v1947_v51 = vpop.f32.mrf.mxu0 }
 0x4fa   : > { %2023 = vst [vmem:[%s5322_s21 + $0x8] sm:$0xff] %v5327_v26  ;;  %v5332_v46 = vadd.f32 %v1947_v51, %v5314_v12  ;;  %v2054_v63 = vmax.f32 %v5319_v30, %v5327_v26 }
 0x4fb   : > { %v1949_v2 = vpop.f32.mrf.mxu0 }
 0x4fc   : > { %2024 = vst [vmem:[%s5322_s21 + $0x10] sm:$0xff] %v5332_v46  ;;  %v5339_v47 = vadd.f32 %v1949_v2, %v5316_v56  ;;  %2055 = vmax.xlane.f32.xlu0 %v2054_v63 }
 0x4fd   : > { %v1953_v10 = vpop.f32.mrf.mxu0 }
 0x4fe   : > { %2025 = vst [vmem:[%s5322_s21 + $0x18] sm:$0xff] %v5339_v47  ;;  %v5344_v52 = vadd.f32 %v1953_v10, %v5314_v12  ;;  %v2057_v49 = vmax.f32 %v5332_v46, %v5339_v47 }
 0x4ff   : > { %v1955_v3 = vpop.f32.mrf.mxu0 }
 0x500   : > { %2026 = vst [vmem:[%s5322_s21 + $0x20] sm:$0xff] %v5344_v52  ;;  %v5351_v16 = vadd.f32 %v1955_v3, %v5316_v56  ;;  %2058 = vmax.xlane.f32.xlu1 %v2057_v49 }
 0x501   : > { %v1957_v59 = vpop.f32.mrf.mxu0 }
 0x502   : > { %2027 = vst [vmem:[%s5322_s21 + $0x28] sm:$0xff] %v5351_v16  ;;  %v5356_v29 = vadd.f32 %v1957_v59, %v5314_v12  ;;  %v2060_v23 = vmax.f32 %v5344_v52, %v5351_v16 }
 0x503   : > { %v1959_v27 = vpop.f32.mrf.mxu0 }
 0x504   : > { %2028 = vst [vmem:[%s5322_s21 + $0x30] sm:$0xff] %v5356_v29  ;;  %v5363_v38 = vadd.f32 %v1959_v27, %v5316_v56  ;;  %2061 = vmax.xlane.f32.xlu0 %v2060_v23 }
 0x505   : > { %v1963_v51 = vpop.f32.mrf.mxu0 }
 0x506   : > { %2029 = vst [vmem:[%s5322_s21 + $0x38] sm:$0xff] %v5363_v38  ;;  %v2063_v63 = vmax.f32 %v5356_v29, %v5363_v38  ;;  %v5370_v2 = vadd.f32 %v1963_v51, %v5314_v12 }
 0x507   : > { %v1965_v10 = vpop.f32.mrf.mxu0 }
 0x508   : > { %2064 = vmax.xlane.f32.xlu0 %v2063_v63  ;;  %2030 = vst [vmem:[%s5322_s21 + $0x40] sm:$0xff] %v5370_v2  ;;  %v5375_v49 = vadd.f32 %v1965_v10, %v5316_v56 }
 0x509   : > { %v1967_v3 = vpop.f32.mrf.mxu0 }
 0x50a   : > { %2031 = vst [vmem:[%s5322_s21 + $0x48] sm:$0xff] %v5375_v49  ;;  %v5380_v59 = vadd.f32 %v1967_v3, %v5314_v12  ;;  %v2066_v23 = vmax.f32 %v5370_v2, %v5375_v49 }
 0x50b   : > { %v1969_v27 = vpop.f32.mrf.mxu0 }
 0x50c   : > { %2032 = vst [vmem:[%s5322_s21 + $0x50] sm:$0xff] %v5380_v59  ;;  %v5387_v51 = vadd.f32 %v1969_v27, %v5316_v56  ;;  %2067 = vmax.xlane.f32.xlu0 %v2066_v23 }
 0x50d   : > { %v1973_v63 = vpop.f32.mrf.mxu0 }
 0x50e   : > { %2033 = vst [vmem:[%s5322_s21 + $0x58] sm:$0xff] %v5387_v51  ;;  %v5392_v10 = vadd.f32 %v1973_v63, %v5314_v12  ;;  %v2069_v3 = vmax.f32 %v5380_v59, %v5387_v51 }
 0x50f   : > { %v1975_v60 = vpop.f32.mrf.mxu0 }
 0x510   : > { %2034 = vst [vmem:[%s5322_s21 + $0x60] sm:$0xff] %v5392_v10  ;;  %v5399_v45 = vadd.f32 %v1975_v60, %v5316_v56  ;;  %2070 = vmax.xlane.f32.xlu1 %v2069_v3 }
 0x511   : > { %v1977_v27 = vpop.f32.mrf.mxu0 }
 0x512   : > { %2035 = vst [vmem:[%s5322_s21 + $0x68] sm:$0xff] %v5399_v45  ;;  %v5404_v23 = vadd.f32 %v1977_v27, %v5314_v12  ;;  %v2072_v63 = vmax.f32 %v5392_v10, %v5399_v45 }
 0x513   : > { %v1979_v34 = vpop.f32.mrf.mxu0 }
 0x514   : > { %2036 = vst [vmem:[%s5322_s21 + $0x70] sm:$0xff] %v5404_v23  ;;  %v5411_v24 = vadd.f32 %v1979_v34, %v5316_v56  ;;  %2073 = vmax.xlane.f32.xlu0 %v2072_v63 }
 0x515   : > { %v1983_v60 = vpop.f32.mrf.mxu0 }
 0x516   : > { %2037 = vst [vmem:[%s5322_s21 + $0x78] sm:$0xff] %v5411_v24  ;;  %v5416_v3 = vadd.f32 %v1983_v60, %v5314_v12  ;;  %v2075_v27 = vmax.f32 %v5404_v23, %v5411_v24 }
 0x517   : > { %v1985_v62 = vpop.f32.mrf.mxu0 }
 0x518   : > { %2038 = vst [vmem:[%s5322_s21 + $0x80] sm:$0xff] %v5416_v3  ;;  %v5423_v50 = vadd.f32 %v1985_v62, %v5316_v56  ;;  %2076 = vmax.xlane.f32.xlu1 %v2075_v27 }
 0x519   : > { %v1987_v34 = vpop.f32.mrf.mxu0 }
 0x51a   : > { %2039 = vst [vmem:[%s5322_s21 + $0x88] sm:$0xff] %v5423_v50  ;;  %v5428_v63 = vadd.f32 %v1987_v34, %v5314_v12  ;;  %v2078_v60 = vmax.f32 %v5416_v3, %v5423_v50 }
 0x51b   : > { %v1989_v14 = vpop.f32.mrf.mxu0 }
 0x51c   : > { %2040 = vst [vmem:[%s5322_s21 + $0x90] sm:$0xff] %v5428_v63  ;;  %v5435_v8 = vadd.f32 %v1989_v14, %v5316_v56  ;;  %2079 = vmax.xlane.f32.xlu0 %v2078_v60 }
 0x51d   : > { %v1993_v62 = vpop.f32.mrf.mxu0 }
 0x51e   : > { %2041 = vst [vmem:[%s5322_s21 + $0x98] sm:$0xff] %v5435_v8  ;;  %v5440_v27 = vadd.f32 %v1993_v62, %v5314_v12  ;;  %v2081_v34 = vmax.f32 %v5428_v63, %v5435_v8 }
 0x51f   : > { %v1995_v21 = vpop.f32.mrf.mxu0 }
 0x520   : > { %2042 = vst [vmem:[%s5322_s21 + $0xa0] sm:$0xff] %v5440_v27  ;;  %v5447_v17 = vadd.f32 %v1995_v21, %v5316_v56  ;;  %2082 = vmax.xlane.f32.xlu1 %v2081_v34 }
 0x521   : > { %v1997_v14 = vpop.f32.mrf.mxu0 }
 0x522   : > { %2043 = vst [vmem:[%s5322_s21 + $0xa8] sm:$0xff] %v5447_v17  ;;  %v5452_v60 = vadd.f32 %v1997_v14, %v5314_v12  ;;  %v2084_v62 = vmax.f32 %v5440_v27, %v5447_v17 }
 0x523   : > { %v1999_v55 = vpop.f32.mrf.mxu0 }
 0x524   : > { %2044 = vst [vmem:[%s5322_s21 + $0xb0] sm:$0xff] %v5452_v60  ;;  %v5459_v36 = vadd.f32 %v1999_v55, %v5316_v56  ;;  %2085 = vmax.xlane.f32.xlu0 %v2084_v62 }
 0x525   : > { %v2003_v21 = vpop.f32.mrf.mxu0 }
 0x526   : > { %2045 = vst [vmem:[%s5322_s21 + $0xb8] sm:$0xff] %v5459_v36  ;;  %v5464_v34 = vadd.f32 %v2003_v21, %v5314_v12  ;;  %v2087_v14 = vmax.f32 %v5452_v60, %v5459_v36 }
 0x527   : > { %v2005_v1 = vpop.f32.mrf.mxu0 }
 0x528   : > { %2046 = vst [vmem:[%s5322_s21 + $0xc0] sm:$0xff] %v5464_v34  ;;  %v5471_v22 = vadd.f32 %v2005_v1, %v5316_v56  ;;  %2088 = vmax.xlane.f32.xlu1 %v2087_v14 }
 0x529   : > { %v2007_v55 = vpop.f32.mrf.mxu0 }
 0x52a   : > { %2047 = vst [vmem:[%s5322_s21 + $0xc8] sm:$0xff] %v5471_v22  ;;  %v5476_v62 = vadd.f32 %v2007_v55, %v5314_v12  ;;  %v2090_v21 = vmax.f32 %v5464_v34, %v5471_v22 }
 0x52b   : > { %v2009_v19 = vpop.f32.mrf.mxu0 }
 0x52c   : > { %2048 = vst [vmem:[%s5322_s21 + $0xd0] sm:$0xff] %v5476_v62  ;;  %v5483_v35 = vadd.f32 %v2009_v19, %v5316_v56  ;;  %2091 = vmax.xlane.f32.xlu0 %v2090_v21 }
 0x52d   : > { %v2013_v1 = vpop.f32.mrf.mxu0 }
 0x52e   : > { %2049 = vst [vmem:[%s5322_s21 + $0xd8] sm:$0xff] %v5483_v35  ;;  %v5488_v14 = vadd.f32 %v2013_v1, %v5314_v12  ;;  %v2093_v55 = vmax.f32 %v5476_v62, %v5483_v35 }
 0x52f   : > { %v2015_v32 = vpop.f32.mrf.mxu0 }
 0x530   : > { %2050 = vst [vmem:[%s5322_s21 + $0xe0] sm:$0xff] %v5488_v14  ;;  %v5495_v40 = vadd.f32 %v2015_v32, %v5316_v56  ;;  %2094 = vmax.xlane.f32.xlu1 %v2093_v55 }
 0x531   : > { %v2017_v19 = vpop.f32.mrf.mxu0 }
 0x532   : > { %2051 = vst [vmem:[%s5322_s21 + $0xe8] sm:$0xff] %v5495_v40  ;;  %v5500_v21 = vadd.f32 %v2017_v19, %v5314_v12  ;;  %v2096_v1 = vmax.f32 %v5488_v14, %v5495_v40  ;;  %v2649_v12 = vmul.f32 0.6931472, %v3814_v15 }
 0x533   : > { %v2019_v43 = vpop.f32.mrf.mxu0 }
 0x534   : > { %2052 = vst [vmem:[%s5322_s21 + $0xf0] sm:$0xff] %v5500_v21  ;;  %v5508_v20 = vadd.f32 %v2019_v43, %v5316_v56  ;;  %2097 = vmax.xlane.f32.xlu0 %v2096_v1  ;;  %v3816_v43 = vpop.eup %3815  ;;  %v2671_v19 = vmul.f32 2.0, %v2649_v12 }
 0x535   : > { %v3818_v7 = vpop.eup %3817  ;;  %v2651_v56 = vmul.f32 0.6931472, %v3816_v43 }
 0x536   : > { %2053 = vst [vmem:[%s5322_s21 + $0xf8] sm:$0xff] %v5508_v20  ;;  %v2099_v32 = vmax.f32 %v5500_v21, %v5508_v20  ;;  %v3820_v55 = vpop.eup %3819  ;;  %v2653_v1 = vmul.f32 0.6931472, %v3818_v7  ;;  %s4029_s21 = sshll.u32 %s4131_s29, 4  ;;  %s4030_s21 = int_to_ptr.vmem [resolvable:$false] %s4029_s21 }
 0x537   : > { %v3822_v54 = vpop.eup %3821  ;;  %v2672_v9 = vmul.f32 2.0, %v2651_v56  ;;  %v2655_v41 = vmul.f32 0.6931472, %v3820_v55  ;;  %p4032_p0 = scmp.lt.s32.totalorder %s6037_s24, %s4030_s21 }
 0x538   : > { %2100 = vmax.xlane.f32.xlu1 %v2099_v32  ;;  %v3824_v32 = vpop.eup %3823  ;;  %v2673_v57 = vmul.f32 2.0, %v2653_v1  ;;  %v2657_v6 = vmul.f32 0.6931472, %v3822_v54  ;;  %v5529_v54 = vpop.permute.xlu1 %2704 }
 0x539   : > { %v3826_v0 = vpop.eup %3825  ;;  %v2674_v39 = vmul.f32 2.0, %v2655_v41  ;;  %v2659_v4 = vmul.f32 0.6931472, %v3824_v32 }
 0x53a   : > { %v2675_v15 = vmul.f32 2.0, %v2657_v6  ;;  %v2661_v43 = vmul.f32 0.6931472, %v3826_v0 }
 0x53b   : > { %v2676_v12 = vmul.f32 2.0, %v2659_v4 }
 0x53c   : > { %v2677_v7 = vmul.f32 2.0, %v2661_v43 }
 0x549   : > { %2712 = vrot.lane.b32.xlu1 %v2671_v19, %s4129_s13 }
 0x54a   : > { %2714 = vrot.lane.b32.xlu0 %v2672_v9, %s4129_s13  ;;  %v5527_v9 = vpop.permute.xlu0 %2710 }
 0x54d   : > { %2716 = vrot.lane.b32.xlu1 %v2673_v57, %s4129_s13 }
 0x54e   : > { %2718 = vrot.lane.b32.xlu0 %v2674_v39, %s4129_s13 }
 0x551   : > { %2720 = vrot.lane.b32.xlu1 %v2675_v15, %s4129_s13 }
 0x552   : > { %2722 = vrot.lane.b32.xlu0 %v2676_v12, %s4129_s13 }
 0x555   : > { %2724 = vrot.lane.b32.xlu1 %v2677_v7, %s4129_s13  ;;  %s5852_s13 = scalar_lea.vmem [#allocation8], %s4369_s23  ;;  %s4031_s23 = scalar_lea.vmem %s4030_s21, 8192 }
 0x556   : > { %p4033_p2 = scmp.lt.s32.totalorder %s4031_s23, %s4025_s19 }
 0x558   : > { %p4034_p4 = por %p4033_p2, %p4032_p0 }
 0x55a   : > { %p4035_p9 = pnand %p4034_p4, %p4028_p10 }
 0x585   : > { %v2056_v56 = vpop.xlane.xlu0 %2055 }
 0x586   : > { %v5532_v55 = vsub.f32 %v5319_v30, %v2056_v56  ;;  %v5535_v19 = vsub.f32 %v5327_v26, %v2056_v56 }
 0x588   : > { %v2134_v4 = vmul.f32 1.442695, %v5532_v55  ;;  %v2136_v1 = vmul.f32 1.442695, %v5535_v19 }
 0x589   : > { %v2059_v41 = vpop.xlane.xlu1 %2058 }
 0x58a   : > { %3827 = vpow2.f32 %v2134_v4  ;;  %v5540_v32 = vsub.f32 %v5332_v46, %v2059_v41  ;;  %v5543_v57 = vsub.f32 %v5339_v47, %v2059_v41 }
 0x58b   : > { %3829 = vpow2.f32 %v2136_v1 }
 0x58c   : > { %v2138_v6 = vmul.f32 1.442695, %v5540_v32  ;;  %v2140_v30 = vmul.f32 1.442695, %v5543_v57 }
 0x58d   : > { %v2062_v0 = vpop.xlane.xlu0 %2061 }
 0x58e   : > { %3831 = vpow2.f32 %v2138_v6  ;;  %v5548_v26 = vsub.f32 %v5344_v52, %v2062_v0  ;;  %v5551_v39 = vsub.f32 %v5351_v16, %v2062_v0 }
 0x58f   : > { %3833 = vpow2.f32 %v2140_v30 }
 0x590   : > { %v2142_v46 = vmul.f32 1.442695, %v5548_v26  ;;  %v2144_v15 = vmul.f32 1.442695, %v5551_v39 }
 0x591   : > { %v2065_v47 = vpop.xlane.xlu0 %2064 }
 0x592   : > { %3835 = vpow2.f32 %v2142_v46  ;;  %v5556_v43 = vsub.f32 %v5356_v29, %v2065_v47  ;;  %v5559_v12 = vsub.f32 %v5363_v38, %v2065_v47 }
 0x593   : > { %3837 = vpow2.f32 %v2144_v15 }
 0x594   : > { %v2146_v52 = vmul.f32 1.442695, %v5556_v43  ;;  %v2148_v7 = vmul.f32 1.442695, %v5559_v12 }
 0x595   : > { %v2068_v16 = vpop.xlane.xlu0 %2067 }
 0x596   : > { %3839 = vpow2.f32 %v2146_v52  ;;  %v5566_v4 = vsub.f32 %v5370_v2, %v2068_v16  ;;  %v5569_v1 = vsub.f32 %v5375_v49, %v2068_v16 }
 0x597   : > { %v5563_v56 = vpop.eup %3827  ;;  %3841 = vpow2.f32 %v2148_v7 }
 0x598   : > { %v5571_v29 = vpop.eup %3829  ;;  %v2150_v38 = vmul.f32 1.442695, %v5566_v4  ;;  %v2152_v41 = vmul.f32 1.442695, %v5569_v1 }
 0x599   : > { %v2198_v6 = vadd.f32 %v5571_v29, %v5563_v56  ;;  %v2071_v30 = vpop.xlane.xlu1 %2070 }
 0x59a   : > { %3843 = vpow2.f32 %v2150_v38  ;;  %v5580_v46 = vsub.f32 %v5380_v59, %v2071_v30  ;;  %v5583_v2 = vsub.f32 %v5387_v51, %v2071_v30 }
 0x59b   : > { %v5577_v0 = vpop.eup %3831  ;;  %2199 = vadd.xlane.f32.xlu0 %v2198_v6  ;;  %3845 = vpow2.f32 %v2152_v41 }
 0x59c   : > { %6353 = vst [vmem:[#allocation44_spill] sm:$0xff] %v5580_v46  ;;  %6354 = vst [vmem:[#allocation45_spill] sm:$0xff] %v5583_v2  ;;  %v5585_v49 = vpop.eup %3833  ;;  %v2154_v15 = vmul.f32 1.442695, %v5580_v46  ;;  %v2156_v47 = vmul.f32 1.442695, %v5583_v2 }
 0x59d   : > { %v2201_v52 = vadd.f32 %v5585_v49, %v5577_v0  ;;  %v2074_v7 = vpop.xlane.xlu0 %2073 }
 0x59e   : > { %3847 = vpow2.f32 %v2154_v15  ;;  %v5594_v59 = vsub.f32 %v5392_v10, %v2074_v7  ;;  %v5597_v51 = vsub.f32 %v5399_v45, %v2074_v7 }
 0x59f   : > { %v5591_v16 = vpop.eup %3835  ;;  %2202 = vadd.xlane.f32.xlu1 %v2201_v52  ;;  %3849 = vpow2.f32 %v2156_v47 }
 0x5a0   : > { %6355 = vst [vmem:[#allocation46_spill] sm:$0xff] %v5597_v51  ;;  %v5599_v38 = vpop.eup %3837  ;;  %v2158_v41 = vmul.f32 1.442695, %v5594_v59  ;;  %v2160_v6 = vmul.f32 1.442695, %v5597_v51 }
 0x5a1   : > { %v2204_v30 = vadd.f32 %v5599_v38, %v5591_v16  ;;  %v2077_v2 = vpop.xlane.xlu1 %2076 }
 0x5a2   : > { %3851 = vpow2.f32 %v2158_v41  ;;  %v5608_v10 = vsub.f32 %v5404_v23, %v2077_v2  ;;  %v5611_v45 = vsub.f32 %v5411_v24, %v2077_v2 }
 0x5a3   : > { %v5605_v46 = vpop.eup %3839  ;;  %2205 = vadd.xlane.f32.xlu0 %v2204_v30  ;;  %3853 = vpow2.f32 %v2160_v6 }
 0x5a4   : > { %6356 = vst [vmem:[#allocation47_spill] sm:$0xff] %v5611_v45  ;;  %v5613_v15 = vpop.eup %3841  ;;  %v2162_v47 = vmul.f32 1.442695, %v5608_v10  ;;  %v2164_v52 = vmul.f32 1.442695, %v5611_v45 }
 0x5a5   : > { %v2207_v7 = vadd.f32 %v5613_v15, %v5605_v46  ;;  %v2080_v51 = vpop.xlane.xlu0 %2079 }
 0x5a6   : > { %3855 = vpow2.f32 %v2162_v47  ;;  %v5620_v41 = vsub.f32 %v5416_v3, %v2080_v51  ;;  %v5623_v23 = vsub.f32 %v5423_v50, %v2080_v51 }
 0x5a7   : > { %2208 = vadd.xlane.f32.xlu1 %v2207_v7  ;;  %v5625_v24 = vpop.eup %3843  ;;  %3857 = vpow2.f32 %v2164_v52 }
 0x5a8   : > { %6357 = vst [vmem:[#allocation48_spill] sm:$0xff] %v5620_v41  ;;  %6358 = vst [vmem:[#allocation49_spill] sm:$0xff] %v5623_v23  ;;  %v5627_v2 = vpop.eup %3845  ;;  %v2166_v6 = vmul.f32 1.442695, %v5620_v41  ;;  %v2168_v30 = vmul.f32 1.442695, %v5623_v23 }
 0x5a9   : > { %v2083_v45 = vpop.xlane.xlu1 %2082  ;;  %v2210_v47 = vadd.f32 %v5627_v2, %v5625_v24 }
 0x5aa   : > { %3859 = vpow2.f32 %v2166_v6  ;;  %v5634_v3 = vsub.f32 %v5428_v63, %v2083_v45  ;;  %v5637_v50 = vsub.f32 %v5435_v8, %v2083_v45 }
 0x5ab   : > { %v5639_v51 = vpop.eup %3847  ;;  %3861 = vpow2.f32 %v2168_v30  ;;  %2211 = vadd.xlane.f32.xlu0 %v2210_v47 }
 0x5ac   : > { %6359 = vst [vmem:[#allocation50_spill] sm:$0xff] %v5634_v3  ;;  %6360 = vst [vmem:[#allocation51_spill] sm:$0xff] %v5637_v50  ;;  %v5641_v52 = vpop.eup %3849  ;;  %v2170_v7 = vmul.f32 1.442695, %v5634_v3  ;;  %v2172_v23 = vmul.f32 1.442695, %v5637_v50 }
 0x5ad   : > { %v2086_v41 = vpop.xlane.xlu0 %2085  ;;  %v2213_v6 = vadd.f32 %v5641_v52, %v5639_v51 }
 0x5ae   : > { %3863 = vpow2.f32 %v2170_v7  ;;  %v5648_v63 = vsub.f32 %v5440_v27, %v2086_v41  ;;  %v5651_v8 = vsub.f32 %v5447_v17, %v2086_v41 }
 0x5af   : > { %v5653_v45 = vpop.eup %3851  ;;  %3865 = vpow2.f32 %v2172_v23  ;;  %2214 = vadd.xlane.f32.xlu1 %v2213_v6 }
 0x5b0   : > { %6361 = vst [vmem:[#allocation52_spill] sm:$0xff] %v5648_v63  ;;  %6362 = vst [vmem:[#allocation53_spill] sm:$0xff] %v5651_v8  ;;  %v5655_v30 = vpop.eup %3853  ;;  %v2174_v47 = vmul.f32 1.442695, %v5648_v63  ;;  %v2176_v50 = vmul.f32 1.442695, %v5651_v8 }
 0x5b1   : > { %v2089_v3 = vpop.xlane.xlu1 %2088  ;;  %v2216_v7 = vadd.f32 %v5655_v30, %v5653_v45 }
 0x5b2   : > { %3867 = vpow2.f32 %v2174_v47  ;;  %v5662_v27 = vsub.f32 %v5452_v60, %v2089_v3  ;;  %v5665_v17 = vsub.f32 %v5459_v36, %v2089_v3 }
 0x5b3   : > { %v5667_v41 = vpop.eup %3855  ;;  %3869 = vpow2.f32 %v2176_v50  ;;  %2217 = vadd.xlane.f32.xlu0 %v2216_v7 }
 0x5b4   : > { %6363 = vst [vmem:[#allocation54_spill] sm:$0xff] %v5662_v27  ;;  %6364 = vst [vmem:[#allocation55_spill] sm:$0xff] %v5665_v17  ;;  %v5669_v23 = vpop.eup %3857  ;;  %v2178_v6 = vmul.f32 1.442695, %v5662_v27  ;;  %v2180_v8 = vmul.f32 1.442695, %v5665_v17 }
 0x5b5   : > { %v2092_v63 = vpop.xlane.xlu0 %2091  ;;  %v2219_v47 = vadd.f32 %v5669_v23, %v5667_v41 }
 0x5b6   : > { %3871 = vpow2.f32 %v2178_v6  ;;  %v5676_v60 = vsub.f32 %v5464_v34, %v2092_v63  ;;  %v5679_v36 = vsub.f32 %v5471_v22, %v2092_v63 }
 0x5b7   : > { %v5681_v3 = vpop.eup %3859  ;;  %3873 = vpow2.f32 %v2180_v8  ;;  %2220 = vadd.xlane.f32.xlu1 %v2219_v47 }
 0x5b8   : > { %6365 = vst [vmem:[#allocation56_spill] sm:$0xff] %v5676_v60  ;;  %6366 = vst [vmem:[#allocation57_spill] sm:$0xff] %v5679_v36  ;;  %v5683_v50 = vpop.eup %3861  ;;  %v2182_v7 = vmul.f32 1.442695, %v5676_v60  ;;  %v2184_v17 = vmul.f32 1.442695, %v5679_v36 }
 0x5b9   : > { %v2095_v27 = vpop.xlane.xlu1 %2094  ;;  %v2222_v6 = vadd.f32 %v5683_v50, %v5681_v3 }
 0x5ba   : > { %3875 = vpow2.f32 %v2182_v7  ;;  %v5690_v34 = vsub.f32 %v5476_v62, %v2095_v27  ;;  %v5693_v22 = vsub.f32 %v5483_v35, %v2095_v27 }
 0x5bb   : > { %v5695_v63 = vpop.eup %3863  ;;  %3877 = vpow2.f32 %v2184_v17  ;;  %2223 = vadd.xlane.f32.xlu0 %v2222_v6 }
 0x5bc   : > { %6367 = vst [vmem:[#allocation58_spill] sm:$0xff] %v5690_v34  ;;  %6368 = vst [vmem:[#allocation59_spill] sm:$0xff] %v5693_v22  ;;  %v5697_v8 = vpop.eup %3865  ;;  %v2186_v47 = vmul.f32 1.442695, %v5690_v34  ;;  %v2188_v36 = vmul.f32 1.442695, %v5693_v22  ;;  %3879 = vrcp.f32 %v5185_v18 }
 0x5bd   : > { %6369 = vst [vmem:[#allocation60_spill] sm:$0xff] %v5695_v63  ;;  %6370 = vst [vmem:[#allocation61_spill] sm:$0xff] %v5697_v8  ;;  %v2098_v60 = vpop.xlane.xlu0 %2097  ;;  %v2225_v62 = vadd.f32 %v5697_v8, %v5695_v63  ;;  %v6398_v8 = vld [vmem:[#allocation34_spill] sm:$0xff] }
 0x5be   : > { %3881 = vpow2.f32 %v2186_v47  ;;  %v5705_v35 = vsub.f32 %v5488_v14, %v2098_v60  ;;  %v5708_v27 = vsub.f32 %v5495_v40, %v2098_v60 }
 0x5bf   : > { %v5710_v17 = vpop.eup %3867  ;;  %3883 = vpow2.f32 %v2188_v36  ;;  %2226 = vadd.xlane.f32.xlu1 %v2225_v62 }
 0x5c0   : > { %6371 = vst [vmem:[#allocation62_spill] sm:$0xff] %v5705_v35  ;;  %6372 = vst [vmem:[#allocation63_spill] sm:$0xff] %v5708_v27  ;;  %v5712_v7 = vpop.eup %3869  ;;  %v2190_v6 = vmul.f32 1.442695, %v5705_v35  ;;  %v2192_v18 = vmul.f32 1.442695, %v5708_v27 }
 0x5c1   : > { %6373 = vst [vmem:[#allocation64_spill] sm:$0xff] %v5710_v17  ;;  %6374 = vst [vmem:[#allocation65_spill] sm:$0xff] %v5712_v7  ;;  %v2101_v22 = vpop.xlane.xlu1 %2100  ;;  %v2228_v47 = vadd.f32 %v5712_v7, %v5710_v17  ;;  %v6395_v7 = vld [vmem:[#allocation21_spill] sm:$0xff] }
 0x5c2   : > { %3885 = vpow2.f32 %v2190_v6  ;;  %v5719_v14 = vsub.f32 %v5500_v21, %v2101_v22  ;;  %v5722_v40 = vsub.f32 %v5508_v20, %v2101_v22  ;;  %v2486_v21 = vsub.f32 %v5111_v33, %v4682_v48 }
 0x5c3   : > { %v5724_v60 = vpop.eup %3871  ;;  %3887 = vpow2.f32 %v2192_v18  ;;  %2229 = vadd.xlane.f32.xlu0 %v2228_v47 }
 0x5c4   : > { %6375 = vst [vmem:[#allocation66_spill] sm:$0xff] %v5719_v14  ;;  %6376 = vst [vmem:[#allocation67_spill] sm:$0xff] %v5722_v40  ;;  %v5726_v36 = vpop.eup %3873  ;;  %v2194_v62 = vmul.f32 1.442695, %v5719_v14  ;;  %v2196_v27 = vmul.f32 1.442695, %v5722_v40 }
 0x5c5   : > { %6377 = vst [vmem:[#allocation68_spill] sm:$0xff] %v5724_v60  ;;  %6378 = vst [vmem:[#allocation69_spill] sm:$0xff] %v5726_v36  ;;  %v2231_v35 = vadd.f32 %v5726_v36, %v5724_v60 }
 0x5c6   : > { %3889 = vpow2.f32 %v2194_v62 }
 0x5c7   : > { %v5732_v6 = vpop.eup %3875  ;;  %3891 = vpow2.f32 %v2196_v27  ;;  %2232 = vadd.xlane.f32.xlu1 %v2231_v35  ;;  %v2502_v27 = vmul.f32 %v2486_v21, %v2486_v21  ;;  %v2491_v21 = vsub.f32 %v5136_v25, %v4716_v11 }
 0x5c8   : > { %6379 = vst [vmem:[#allocation70_spill] sm:$0xff] %v5732_v6  ;;  %v5734_v20 = vpop.eup %3877  ;;  %3893 = vrcp.f32 %v5200_v53 }
 0x5c9   : > { %6380 = vst [vmem:[#allocation71_spill] sm:$0xff] %v5734_v20  ;;  %v2234_v22 = vadd.f32 %v5734_v20, %v5732_v6  ;;  %v3880_v18 = vpop.eup %3879  ;;  %3895 = vrcp.f32 %v5196_v31  ;;  %v2759_v31 = vadd.f32 1.837877, %v5228_v58  ;;  %v2760_v58 = vadd.f32 1.837877, %v5218_v42  ;;  %v2713_v6 = vpop.permute.xlu1 %2712  ;;  %v6392_v42 = vld [vmem:[#allocation38_spill] sm:$0xff] }
 0x5ca   : > { %3897 = vrcp.f32 %v5198_v61  ;;  %v2599_v48 = vmul.f32 %v3880_v18, %v2502_v27 }
 0x5cb   : > { %v5741_v47 = vpop.eup %3881  ;;  %2235 = vadd.xlane.f32.xlu0 %v2234_v22  ;;  %3899 = vrcp.f32 %v5206_v5  ;;  %v2494_v5 = vsub.f32 %v5154_v37, %v4730_v13  ;;  %v2777_v11 = vsel %vm1655_vm0, %v2759_v31, 0.0  ;;  %v6391_v13 = vld [vmem:[#allocation29_spill] sm:$0xff] }
 0x5cc   : > { %6381 = vst [vmem:[#allocation72_spill] sm:$0xff] %v5741_v47  ;;  %v5743_v40 = vpop.eup %3883  ;;  %v2742_v22 = vadd.f32 %v5212_v28, %v2599_v48  ;;  %3901 = vrcp.f32 %v5202_v44  ;;  %v6387_v48 = vld [vmem:[#allocation36_spill] sm:$0xff] }
 0x5cd   : > { %6382 = vst [vmem:[#allocation73_spill] sm:$0xff] %v5743_v40  ;;  %v2237_v35 = vadd.f32 %v5743_v40, %v5741_v47  ;;  %3903 = vrcp.f32 %v6387_v48  ;;  %v6390_v47 = vld [vmem:[#allocation20_spill] sm:$0xff]  ;;  %v6394_v48 = vld [vmem:[#allocation39_spill] sm:$0xff] }
 0x5ce   : > { %v2758_v27 = vadd.f32 1.837877, %v2742_v22  ;;  %v6389_v22 = vld [vmem:[#allocation30_spill] sm:$0xff]  ;;  %v2495_v20 = vsub.f32 %v6391_v13, %v6390_v47  ;;  %v2764_v36 = vadd.f32 1.837877, %v6394_v48 }
 0x5cf   : > { %v5748_v62 = vpop.eup %3885  ;;  %2238 = vadd.xlane.f32.xlu1 %v2237_v35  ;;  %v2507_v35 = vmul.f32 %v2491_v21, %v2491_v21  ;;  %v2761_v21 = vadd.f32 1.837877, %v6392_v42 }
 0x5d0   : > { %6383 = vst [vmem:[#allocation74_spill] sm:$0xff] %v5748_v62  ;;  %v5751_v53 = vpop.eup %3887  ;;  %v2511_v60 = vmul.f32 %v2495_v20, %v2495_v20  ;;  %v6397_v20 = vld [vmem:[#allocation22_spill] sm:$0xff] }
 0x5d1   : > { %6384 = vst [vmem:[#allocation75_spill] sm:$0xff] %v5751_v53  ;;  %v2240_v14 = vadd.f32 %v5751_v53, %v5748_v62  ;;  %v2510_v53 = vmul.f32 %v2494_v5, %v2494_v5  ;;  %v6388_v62 = vld [vmem:[#allocation19_spill] sm:$0xff]  ;;  %v2500_v63 = vsub.f32 %v6398_v8, %v6397_v20 }
 0x5d2   : > { %v2496_v40 = vsub.f32 %v6389_v22, %v6388_v62 }
 0x5d3   : > { %v5760_v34 = vpop.eup %3889  ;;  %2241 = vadd.xlane.f32.xlu0 %v2240_v14 }
 0x5d4   : > { %6385 = vst [vmem:[#allocation76_spill] sm:$0xff] %v5760_v34  ;;  %v5763_v61 = vpop.eup %3891  ;;  %v2512_v47 = vmul.f32 %v2496_v40, %v2496_v40 }
 0x5d5   : > { %6386 = vst [vmem:[#allocation77_spill] sm:$0xff] %v5763_v61  ;;  %v3894_v18 = vpop.eup %3893  ;;  %v2243_v28 = vadd.f32 %v5763_v61, %v5760_v34  ;;  %v2774_v61 = vsel %vm1655_vm0, %v2758_v27, 0.0  ;;  %v6393_v34 = vld [vmem:[#allocation37_spill] sm:$0xff]  ;;  %v6396_v27 = vld [vmem:[#allocation32_spill] sm:$0xff] }
 0x5d6   : > { %v2609_v44 = vmul.f32 %v3894_v18, %v2507_v35  ;;  %v3896_v14 = vpop.eup %3895  ;;  %v2762_v31 = vadd.f32 1.837877, %v6393_v34  ;;  %v2715_v18 = vpop.permute.xlu0 %2714  ;;  %v2498_v17 = vsub.f32 %v6396_v27, %v6395_v7  ;;  %v2792_v7 = vsel %vm1655_vm0, %v2764_v36, 0.0 }
 0x5d7   : > { %2244 = vadd.xlane.f32.xlu1 %v2243_v28  ;;  %2778 = vadd.xlane.f32.xlu0 %v2777_v11  ;;  %v2780_v11 = vsel %vm1655_vm0, %v2760_v58, 0.0  ;;  %v3898_v5 = vpop.eup %3897  ;;  %v2615_v35 = vmul.f32 %v3896_v14, %v2510_v53  ;;  %v2783_v58 = vsel %vm1655_vm0, %v2761_v21, 0.0 }
 0x5d8   : > { %v2747_v28 = vadd.f32 %v5529_v54, %v2609_v44  ;;  %v3900_v62 = vpop.eup %3899  ;;  %v2786_v54 = vsel %vm1655_vm0, %v2762_v31, 0.0  ;;  %v2619_v44 = vmul.f32 %v3898_v5, %v2512_v47  ;;  %v2514_v48 = vmul.f32 %v2498_v17, %v2498_v17 }
 0x5d9   : > { %v2750_v42 = vadd.f32 %v5527_v9, %v2615_v35  ;;  %v3902_v53 = vpop.eup %3901  ;;  %v2617_v14 = vmul.f32 %v3900_v62, %v2511_v60  ;;  %v6399_v9 = vld [vmem:[#allocation41_spill] sm:$0xff] }
 0x5da   : > { %v2763_v34 = vadd.f32 1.837877, %v2747_v28  ;;  %v2719_v40 = vpop.permute.xlu0 %2718  ;;  %v2765_v28 = vadd.f32 1.837877, %v6399_v9  ;;  %v2623_v5 = vmul.f32 %v3902_v53, %v2514_v48  ;;  %v3904_v47 = vpop.eup %3903 }
 0x5db   : > { %2775 = vadd.xlane.f32.xlu1 %v2774_v61  ;;  %2781 = vadd.xlane.f32.xlu0 %v2780_v11  ;;  %v2717_v61 = vpop.permute.xlu1 %2716  ;;  %v2752_v11 = vadd.f32 %v2715_v18, %v2619_v44  ;;  %v2766_v35 = vadd.f32 1.837877, %v2750_v42  ;;  %v2751_v31 = vadd.f32 %v2713_v6, %v2617_v14  ;;  %v2516_v18 = vmul.f32 %v2500_v63, %v2500_v63 }
 0x5dc   : > { %v2789_v21 = vsel %vm1655_vm0, %v2763_v34, 0.0  ;;  %v2754_v60 = vadd.f32 %v2719_v40, %v2623_v5  ;;  %v2795_v36 = vsel %vm1655_vm0, %v2765_v28, 0.0 }
 0x5dd   : > { %v2767_v62 = vadd.f32 1.837877, %v2751_v31  ;;  %v2798_v20 = vsel %vm1655_vm0, %v2766_v35, 0.0  ;;  %v2627_v6 = vmul.f32 %v3904_v47, %v2516_v18  ;;  %v6402_v31 = vld [vmem:[#allocation42_spill] sm:$0xff] }
 0x5de   : > { %v2723_v9 = vpop.permute.xlu0 %2722  ;;  %v2770_v42 = vadd.f32 1.837877, %v2754_v60 }
 0x5df   : > { %2787 = vadd.xlane.f32.xlu1 %v2786_v54  ;;  %2784 = vadd.xlane.f32.xlu0 %v2783_v58  ;;  %v2768_v54 = vadd.f32 1.837877, %v2752_v11  ;;  %v2721_v17 = vpop.permute.xlu1 %2720  ;;  %v6400_v58 = vld [vmem:[#allocation40_spill] sm:$0xff]  ;;  %v2756_v14 = vadd.f32 %v2723_v9, %v2627_v6  ;;  %v6401_v11 = vld [vmem:[#allocation43_spill] sm:$0xff]  ;;  %v2801_v63 = vsel %vm1655_vm0, %v2767_v62, 0.0 }
 0x5e0   : > { %v2753_v44 = vadd.f32 %v2717_v61, %v6400_v58  ;;  %v2755_v48 = vadd.f32 %v2721_v17, %v6401_v11  ;;  %v2810_v61 = vsel %vm1655_vm0, %v2770_v42, 0.0  ;;  %v6404_v58 = vld [vmem:[#allocation23_spill] sm:$0xff] }
 0x5e1   : > { %v2804_v34 = vsel %vm1655_vm0, %v2768_v54, 0.0  ;;  %v2772_v28 = vadd.f32 1.837877, %v2756_v14  ;;  %v6403_v54 = vld [vmem:[#allocation24_spill] sm:$0xff]  ;;  %v6407_v11 = vld [vmem:[#allocation27_spill] sm:$0xff] }
 0x5e2   : > { %v2769_v53 = vadd.f32 1.837877, %v2753_v44  ;;  %v2771_v35 = vadd.f32 1.837877, %v2755_v48  ;;  %v2840_v60 = vmul.f32 %v6403_v54, %v6403_v54  ;;  %v2844_v48 = vmul.f32 %v6407_v11, %v6407_v11 }
 0x5e3   : > { %2793 = vadd.xlane.f32.xlu1 %v2792_v7  ;;  %2790 = vadd.xlane.f32.xlu0 %v2789_v21  ;;  %v2725_v40 = vpop.permute.xlu1 %2724  ;;  %v2838_v7 = vmul.f32 %v5111_v33, %v5111_v33  ;;  %v2816_v62 = vsel %vm1655_vm0, %v2772_v28, 0.0  ;;  %v2839_v33 = vmul.f32 %v6404_v58, %v6404_v58  ;;  %v2846_v54 = vmul.f32 %v5154_v37, %v5154_v37 }
 0x5e4   : > { %v2757_v21 = vadd.f32 %v2725_v40, %v6402_v31  ;;  %v2807_v5 = vsel %vm1655_vm0, %v2769_v53, 0.0  ;;  %v2813_v17 = vsel %vm1655_vm0, %v2771_v35, 0.0  ;;  %v2856_v44 = vadd.f32 1.837877, %v2840_v60 }
 0x5e5   : > { %v2854_v47 = vadd.f32 1.837877, %v2838_v7  ;;  %v2855_v42 = vadd.f32 1.837877, %v2839_v33  ;;  %v2843_v7 = vmul.f32 %v5136_v25, %v5136_v25  ;;  %v2860_v35 = vadd.f32 1.837877, %v2844_v48 }
 0x5e6   : > { %v2773_v18 = vadd.f32 1.837877, %v2757_v21  ;;  %v2876_v40 = vsel %vm1655_vm0, %v2856_v44, 0.0  ;;  %v2847_v25 = vmul.f32 %v6391_v13, %v6391_v13  ;;  %v2848_v58 = vmul.f32 %v6389_v22, %v6389_v22  ;;  %v6409_v44 = vld [vmem:[#allocation31_spill] sm:$0xff] }
 0x5e7   : > { %2799 = vadd.xlane.f32.xlu1 %v2798_v20  ;;  %2796 = vadd.xlane.f32.xlu0 %v2795_v36  ;;  %v6405_v20 = vld [vmem:[#allocation25_spill] sm:$0xff]  ;;  %v2870_v6 = vsel %vm1655_vm0, %v2854_v47, 0.0  ;;  %v2859_v21 = vadd.f32 1.837877, %v2843_v7  ;;  %v2888_v60 = vsel %vm1655_vm0, %v2860_v35, 0.0  ;;  %v2849_v37 = vmul.f32 %v6409_v44, %v6409_v44 }
 0x5e8   : > { %v2841_v36 = vmul.f32 %v6405_v20, %v6405_v20  ;;  %v2819_v9 = vsel %vm1655_vm0, %v2773_v18, 0.0  ;;  %v2863_v33 = vadd.f32 1.837877, %v2847_v25  ;;  %v2850_v13 = vmul.f32 %v6396_v27, %v6396_v27 }
 0x5e9   : > { %v2885_v18 = vsel %vm1655_vm0, %v2859_v21, 0.0  ;;  %v2852_v11 = vmul.f32 %v6398_v8, %v6398_v8 }
 0x5ea   : > { %v2857_v14 = vadd.f32 1.837877, %v2841_v36 }
 0x5eb   : > { %2802 = vadd.xlane.f32.xlu0 %v2801_v63  ;;  %2805 = vadd.xlane.f32.xlu1 %v2804_v34  ;;  %v6406_v34 = vld [vmem:[#allocation26_spill] sm:$0xff]  ;;  %v2873_v63 = vsel %vm1655_vm0, %v2855_v42, 0.0  ;;  %v2865_v42 = vadd.f32 1.837877, %v2849_v37 }
 0x5ec   : > { %v2842_v53 = vmul.f32 %v6406_v34, %v6406_v34  ;;  %v2879_v28 = vsel %vm1655_vm0, %v2857_v14, 0.0  ;;  %v2866_v34 = vadd.f32 1.837877, %v2850_v13  ;;  %v626_v13 = vld [vmem:[%s4381_s20 + $0x10] sm:$0xff] }
 0x5ed   : > { %v2903_v48 = vsel %vm1655_vm0, %v2865_v42, 0.0 }
 0x5ee   : > { %v2906_v27 = vsel %vm1655_vm0, %v2866_v34, 0.0 }
 0x5ef   : > { %2808 = vadd.xlane.f32.xlu0 %v2807_v5  ;;  %2811 = vadd.xlane.f32.xlu1 %v2810_v61  ;;  %v2858_v61 = vadd.f32 1.837877, %v2842_v53  ;;  %v6408_v5 = vld [vmem:[#allocation28_spill] sm:$0xff]  ;;  %v6410_v53 = vld [vmem:[#allocation33_spill] sm:$0xff] }
 0x5f0   : > { %v2845_v47 = vmul.f32 %v6408_v5, %v6408_v5  ;;  %v2851_v14 = vmul.f32 %v6410_v53, %v6410_v53 }
 0x5f1   : > { %v2882_v31 = vsel %vm1655_vm0, %v2858_v61, 0.0 }
 0x5f3   : > { %2814 = vadd.xlane.f32.xlu0 %v2813_v17  ;;  %2817 = vadd.xlane.f32.xlu1 %v2816_v62  ;;  %v2861_v17 = vadd.f32 1.837877, %v2845_v47  ;;  %v2862_v62 = vadd.f32 1.837877, %v2846_v54 }
 0x5f5   : > { %v2891_v20 = vsel %vm1655_vm0, %v2861_v17, 0.0  ;;  %v2894_v36 = vsel %vm1655_vm0, %v2862_v62, 0.0  ;;  %v625_v17 = vld [vmem:[%s4381_s20 + $0x8] sm:$0xff] }
 0x5f7   : > { %2820 = vadd.xlane.f32.xlu0 %v2819_v9  ;;  %2871 = vadd.xlane.f32.xlu1 %v2870_v6  ;;  %v2864_v9 = vadd.f32 1.837877, %v2848_v58  ;;  %v2897_v6 = vsel %vm1655_vm0, %v2863_v33, 0.0 }
 0x5f9   : > { %v2900_v22 = vsel %vm1655_vm0, %v2864_v9, 0.0 }
 0x5fb   : > { %2874 = vadd.xlane.f32.xlu0 %v2873_v63  ;;  %2877 = vadd.xlane.f32.xlu1 %v2876_v40  ;;  %v2867_v63 = vadd.f32 1.837877, %v2851_v14  ;;  %v2868_v40 = vadd.f32 1.837877, %v2852_v11 }
 0x5fd   : > { %v2909_v61 = vsel %vm1655_vm0, %v2867_v63, 0.0  ;;  %v2912_v7 = vsel %vm1655_vm0, %v2868_v40, 0.0 }
 0x5ff   : > { %2880 = vadd.xlane.f32.xlu0 %v2879_v28  ;;  %2883 = vadd.xlane.f32.xlu1 %v2882_v31 }
 0x603   : > { %2886 = vadd.xlane.f32.xlu0 %v2885_v18  ;;  %2889 = vadd.xlane.f32.xlu1 %v2888_v60  ;;  %v624_v18 = vld [vmem:[%s4381_s20] sm:$0xff] }
 0x607   : > { %2892 = vadd.xlane.f32.xlu0 %v2891_v20  ;;  %2895 = vadd.xlane.f32.xlu1 %v2894_v36 }
 0x60b   : > { %2898 = vadd.xlane.f32.xlu0 %v2897_v6  ;;  %2901 = vadd.xlane.f32.xlu1 %v2900_v22  ;;  %v627_v6 = vld [vmem:[%s4381_s20 + $0x18] sm:$0xff] }
 0x60f   : > { %2904 = vadd.xlane.f32.xlu0 %v2903_v48  ;;  %2907 = vadd.xlane.f32.xlu1 %v2906_v27  ;;  %v629_v27 = vld [vmem:[%s4381_s20 + $0x28] sm:$0xff] }
 0x613   : > { %2910 = vadd.xlane.f32.xlu0 %v2909_v61  ;;  %2913 = vadd.xlane.f32.xlu1 %v2912_v7 }
 0x624   : > { %v2200_v28 = vpop.xlane.xlu0 %2199 }
 0x625   : > { %3905 = vrcp.f32 %v2200_v28 }
 0x626   : > { %3907 = vlog2.f32 %v2200_v28 }
 0x628   : > { %v2203_v8 = vpop.xlane.xlu1 %2202 }
 0x629   : > { %3909 = vrcp.f32 %v2203_v8 }
 0x62a   : > { %3911 = vlog2.f32 %v2203_v8 }
 0x62c   : > { %v2206_v35 = vpop.xlane.xlu0 %2205 }
 0x62d   : > { %3913 = vrcp.f32 %v2206_v35 }
 0x62e   : > { %3915 = vlog2.f32 %v2206_v35 }
 0x630   : > { %v2209_v31 = vpop.xlane.xlu1 %2208 }
 0x631   : > { %3917 = vrcp.f32 %v2209_v31 }
 0x632   : > { %v3906_v21 = vpop.eup %3905  ;;  %3919 = vlog2.f32 %v2209_v31 }
 0x633   : > { %v3908_v5 = vpop.eup %3907  ;;  %v2262_v47 = vmul.f32 %v3906_v21, %v5563_v56  ;;  %v2263_v54 = vmul.f32 %v3906_v21, %v5571_v29  ;;  %v630_v21 = vld [vmem:[%s4381_s20 + $0x30] sm:$0xff] }
 0x634   : > { %v2327_v60 = vmul.f32 0.6931472, %v3908_v5  ;;  %v2212_v25 = vpop.xlane.xlu0 %2211 }
 0x635   : > { %2294 = vst [vmem:[%s5852_s13] sm:$0xff] %v2262_v47  ;;  %2295 = vst [vmem:[%s5852_s13 + $0x8] sm:$0xff] %v2263_v54  ;;  %3921 = vrcp.f32 %v2212_v25 }
 0x636   : > { %v3910_v62 = vpop.eup %3909  ;;  %v2358_v58 = vsub.f32 %v5532_v55, %v2327_v60  ;;  %v2359_v56 = vsub.f32 %v5535_v19, %v2327_v60  ;;  %3923 = vlog2.f32 %v2212_v25 }
 0x637   : > { %v3912_v29 = vpop.eup %3911  ;;  %v2264_v33 = vmul.f32 %v3910_v62, %v5577_v0  ;;  %v2265_v44 = vmul.f32 %v3910_v62, %v5585_v49 }
 0x638   : > { %v2329_v37 = vmul.f32 0.6931472, %v3912_v29  ;;  %v2390_v20 = vmul.f32 %v2358_v58, %v624_v18  ;;  %v2391_v36 = vmul.f32 %v2359_v56, %v625_v17  ;;  %v2215_v9 = vpop.xlane.xlu1 %2214  ;;  %v633_v58 = vld [vmem:[%s4381_s20 + $0x48] sm:$0xff] }
 0x639   : > { %2296 = vst [vmem:[%s5852_s13 + $0x10] sm:$0xff] %v2264_v33  ;;  %2297 = vst [vmem:[%s5852_s13 + $0x18] sm:$0xff] %v2265_v44  ;;  %3925 = vrcp.f32 %v2215_v9 }
 0x63a   : > { %v3914_v55 = vpop.eup %3913  ;;  %v2360_v19 = vsub.f32 %v5540_v32, %v2329_v37  ;;  %v2361_v0 = vsub.f32 %v5543_v57, %v2329_v37  ;;  %v2422_v49 = vadd.f32 %v2391_v36, %v2390_v20  ;;  %3927 = vlog2.f32 %v2215_v9  ;;  %v628_v32 = vld [vmem:[%s4381_s20 + $0x20] sm:$0xff] }
 0x63b   : > { %v3916_v42 = vpop.eup %3915  ;;  %v2266_v22 = vmul.f32 %v3914_v55, %v5591_v16  ;;  %v2267_v34 = vmul.f32 %v3914_v55, %v5599_v38 }
 0x63c   : > { %v2331_v53 = vmul.f32 0.6931472, %v3916_v42  ;;  %2423 = vadd.xlane.f32.xlu0 %v2422_v49  ;;  %v2392_v14 = vmul.f32 %v2360_v19, %v626_v13  ;;  %v2393_v11 = vmul.f32 %v2361_v0, %v627_v6  ;;  %v2218_v48 = vpop.xlane.xlu0 %2217  ;;  %v634_v13 = vld [vmem:[%s4381_s20 + $0x50] sm:$0xff] }
 0x63d   : > { %2298 = vst [vmem:[%s5852_s13 + $0x20] sm:$0xff] %v2266_v22  ;;  %2299 = vst [vmem:[%s5852_s13 + $0x28] sm:$0xff] %v2267_v34  ;;  %3929 = vrcp.f32 %v2218_v48  ;;  %v6412_v19 = vld [vmem:[#allocation45_spill] sm:$0xff] }
 0x63e   : > { %v3918_v57 = vpop.eup %3917  ;;  %v2362_v63 = vsub.f32 %v5548_v26, %v2331_v53  ;;  %v2363_v16 = vsub.f32 %v5551_v39, %v2331_v53  ;;  %v2425_v38 = vadd.f32 %v2393_v11, %v2392_v14  ;;  %3931 = vlog2.f32 %v2218_v48  ;;  %v631_v26 = vld [vmem:[%s4381_s20 + $0x38] sm:$0xff]  ;;  %v636_v11 = vld [vmem:[%s4381_s20 + $0x60] sm:$0xff]  ;;  %v637_v48 = vld [vmem:[%s4381_s20 + $0x68] sm:$0xff] }
 0x63f   : > { %v3920_v40 = vpop.eup %3919  ;;  %v2268_v61 = vmul.f32 %v3918_v57, %v5605_v46  ;;  %v2269_v7 = vmul.f32 %v3918_v57, %v5613_v15  ;;  %v6413_v57 = vld [vmem:[#allocation46_spill] sm:$0xff] }
 0x640   : > { %v2333_v28 = vmul.f32 0.6931472, %v3920_v40  ;;  %2426 = vadd.xlane.f32.xlu1 %v2425_v38  ;;  %v2394_v8 = vmul.f32 %v2362_v63, %v628_v32  ;;  %v2395_v35 = vmul.f32 %v2363_v16, %v629_v27  ;;  %v2221_v31 = vpop.xlane.xlu1 %2220 }
 0x641   : > { %2300 = vst [vmem:[%s5852_s13 + $0x30] sm:$0xff] %v2268_v61  ;;  %2301 = vst [vmem:[%s5852_s13 + $0x38] sm:$0xff] %v2269_v7  ;;  %3933 = vrcp.f32 %v2221_v31 }
 0x642   : > { %v2364_v39 = vsub.f32 %v5556_v43, %v2333_v28  ;;  %v2365_v5 = vsub.f32 %v5559_v12, %v2333_v28  ;;  %v2428_v46 = vadd.f32 %v2395_v35, %v2394_v8  ;;  %v3922_v15 = vpop.eup %3921  ;;  %3935 = vlog2.f32 %v2221_v31  ;;  %v632_v12 = vld [vmem:[%s4381_s20 + $0x40] sm:$0xff]  ;;  %v639_v8 = vld [vmem:[%s4381_s20 + $0x78] sm:$0xff] }
 0x643   : > { %v3924_v47 = vpop.eup %3923  ;;  %v2270_v54 = vmul.f32 %v3922_v15, %v5625_v24  ;;  %v2271_v60 = vmul.f32 %v3922_v15, %v5627_v2 }
 0x644   : > { %2429 = vadd.xlane.f32.xlu0 %v2428_v46  ;;  %v2396_v25 = vmul.f32 %v2364_v39, %v630_v21  ;;  %v2397_v18 = vmul.f32 %v2365_v5, %v631_v26  ;;  %v2335_v17 = vmul.f32 0.6931472, %v3924_v47  ;;  %v2224_v62 = vpop.xlane.xlu0 %2223  ;;  %v6414_v21 = vld [vmem:[#allocation47_spill] sm:$0xff] }
 0x645   : > { %2302 = vst [vmem:[%s5852_s13 + $0x40] sm:$0xff] %v2270_v54  ;;  %2303 = vst [vmem:[%s5852_s13 + $0x48] sm:$0xff] %v2271_v60  ;;  %3937 = vrcp.f32 %v2224_v62  ;;  %v641_v60 = vld [vmem:[%s4381_s20 + $0x88] sm:$0xff] }
 0x646   : > { %v2431_v43 = vadd.f32 %v2397_v18, %v2396_v25  ;;  %v3926_v56 = vpop.eup %3925  ;;  %v2366_v24 = vsub.f32 %v5566_v4, %v2335_v17  ;;  %v2367_v2 = vsub.f32 %v5569_v1, %v2335_v17  ;;  %3939 = vlog2.f32 %v2224_v62  ;;  %v635_v4 = vld [vmem:[%s4381_s20 + $0x58] sm:$0xff]  ;;  %v6411_v1 = vld [vmem:[#allocation44_spill] sm:$0xff]  ;;  %v6416_v62 = vld [vmem:[#allocation49_spill] sm:$0xff] }
 0x647   : > { %v3928_v29 = vpop.eup %3927  ;;  %v2272_v33 = vmul.f32 %v3926_v56, %v5639_v51  ;;  %v2273_v44 = vmul.f32 %v3926_v56, %v5641_v52  ;;  %v6415_v18 = vld [vmem:[#allocation48_spill] sm:$0xff]  ;;  %v6418_v56 = vld [vmem:[#allocation61_spill] sm:$0xff] }
 0x648   : > { %2432 = vadd.xlane.f32.xlu1 %v2431_v43  ;;  %v2337_v37 = vmul.f32 0.6931472, %v3928_v29  ;;  %v2227_v20 = vpop.xlane.xlu1 %2226  ;;  %v2398_v36 = vmul.f32 %v2366_v24, %v632_v12  ;;  %v2399_v9 = vmul.f32 %v2367_v2, %v633_v58  ;;  %v6417_v12 = vld [vmem:[#allocation60_spill] sm:$0xff] }
 0x649   : > { %2304 = vst [vmem:[%s5852_s13 + $0x50] sm:$0xff] %v2272_v33  ;;  %2305 = vst [vmem:[%s5852_s13 + $0x58] sm:$0xff] %v2273_v44  ;;  %3941 = vrcp.f32 %v2227_v20 }
 0x64a   : > { %v3930_v6 = vpop.eup %3929  ;;  %v2368_v55 = vsub.f32 %v6411_v1, %v2337_v37  ;;  %v2369_v51 = vsub.f32 %v6412_v19, %v2337_v37  ;;  %3943 = vlog2.f32 %v2227_v20  ;;  %v2434_v52 = vadd.f32 %v2399_v9, %v2398_v36  ;;  %v642_v37 = vld [vmem:[%s4381_s20 + $0x90] sm:$0xff]  ;;  %v643_v20 = vld [vmem:[%s4381_s20 + $0x98] sm:$0xff]  ;;  %v6421_v19 = vld [vmem:[#allocation64_spill] sm:$0xff] }
 0x64b   : > { %v3932_v0 = vpop.eup %3931  ;;  %v2274_v49 = vmul.f32 %v3930_v6, %v5653_v45  ;;  %v2275_v42 = vmul.f32 %v3930_v6, %v5655_v30  ;;  %v6419_v9 = vld [vmem:[#allocation50_spill] sm:$0xff] }
 0x64c   : > { %v2339_v22 = vmul.f32 0.6931472, %v3932_v0  ;;  %2435 = vadd.xlane.f32.xlu0 %v2434_v52  ;;  %v2230_v34 = vpop.xlane.xlu0 %2229  ;;  %v2400_v53 = vmul.f32 %v2368_v55, %v634_v13  ;;  %v2401_v14 = vmul.f32 %v2369_v51, %v635_v4  ;;  %v6420_v4 = vld [vmem:[#allocation51_spill] sm:$0xff]  ;;  %v6422_v52 = vld [vmem:[#allocation65_spill] sm:$0xff] }
 0x64d   : > { %2306 = vst [vmem:[%s5852_s13 + $0x60] sm:$0xff] %v2274_v49  ;;  %2307 = vst [vmem:[%s5852_s13 + $0x68] sm:$0xff] %v2275_v42  ;;  %3945 = vrcp.f32 %v2230_v34 }
 0x64e   : > { %v3934_v32 = vpop.eup %3933  ;;  %v2370_v27 = vsub.f32 %v5594_v59, %v2339_v22  ;;  %v2371_v45 = vsub.f32 %v6413_v57, %v2339_v22  ;;  %3947 = vlog2.f32 %v2230_v34  ;;  %v2437_v30 = vadd.f32 %v2401_v14, %v2400_v53  ;;  %v638_v59 = vld [vmem:[%s4381_s20 + $0x70] sm:$0xff]  ;;  %v644_v53 = vld [vmem:[%s4381_s20 + $0xa0] sm:$0xff]  ;;  %v645_v14 = vld [vmem:[%s4381_s20 + $0xa8] sm:$0xff] }
 0x64f   : > { %v3936_v63 = vpop.eup %3935  ;;  %v2276_v16 = vmul.f32 %v3934_v32, %v5667_v41  ;;  %v2277_v38 = vmul.f32 %v3934_v32, %v5669_v23 }
 0x650   : > { %v2341_v40 = vmul.f32 0.6931472, %v3936_v63  ;;  %2438 = vadd.xlane.f32.xlu1 %v2437_v30  ;;  %v2233_v61 = vpop.xlane.xlu1 %2232  ;;  %v2402_v7 = vmul.f32 %v2370_v27, %v636_v11  ;;  %v2403_v28 = vmul.f32 %v2371_v45, %v637_v48  ;;  %v6423_v48 = vld [vmem:[#allocation52_spill] sm:$0xff]  ;;  %v6424_v27 = vld [vmem:[#allocation53_spill] sm:$0xff] }
 0x651   : > { %2308 = vst [vmem:[%s5852_s13 + $0x70] sm:$0xff] %v2276_v16  ;;  %2309 = vst [vmem:[%s5852_s13 + $0x78] sm:$0xff] %v2277_v38  ;;  %3949 = vrcp.f32 %v2233_v61  ;;  %v6425_v63 = vld [vmem:[#allocation68_spill] sm:$0xff]  ;;  %v6426_v38 = vld [vmem:[#allocation69_spill] sm:$0xff] }
 0x652   : > { %v3938_v35 = vpop.eup %3937  ;;  %v2372_v31 = vsub.f32 %v5608_v10, %v2341_v40  ;;  %v2373_v41 = vsub.f32 %v6414_v21, %v2341_v40  ;;  %3951 = vlog2.f32 %v2233_v61  ;;  %v2440_v23 = vadd.f32 %v2403_v28, %v2402_v7  ;;  %v640_v10 = vld [vmem:[%s4381_s20 + $0x80] sm:$0xff] }
 0x653   : > { %v3940_v26 = vpop.eup %3939  ;;  %v2278_v39 = vmul.f32 %v3938_v35, %v5681_v3  ;;  %v2279_v5 = vmul.f32 %v3938_v35, %v5683_v50  ;;  %v646_v35 = vld [vmem:[%s4381_s20 + $0xb0] sm:$0xff] }
 0x654   : > { %v2343_v46 = vmul.f32 0.6931472, %v3940_v26  ;;  %2441 = vadd.xlane.f32.xlu0 %v2440_v23  ;;  %v2236_v15 = vpop.xlane.xlu0 %2235  ;;  %v2404_v47 = vmul.f32 %v2372_v31, %v638_v59  ;;  %v2405_v54 = vmul.f32 %v2373_v41, %v639_v8  ;;  %v647_v31 = vld [vmem:[%s4381_s20 + $0xb8] sm:$0xff]  ;;  %v6428_v26 = vld [vmem:[#allocation55_spill] sm:$0xff] }
 0x655   : > { %2310 = vst [vmem:[%s5852_s13 + $0x80] sm:$0xff] %v2278_v39  ;;  %2311 = vst [vmem:[%s5852_s13 + $0x88] sm:$0xff] %v2279_v5  ;;  %3953 = vrcp.f32 %v2236_v15  ;;  %v6427_v41 = vld [vmem:[#allocation54_spill] sm:$0xff] }
 0x656   : > { %v3942_v25 = vpop.eup %3941  ;;  %v2374_v17 = vsub.f32 %v6415_v18, %v2343_v46  ;;  %v2375_v3 = vsub.f32 %v6416_v62, %v2343_v46  ;;  %3955 = vlog2.f32 %v2236_v15  ;;  %v2443_v50 = vadd.f32 %v2405_v54, %v2404_v47  ;;  %v6429_v15 = vld [vmem:[#allocation70_spill] sm:$0xff]  ;;  %v6430_v54 = vld [vmem:[#allocation71_spill] sm:$0xff] }
 0x657   : > { %v3944_v43 = vpop.eup %3943  ;;  %v2280_v58 = vmul.f32 %v3942_v25, %v6417_v12  ;;  %v2281_v24 = vmul.f32 %v3942_v25, %v6418_v56  ;;  %v6431_v12 = vld [vmem:[#allocation56_spill] sm:$0xff]  ;;  %v6432_v56 = vld [vmem:[#allocation57_spill] sm:$0xff] }
 0x658   : > { %v2345_v2 = vmul.f32 0.6931472, %v3944_v43  ;;  %2444 = vadd.xlane.f32.xlu1 %v2443_v50  ;;  %v2239_v29 = vpop.xlane.xlu1 %2238  ;;  %v2406_v33 = vmul.f32 %v2374_v17, %v640_v10  ;;  %v2407_v44 = vmul.f32 %v2375_v3, %v641_v60  ;;  %v648_v3 = vld [vmem:[%s4381_s20 + $0xc0] sm:$0xff]  ;;  %v649_v50 = vld [vmem:[%s4381_s20 + $0xc8] sm:$0xff] }
 0x659   : > { %2312 = vst [vmem:[%s5852_s13 + $0x90] sm:$0xff] %v2280_v58  ;;  %2313 = vst [vmem:[%s5852_s13 + $0x98] sm:$0xff] %v2281_v24  ;;  %3957 = vrcp.f32 %v2239_v29 }
 0x65a   : > { %v3946_v36 = vpop.eup %3945  ;;  %v2376_v13 = vsub.f32 %v6419_v9, %v2345_v2  ;;  %v2377_v6 = vsub.f32 %v6420_v4, %v2345_v2  ;;  %3959 = vlog2.f32 %v2239_v29  ;;  %v2446_v1 = vadd.f32 %v2407_v44, %v2406_v33  ;;  %v6433_v33 = vld [vmem:[#allocation72_spill] sm:$0xff] }
 0x65b   : > { %v3948_v55 = vpop.eup %3947  ;;  %v2282_v51 = vmul.f32 %v3946_v36, %v6421_v19  ;;  %v2283_v0 = vmul.f32 %v3946_v36, %v6422_v52 }
 0x65c   : > { %v2347_v49 = vmul.f32 0.6931472, %v3948_v55  ;;  %2447 = vadd.xlane.f32.xlu0 %v2446_v1  ;;  %v2242_v42 = vpop.xlane.xlu0 %2241  ;;  %v2408_v22 = vmul.f32 %v2376_v13, %v642_v37  ;;  %v2409_v34 = vmul.f32 %v2377_v6, %v643_v20  ;;  %v6434_v37 = vld [vmem:[#allocation73_spill] sm:$0xff]  ;;  %v651_v55 = vld [vmem:[%s4381_s20 + $0xd8] sm:$0xff] }
 0x65d   : > { %2314 = vst [vmem:[%s5852_s13 + $0xa0] sm:$0xff] %v2282_v51  ;;  %2315 = vst [vmem:[%s5852_s13 + $0xa8] sm:$0xff] %v2283_v0  ;;  %3961 = vrcp.f32 %v2242_v42  ;;  %v650_v1 = vld [vmem:[%s4381_s20 + $0xd0] sm:$0xff]  ;;  %v6435_v51 = vld [vmem:[#allocation58_spill] sm:$0xff] }
 0x65e   : > { %v3950_v11 = vpop.eup %3949  ;;  %v2378_v32 = vsub.f32 %v6423_v48, %v2347_v49  ;;  %v2379_v57 = vsub.f32 %v6424_v27, %v2347_v49  ;;  %3963 = vlog2.f32 %v2242_v42  ;;  %v2449_v45 = vadd.f32 %v2409_v34, %v2408_v22  ;;  %v6436_v0 = vld [vmem:[#allocation59_spill] sm:$0xff]  ;;  %v6437_v34 = vld [vmem:[#allocation74_spill] sm:$0xff] }
 0x65f   : > { %v3952_v30 = vpop.eup %3951  ;;  %v2284_v16 = vmul.f32 %v3950_v11, %v6425_v63  ;;  %v2285_v40 = vmul.f32 %v3950_v11, %v6426_v38  ;;  %v653_v63 = vld [vmem:[%s4381_s20 + $0xe8] sm:$0xff]  ;;  %v6439_v38 = vld [vmem:[#allocation62_spill] sm:$0xff] }
 0x660   : > { %v2349_v61 = vmul.f32 0.6931472, %v3952_v30  ;;  %2450 = vadd.xlane.f32.xlu1 %v2449_v45  ;;  %v2245_v7 = vpop.xlane.xlu1 %2244  ;;  %v5942_v28 = vpop.xlane.xlu0 %2778  ;;  %v2410_v59 = vmul.f32 %v2378_v32, %v644_v53  ;;  %v2411_v8 = vmul.f32 %v2379_v57, %v645_v14  ;;  %v6438_v14 = vld [vmem:[#allocation75_spill] sm:$0xff] }
 0x661   : > { %2316 = vst [vmem:[%s5852_s13 + $0xb0] sm:$0xff] %v2284_v16  ;;  %2317 = vst [vmem:[%s5852_s13 + $0xb8] sm:$0xff] %v2285_v40  ;;  %3965 = vrcp.f32 %v2245_v7  ;;  %v652_v30 = vld [vmem:[%s4381_s20 + $0xe0] sm:$0xff] }
 0x662   : > { %v3954_v21 = vpop.eup %3953  ;;  %v2380_v23 = vsub.f32 %v6427_v41, %v2349_v61  ;;  %v2381_v39 = vsub.f32 %v6428_v26, %v2349_v61  ;;  %3967 = vlog2.f32 %v2245_v7  ;;  %v2452_v5 = vadd.f32 %v2411_v8, %v2410_v59  ;;  %v6440_v61 = vld [vmem:[#allocation63_spill] sm:$0xff] }
 0x663   : > { %v3956_v46 = vpop.eup %3955  ;;  %v2286_v47 = vmul.f32 %v3954_v21, %v6429_v15  ;;  %v2287_v10 = vmul.f32 %v3954_v21, %v6430_v54  ;;  %v6442_v21 = vld [vmem:[#allocation77_spill] sm:$0xff] }
 0x664   : > { %v2351_v60 = vmul.f32 0.6931472, %v3956_v46  ;;  %2453 = vadd.xlane.f32.xlu0 %v2452_v5  ;;  %v5952_v25 = vpop.xlane.xlu1 %2775  ;;  %v5954_v18 = vpop.xlane.xlu0 %2781  ;;  %v2412_v17 = vmul.f32 %v2380_v23, %v646_v35  ;;  %v2413_v62 = vmul.f32 %v2381_v39, %v647_v31  ;;  %v6441_v35 = vld [vmem:[#allocation76_spill] sm:$0xff]  ;;  %v6443_v23 = vld [vmem:[#allocation35_spill] sm:$0xff]  ;;  %v654_v54 = vld [vmem:[%s4381_s20 + $0xf0] sm:$0xff] }
 0x665   : > { %2318 = vst [vmem:[%s5852_s13 + $0xc0] sm:$0xff] %v2286_v47  ;;  %2319 = vst [vmem:[%s5852_s13 + $0xc8] sm:$0xff] %v2287_v10  ;;  %v2853_v26 = vmul.f32 %v6443_v23, %v6443_v23  ;;  %v655_v10 = vld [vmem:[%s4381_s20 + $0xf8] sm:$0xff] }
 0x666   : > { %v3958_v43 = vpop.eup %3957  ;;  %v2382_v58 = vsub.f32 %v6431_v12, %v2351_v60  ;;  %v2383_v24 = vsub.f32 %v6432_v56, %v2351_v60  ;;  %v2455_v2 = vadd.f32 %v2413_v62, %v2412_v17  ;;  %v6444_v60 = vld [vmem:[#allocation66_spill] sm:$0xff]  ;;  %v6445_v62 = vld [vmem:[#allocation67_spill] sm:$0xff] }
 0x667   : > { %v3960_v29 = vpop.eup %3959  ;;  %v2288_v44 = vmul.f32 %v3958_v43, %v6433_v33  ;;  %v2289_v20 = vmul.f32 %v3958_v43, %v6434_v37  ;;  %v2869_v43 = vadd.f32 1.837877, %v2853_v26 }
 0x668   : > { %v2353_v36 = vmul.f32 0.6931472, %v3960_v29  ;;  %2456 = vadd.xlane.f32.xlu1 %v2455_v2  ;;  %v5964_v9 = vpop.xlane.xlu1 %2787  ;;  %v5966_v13 = vpop.xlane.xlu0 %2784  ;;  %v2414_v4 = vmul.f32 %v2382_v58, %v648_v3  ;;  %v2415_v6 = vmul.f32 %v2383_v24, %v649_v50 }
 0x669   : > { %2320 = vst [vmem:[%s5852_s13 + $0xd0] sm:$0xff] %v2288_v44  ;;  %2321 = vst [vmem:[%s5852_s13 + $0xd8] sm:$0xff] %v2289_v20  ;;  %v2915_v29 = vsel %vm1655_vm0, %v2869_v43, 0.0 }
 0x66a   : > { %v3962_v19 = vpop.eup %3961  ;;  %v2384_v52 = vsub.f32 %v6435_v51, %v2353_v36  ;;  %v2385_v49 = vsub.f32 %v6436_v0, %v2353_v36  ;;  %v2458_v42 = vadd.f32 %v2415_v6, %v2414_v4  ;;  %v2822_v6 = vmul.f32 -0.5, %v5952_v25 }
 0x66b   : > { %v3964_v22 = vpop.eup %3963  ;;  %v2290_v53 = vmul.f32 %v3962_v19, %v6437_v34  ;;  %v2291_v11 = vmul.f32 %v3962_v19, %v6438_v14  ;;  %v2823_v19 = vmul.f32 -0.5, %v5942_v28  ;;  %v2824_v0 = vmul.f32 -0.5, %v5954_v18 }
 0x66c   : > { %v2355_v48 = vmul.f32 0.6931472, %v3964_v22  ;;  %2459 = vadd.xlane.f32.xlu0 %v2458_v42  ;;  %v5976_v32 = vpop.xlane.xlu1 %2793  ;;  %v5978_v27 = vpop.xlane.xlu0 %2790  ;;  %v2416_v57 = vmul.f32 %v2384_v52, %v650_v1  ;;  %v2417_v45 = vmul.f32 %v2385_v49, %v651_v55  ;;  %v2825_v28 = vmul.f32 -0.5, %v5966_v13 }
 0x66d   : > { %2322 = vst [vmem:[%s5852_s13 + $0xe0] sm:$0xff] %v2290_v53  ;;  %2323 = vst [vmem:[%s5852_s13 + $0xe8] sm:$0xff] %v2291_v11  ;;  %v2826_v53 = vmul.f32 -0.5, %v5964_v9 }
 0x66e   : > { %v3966_v16 = vpop.eup %3965  ;;  %v2386_v40 = vsub.f32 %v6439_v38, %v2355_v48  ;;  %v2387_v7 = vsub.f32 %v6440_v61, %v2355_v48  ;;  %v2461_v59 = vadd.f32 %v2417_v45, %v2416_v57 }
 0x66f   : > { %v3968_v8 = vpop.eup %3967  ;;  %v2292_v31 = vmul.f32 %v3966_v16, %v6441_v35  ;;  %v2293_v41 = vmul.f32 %v3966_v16, %v6442_v21 }
 0x670   : > { %v2357_v39 = vmul.f32 0.6931472, %v3968_v8  ;;  %2462 = vadd.xlane.f32.xlu1 %v2461_v59  ;;  %v5990_v5 = vpop.xlane.xlu1 %2799  ;;  %v5992_v46 = vpop.xlane.xlu0 %2796  ;;  %v2418_v15 = vmul.f32 %v2386_v40, %v652_v30  ;;  %v2419_v47 = vmul.f32 %v2387_v7, %v653_v63  ;;  %v6044_v30 = vmul.f32 -0.5, %v5976_v32 }
 0x671   : > { %2324 = vst [vmem:[%s5852_s13 + $0xf0] sm:$0xff] %v2292_v31  ;;  %2325 = vst [vmem:[%s5852_s13 + $0xf8] sm:$0xff] %v2293_v41  ;;  %v6047_v63 = vmul.f32 -0.5, %v5978_v27 }
 0x672   : > { %v2388_v17 = vsub.f32 %v6444_v60, %v2357_v39  ;;  %v2389_v3 = vsub.f32 %v6445_v62, %v2357_v39  ;;  %v2464_v50 = vadd.f32 %v2419_v47, %v2418_v15 }
 0x674   : > { %2465 = vadd.xlane.f32.xlu0 %v2464_v50  ;;  %v6000_v12 = vpop.xlane.xlu1 %2805  ;;  %v6002_v58 = vpop.xlane.xlu0 %2802  ;;  %v2420_v56 = vmul.f32 %v2388_v17, %v654_v54  ;;  %v2421_v24 = vmul.f32 %v2389_v3, %v655_v10 }
 0x676   : > { %v2467_v2 = vadd.f32 %v2421_v24, %v2420_v56 }
 0x678   : > { %2468 = vadd.xlane.f32.xlu1 %v2467_v2  ;;  %2916 = vadd.xlane.f32.xlu0 %v2915_v29  ;;  %v6005_v33 = vpop.xlane.xlu1 %2811  ;;  %v6007_v44 = vpop.xlane.xlu0 %2808 }
 0x67c   : > { %v6009_v37 = vpop.xlane.xlu1 %2817  ;;  %v6011_v20 = vpop.xlane.xlu0 %2814 }
 0x680   : > { %v2872_v36 = vpop.xlane.xlu1 %2871  ;;  %v6013_v4 = vpop.xlane.xlu0 %2820 }
 0x681   : > { %v2918_v1 = vmul.f32 -0.5, %v2872_v36 }
 0x683   : > { %v2934_v55 = vsub.f32 %v2822_v6, %v2918_v1 }
 0x684   : > { %v2878_v51 = vpop.xlane.xlu1 %2877  ;;  %v2875_v52 = vpop.xlane.xlu0 %2874 }
 0x685   : > { %v2950_v49 = vmax.f32 %v2934_v55, 2.0  ;;  %v2920_v25 = vmul.f32 -0.5, %v2878_v51  ;;  %v2919_v42 = vmul.f32 -0.5, %v2875_v52 }
 0x687   : > { %2983 = vst.msk [vmem:[%s6020_s0] sm:$0xff] %vm2966_vm1, %v2950_v49  ;;  %v2936_v22 = vsub.f32 %v2824_v0, %v2920_v25  ;;  %v2935_v34 = vsub.f32 %v2823_v19, %v2919_v42 }
 0x688   : > { %v2884_v14 = vpop.xlane.xlu1 %2883  ;;  %v2881_v11 = vpop.xlane.xlu0 %2880 }
 0x689   : > { %v2952_v18 = vmax.f32 %v2936_v22, 2.0  ;;  %v2951_v48 = vmax.f32 %v2935_v34, 2.0  ;;  %v2922_v57 = vmul.f32 -0.5, %v2884_v14  ;;  %v2921_v45 = vmul.f32 -0.5, %v2881_v11 }
 0x68b   : > { %2985 = vst.msk [vmem:[%s6020_s0 + $0x10] sm:$0xff] %vm2966_vm1, %v2952_v18  ;;  %2984 = vst.msk [vmem:[%s6020_s0 + $0x8] sm:$0xff] %vm2966_vm1, %v2951_v48  ;;  %v2938_v9 = vsub.f32 %v2826_v53, %v2922_v57  ;;  %v2937_v13 = vsub.f32 %v2825_v28, %v2921_v45 }
 0x68c   : > { %v2890_v16 = vpop.xlane.xlu1 %2889  ;;  %v2887_v38 = vpop.xlane.xlu0 %2886 }
 0x68d   : > { %4038 = shalt.err (!%p4035_p9)
}
 0x68e   : > { %s4039_s20 = scalar_lea.hbm %s6034_s11, 4096  ;;  %s4043_s29 = scalar_lea.hbm %s6446_s18, 8192 }
 0x68f   : > { %p4040_p11 = scmp.ne.s32.totalorder %s6034_s11, %s4039_s20  ;;  %p4044_p8 = scmp.lt.s32.totalorder %s6034_s11, %s6446_s18 }
 0x690   : > { %p4045_p6 = scmp.lt.s32.totalorder %s4043_s29, %s4039_s20 }
 0x691   : > { %p4041_p3 = pnand %p4040_p11, %p6447_p12 }
 0x692   : > { %p4046_p13 = por %p4045_p6, %p4044_p8 }
 0x693   : > { %p4042_p5 = pneg %p4041_p3 }
 0x695   : > { %p4047_p1 = pnand %p4046_p13, %p4042_p5 }
 0x697   : > { %4050 = shalt.err (!%p4047_p1)
}
 0x698   : > { %s6287_s19 = smov 256   ;;  %s4133_s21 = smov 16   ;;  %v2954_v32 = vmax.f32 %v2938_v9, 2.0  ;;  %v2953_v27 = vmax.f32 %v2937_v13, 2.0  ;;  %v2924_v40 = vmul.f32 -0.5, %v2890_v16  ;;  %v2923_v61 = vmul.f32 -0.5, %v2887_v38 }
 0x699   : > { %s6448_s12 = scalar_lea.sflag [#allocation4], %s4366_s26  ;;  %s6449_s28 = sshll.u32 %s4231_s17, 12 }
 0x69a   : > { %3507 = dma.vmem_to_hbm [thread:$0]  (%p6447_p12), %s6037_s24, 4096, %s6034_s11, %s6448_s12, %s6287_s19, %s6287_s19, %s4133_s21   ;;  %v2940_v7 = vsub.f32 %v6044_v30, %v2924_v40  ;;  %v2939_v59 = vsub.f32 %v6047_v63, %v2923_v61 }
 0x69b   : > { %s6450_s27 = sld [smem:[#allocation80_spill]]  ;;  %s3046_s29 = sshll.u32 %s5852_s13, 4  ;;  %2987 = vst.msk [vmem:[%s6020_s0 + $0x20] sm:$0xff] %vm2966_vm1, %v2954_v32  ;;  %2986 = vst.msk [vmem:[%s6020_s0 + $0x18] sm:$0xff] %vm2966_vm1, %v2953_v27  ;;  %s6083_s29 = int_to_ptr.vmem [resolvable:$true] %s3046_s29 }
 0x69c   : > { %s3005_s17 = scalar_lea.sflag [#allocation9], %s4366_s26  ;;  %s4051_s11 = scalar_lea.vmem %s6083_s29, 4096 }
 0x69d   : > { %p4052_p7 = scmp.ne.s32.totalorder %s6083_s29, %s4051_s11  ;;  %s4134_s13 = smov [#allocation8]  }
 0x69e   : > { %s4055_s24 = sshll.u32 %s4134_s13, 4  ;;  %s4056_s24 = int_to_ptr.vmem [resolvable:$false] %s4055_s24 }
 0x69f   : > { %p4053_p10 = pnand %p4052_p7, %p6447_p12  ;;  %s4057_s12 = scalar_lea.vmem %s4056_s24, 8192 }
 0x6a0   : > { %p4058_p2 = scmp.lt.s32.totalorder %s6083_s29, %s4056_s24  ;;  %p4059_p4 = scmp.lt.s32.totalorder %s4057_s12, %s4051_s11 }
 0x6a1   : > { %s6080_s22 = scalar_lea.hbm %s6450_s27, %s6449_s28  ;;  %p4054_p0 = pneg %p4053_p10 }
 0x6a2   : > { %p4060_p9 = por %p4059_p4, %p4058_p2 }
 0x6a4   : > { %p4061_p11 = pnand %p4060_p9, %p4054_p0 }
 0x6a6   : > { %4064 = shalt.err (!%p4061_p11)
}
 0x6a7   : > { %s4065_s28 = scalar_lea.hbm %s6080_s22, 4096  ;;  %s4069_s20 = scalar_lea.hbm %s6450_s27, 8192 }
 0x6a8   : > { %p4066_p3 = scmp.ne.s32.totalorder %s6080_s22, %s4065_s28  ;;  %p4070_p6 = scmp.lt.s32.totalorder %s6080_s22, %s6450_s27 }
 0x6a9   : > { %p4071_p13 = scmp.lt.s32.totalorder %s4069_s20, %s4065_s28 }
 0x6aa   : > { %p4067_p5 = pnand %p4066_p3, %p6447_p12 }
 0x6ab   : > { %p4072_p1 = por %p4071_p13, %p4070_p6 }
 0x6ac   : > { %p4068_p8 = pneg %p4067_p5 }
 0x6ae   : > { %p4073_p7 = pnand %p4072_p1, %p4068_p8 }
 0x6b0   : > { %4076 = shalt.err (!%p4073_p7)
}
 0x6b1   : > { %s6451_s11 = smov 256   ;;  %v2830_v8 = vmul.f32 -0.5, %v5990_v5  ;;  %v2829_v35 = vmul.f32 -0.5, %v5992_v46  ;;  %v2896_v31 = vpop.xlane.xlu1 %2895  ;;  %v2893_v21 = vpop.xlane.xlu0 %2892  ;;  %v2956_v41 = vmax.f32 %v2940_v7, 2.0  ;;  %v2955_v23 = vmax.f32 %v2939_v59, 2.0 }
 0x6b2   : > { %3508 = dma.vmem_to_hbm [thread:$0]  (%p6447_p12), %s6083_s29, 4096, %s6080_s22, %s3005_s17, %s6451_s11, %s6451_s11, %s4133_s21   ;;  %v2926_v26 = vmul.f32 -0.5, %v2896_v31  ;;  %v2925_v39 = vmul.f32 -0.5, %v2893_v21  ;;  %v2832_v54 = vmul.f32 -0.5, %v6000_v12  ;;  %v2831_v5 = vmul.f32 -0.5, %v6002_v58 }
 0x6b3   : > { %2989 = vst.msk [vmem:[%s6020_s0 + $0x30] sm:$0xff] %vm2966_vm1, %v2956_v41  ;;  %2988 = vst.msk [vmem:[%s6020_s0 + $0x28] sm:$0xff] %vm2966_vm1, %v2955_v23  ;;  %v2834_v56 = vmul.f32 -0.5, %v6005_v33  ;;  %v2833_v12 = vmul.f32 -0.5, %v6007_v44  ;;  %v2836_v33 = vmul.f32 -0.5, %v6009_v37  ;;  %v2835_v44 = vmul.f32 -0.5, %v6011_v20 }
 0x6b4   : > { %v2942_v15 = vsub.f32 %v2830_v8, %v2926_v26  ;;  %v2941_v47 = vsub.f32 %v2829_v35, %v2925_v39  ;;  %s6452_s21 = sld [smem:[#allocation81_spill]] }
 0x6b5   : > { %v2902_v10 = vpop.xlane.xlu1 %2901  ;;  %v2899_v46 = vpop.xlane.xlu0 %2898 }
 0x6b6   : > { %v2958_v60 = vmax.f32 %v2942_v15, 2.0  ;;  %v2957_v17 = vmax.f32 %v2941_v47, 2.0  ;;  %v2928_v62 = vmul.f32 -0.5, %v2902_v10  ;;  %v2927_v3 = vmul.f32 -0.5, %v2899_v46 }
 0x6b8   : > { %2991 = vst.msk [vmem:[%s6020_s0 + $0x40] sm:$0xff] %vm2966_vm1, %v2958_v60  ;;  %2990 = vst.msk [vmem:[%s6020_s0 + $0x38] sm:$0xff] %vm2966_vm1, %v2957_v17  ;;  %v2944_v50 = vsub.f32 %v2832_v54, %v2928_v62  ;;  %v2943_v43 = vsub.f32 %v2831_v5, %v2927_v3  ;;  %v2837_v5 = vmul.f32 -0.5, %v6013_v4 }
 0x6b9   : > { %v2908_v24 = vpop.xlane.xlu1 %2907  ;;  %v2905_v58 = vpop.xlane.xlu0 %2904 }
 0x6ba   : > { %v2960_v2 = vmax.f32 %v2944_v50, 2.0  ;;  %v2959_v29 = vmax.f32 %v2943_v43, 2.0  ;;  %v2930_v36 = vmul.f32 -0.5, %v2908_v24  ;;  %v2929_v6 = vmul.f32 -0.5, %v2905_v58  ;;  %s6147_s22 = scalar_lea.vmem %s6452_s21, %s5098_s15 }
 0x6bc   : > { %2993 = vst.msk [vmem:[%s6020_s0 + $0x50] sm:$0xff] %vm2966_vm1, %v2960_v2  ;;  %2992 = vst.msk [vmem:[%s6020_s0 + $0x48] sm:$0xff] %vm2966_vm1, %v2959_v29  ;;  %v2946_v1 = vsub.f32 %v2834_v56, %v2930_v36  ;;  %v2945_v55 = vsub.f32 %v2833_v12, %v2929_v6 }
 0x6bd   : > { %v2914_v19 = vpop.xlane.xlu1 %2913  ;;  %v2911_v51 = vpop.xlane.xlu0 %2910 }
 0x6be   : > { %v2962_v52 = vmax.f32 %v2946_v1, 2.0  ;;  %v2961_v0 = vmax.f32 %v2945_v55, 2.0  ;;  %v2932_v49 = vmul.f32 -0.5, %v2914_v19  ;;  %v2931_v25 = vmul.f32 -0.5, %v2911_v51 }
 0x6c0   : > { %2995 = vst.msk [vmem:[%s6020_s0 + $0x60] sm:$0xff] %vm2966_vm1, %v2962_v52  ;;  %2994 = vst.msk [vmem:[%s6020_s0 + $0x58] sm:$0xff] %vm2966_vm1, %v2961_v0  ;;  %v2948_v42 = vsub.f32 %v2836_v33, %v2932_v49  ;;  %v2947_v22 = vsub.f32 %v2835_v44, %v2931_v25 }
 0x6c2   : > { %v2964_v34 = vmax.f32 %v2948_v42, 2.0  ;;  %v2963_v53 = vmax.f32 %v2947_v22, 2.0 }
 0x6c4   : > { %2997 = vst.msk [vmem:[%s6020_s0 + $0x70] sm:$0xff] %vm2966_vm1, %v2964_v34  ;;  %2996 = vst.msk [vmem:[%s6020_s0 + $0x68] sm:$0xff] %vm2966_vm1, %v2963_v53 }
 0x6c5   : > { %v2424_v37 = vpop.xlane.xlu0 %2423 }
 0x6c6   : > { %v2470_v20 = vsub.f32 0.0, %v2424_v37 }
 0x6c8   : > { %2967 = vst.msk [vmem:[%s6147_s22] sm:$0xff] %vm2966_vm1, %v2470_v20 }
 0x6c9   : > { %v2427_v28 = vpop.xlane.xlu1 %2426 }
 0x6ca   : > { %v2471_v14 = vsub.f32 0.0, %v2427_v28 }
 0x6cc   : > { %2968 = vst.msk [vmem:[%s6147_s22 + $0x8] sm:$0xff] %vm2966_vm1, %v2471_v14 }
 0x6cd   : > { %v2430_v11 = vpop.xlane.xlu0 %2429 }
 0x6ce   : > { %v2472_v18 = vsub.f32 0.0, %v2430_v11 }
 0x6d0   : > { %2969 = vst.msk [vmem:[%s6147_s22 + $0x10] sm:$0xff] %vm2966_vm1, %v2472_v18 }
 0x6d1   : > { %v2433_v48 = vpop.xlane.xlu1 %2432 }
 0x6d2   : > { %v2473_v57 = vsub.f32 0.0, %v2433_v48 }
 0x6d4   : > { %2970 = vst.msk [vmem:[%s6147_s22 + $0x18] sm:$0xff] %vm2966_vm1, %v2473_v57 }
 0x6d5   : > { %v2436_v45 = vpop.xlane.xlu0 %2435 }
 0x6d6   : > { %v2474_v9 = vsub.f32 0.0, %v2436_v45 }
 0x6d8   : > { %2971 = vst.msk [vmem:[%s6147_s22 + $0x20] sm:$0xff] %vm2966_vm1, %v2474_v9 }
 0x6d9   : > { %v2439_v13 = vpop.xlane.xlu1 %2438 }
 0x6da   : > { %v2475_v30 = vsub.f32 0.0, %v2439_v13 }
 0x6dc   : > { %2972 = vst.msk [vmem:[%s6147_s22 + $0x28] sm:$0xff] %vm2966_vm1, %v2475_v30 }
 0x6dd   : > { %v2442_v63 = vpop.xlane.xlu0 %2441 }
 0x6de   : > { %v2476_v16 = vsub.f32 0.0, %v2442_v63 }
 0x6e0   : > { %2973 = vst.msk [vmem:[%s6147_s22 + $0x30] sm:$0xff] %vm2966_vm1, %v2476_v16 }
 0x6e1   : > { %v2445_v38 = vpop.xlane.xlu1 %2444 }
 0x6e2   : > { %v2477_v32 = vsub.f32 0.0, %v2445_v38 }
 0x6e4   : > { %2974 = vst.msk [vmem:[%s6147_s22 + $0x38] sm:$0xff] %vm2966_vm1, %v2477_v32 }
 0x6e5   : > { %v2448_v27 = vpop.xlane.xlu0 %2447 }
 0x6e6   : > { %v2478_v40 = vsub.f32 0.0, %v2448_v27 }
 0x6e8   : > { %2975 = vst.msk [vmem:[%s6147_s22 + $0x40] sm:$0xff] %vm2966_vm1, %v2478_v40 }
 0x6e9   : > { %v2451_v61 = vpop.xlane.xlu1 %2450 }
 0x6ea   : > { %v2479_v7 = vsub.f32 0.0, %v2451_v61 }
 0x6ec   : > { %2976 = vst.msk [vmem:[%s6147_s22 + $0x48] sm:$0xff] %vm2966_vm1, %v2479_v7 }
 0x6ed   : > { %v2454_v59 = vpop.xlane.xlu0 %2453 }
 0x6ee   : > { %v2480_v8 = vsub.f32 0.0, %v2454_v59 }
 0x6f0   : > { %2977 = vst.msk [vmem:[%s6147_s22 + $0x50] sm:$0xff] %vm2966_vm1, %v2480_v8 }
 0x6f1   : > { %v2457_v35 = vpop.xlane.xlu1 %2456 }
 0x6f2   : > { %v2481_v31 = vsub.f32 0.0, %v2457_v35 }
 0x6f4   : > { %2978 = vst.msk [vmem:[%s6147_s22 + $0x58] sm:$0xff] %vm2966_vm1, %v2481_v31 }
 0x6f5   : > { %v2460_v21 = vpop.xlane.xlu0 %2459 }
 0x6f6   : > { %v2482_v41 = vsub.f32 0.0, %v2460_v21 }
 0x6f8   : > { %2979 = vst.msk [vmem:[%s6147_s22 + $0x60] sm:$0xff] %vm2966_vm1, %v2482_v41 }
 0x6f9   : > { %v2463_v23 = vpop.xlane.xlu1 %2462 }
 0x6fa   : > { %v2483_v26 = vsub.f32 0.0, %v2463_v23 }
 0x6fc   : > { %2980 = vst.msk [vmem:[%s6147_s22 + $0x68] sm:$0xff] %vm2966_vm1, %v2483_v26 }
 0x6fd   : > { %v2466_v39 = vpop.xlane.xlu0 %2465 }
 0x6fe   : > { %v2484_v15 = vsub.f32 0.0, %v2466_v39 }
 0x700   : > { %2981 = vst.msk [vmem:[%s6147_s22 + $0x70] sm:$0xff] %vm2966_vm1, %v2484_v15 }
 0x701   : > { %v2469_v47 = vpop.xlane.xlu1 %2468  ;;  %v2917_v54 = vpop.xlane.xlu0 %2916 }
 0x702   : > { %v2485_v10 = vsub.f32 0.0, %v2469_v47  ;;  %v2933_v46 = vmul.f32 -0.5, %v2917_v54 }
 0x704   : > { %2982 = vst.msk [vmem:[%s6147_s22 + $0x78] sm:$0xff] %vm2966_vm1, %v2485_v10  ;;  %v2949_v60 = vsub.f32 %v2837_v5, %v2933_v46 }
 0x706   : > { %v2965_v17 = vmax.f32 %v2949_v60, 2.0 }
 0x708   : > { %2998 = vst.msk [vmem:[%s6020_s0 + $0x78] sm:$0xff] %vm2966_vm1, %v2965_v17 }
 0x709 PF: > { %s6453_s15 = sld [smem:[#allocation14_spill]]  ;;  %p6456_p10 = scmp.ge.s32.totalorder %s4123_s16, 2 }
 0x70a   : > { %s6454_s29 = sld [smem:[#allocation18_spill]] }
 0x70f   : > { %s3069_s17 = sand.u32 1, %s6453_s15  }
 0x710   : > { %p6455_p12 = scmp.ne.s32.totalorder %s6454_s29, 0  ;;  %s3070_s24 = scalar_lea.sflag [#allocation4], %s3069_s17 }
 0x712   : > { %p3519_p0 = pnand %p6456_p10, %p6455_p12 }
 0x714   : > { %p3520_p2 = pneg %p3519_p0 }
 0x716   : > { %4102 = dma.done.wait (%p3520_p2), %s3070_s24, 4096  }
 0x717   : > { %4104 = vsyncadd (%p3520_p2), %s3070_s24, 4294963200  ;;  %s3079_s12 = scalar_lea.sflag [#allocation9], %s3069_s17 }
 0x718   : > { %4106 = dma.done.wait (%p3520_p2), %s3079_s12, 4096  }
 0x719   : > { %4108 = vsyncadd (%p3520_p2), %s3079_s12, 4294963200  ;;  %s6457_s16 = sld [smem:[#allocation16_spill]]  ;;  %s6460_s29 = smov %s4115_s30 }
 0x71a   : > { %s6458_s28 = sld [smem:[#allocation15_spill]] }
 0x71b   : > { %s6459_s15 = sld [smem:[#allocation17_spill]] }
 0x71f   : > { %p34_p4 = scmp.ge.s32.totalorder %s6457_s16, 4  }
 0x720   : > { %s6461_s30 = smov %s6458_s28 }
 0x721   :  { %36 = sbr.rel (!%p34_p4) target bundleno = 14 (0xe), region = 166 }
 0x726   :  { %3100 = vsyncpa [#allocation3], 1 }
 0x727   :  { %3102 = vsyncpa [#allocation3 + $0x1], 1 }
 0x728   :  { %3103 = vsyncpa [#allocation6], 1 }
 0x729   :  { %3105 = vsyncpa [#allocation6 + $0x1], 1 }
 0x72a   :  { %3106 = vsyncpa [#allocation4], 1 }
 0x72b   :  { %3108 = vsyncpa [#allocation4 + $0x1], 1 }
 0x72c   :  { %3109 = vsyncpa [#allocation9], 1 }
 0x72d   :  { %3111 = vsyncpa [#allocation9 + $0x1], 1 }

</bundles_post_ra>
